<compile_context>
chip_gen: v5e
topology: v5e:2x2
jax: 0.10.0
libtpu: 0.0.40
codegen_flags: <defaults>
</compile_context>

<pallas_src>
import math
import functools

import jax
import jax.numpy as jnp
from jax.experimental import pallas as pl
from jax.experimental.pallas import tpu as pltpu

EPS = 1e-6
COMPUTE_DTYPE = jnp.bfloat16   # MXU-native operand format; accumulation in f32


# ------------------------------ kernel helpers --------------------------------

def _layernorm(x):
    # quirky LayerNormalisation: (x - mean) / sqrt(std + eps) * 1.0 + 1.0,
    # std with ddof=1 (faithful to the PyTorch reference).
    d = x.shape[-1]
    mean = jnp.mean(x, axis=-1, keepdims=True)
    var = jnp.sum((x - mean) ** 2, axis=-1, keepdims=True) * (1.0 / (d - 1))
    std = jnp.sqrt(var)
    return (x - mean) * jax.lax.rsqrt(std + EPS) + 1.0   # rsqrt -> EUP slot


def _split_heads(t2d, h, width):
    # (S, h*width) -> (h, S, width): static lane slices + a major-axis stack.
    # No activation broadcast, no lane-dim reshape of the whole tensor.
    return jnp.stack([t2d[:, i * width:(i + 1) * width] for i in range(h)], axis=0)


def _attend(q, k, v, wo, bo, scale, h):
    # q: (h, Sq, d_k) bf16, k/v: (h, Skv, d_k) bf16, wo: (D, D) bf16, bo: (1, D) f32
    c = COMPUTE_DTYPE
    # TODO(synk): at long S tile the query dimension (flash-style) so the f32
    # score tensor is (h, tile_q, S_kv) and stays inside v7x's 64 MiB VMEM.
    s = jnp.einsum('hqc,hkc->hqk', q, k, preferred_element_type=jnp.float32) * scale
    s = s - jnp.max(s, axis=-1, keepdims=True)
    p = jnp.exp(s)                                       # f32 (h, Sq, Skv)
    denom = jnp.sum(p, axis=-1, keepdims=True)           # f32 (h, Sq, 1)
    o = jnp.einsum('hqk,hkc->hqc', p.astype(c), v,
                   preferred_element_type=jnp.float32)   # f32 (h, Sq, d_k)
    # deferred softmax normalization: multiply into the small (h,Sq,d_k) output.
    # NOTE: approx=True reciprocal => rows don't sum to exactly 1 (see tolerances).
    o = (o * pl.reciprocal(denom, approx=True)).astype(c)
    # merge heads along lanes (head-major, matches torch .view(h*d_k)); one
    # full-K output projection instead of h thin matmuls + cross-head sum.
    o2d = jnp.concatenate([o[i] for i in range(h)], axis=-1)        # (Sq, D) bf16
    return jnp.dot(o2d, wo, preferred_element_type=jnp.float32) + bo


def _self_attention(n, wqkv, bqkv, wo, bo, *, h, d_k, scale):
    c = COMPUTE_DTYPE
    # one fused (D, 3D) projection: full MXU width, single pass over the weights
    qkv = (jnp.dot(n.astype(c), wqkv, preferred_element_type=jnp.float32)
           + bqkv).astype(c)                              # (S, 3D) bf16 (cast once)
    qkv_h = _split_heads(qkv, h, 3 * d_k)                 # (h, S, 3*d_k)
    q = qkv_h[:, :, :d_k]
    k = qkv_h[:, :, d_k:2 * d_k]
    v = qkv_h[:, :, 2 * d_k:]
    return _attend(q, k, v, wo, bo, scale, h)


def _cross_attention(n, enc, wq, bq, wkv, bkv, wo, bo, *, h, d_k, scale):
    c = COMPUTE_DTYPE
    q2 = (jnp.dot(n.astype(c), wq, preferred_element_type=jnp.float32)
          + bq).astype(c)                                 # (S, D)
    kv2 = (jnp.dot(enc.astype(c), wkv, preferred_element_type=jnp.float32)
           + bkv).astype(c)                               # (Se, 2D), fused K/V
    q = _split_heads(q2, h, d_k)                          # (h, S, d_k)
    kv = _split_heads(kv2, h, 2 * d_k)                    # (h, Se, 2*d_k)
    k = kv[:, :, :d_k]
    v = kv[:, :, d_k:]
    return _attend(q, k, v, wo, bo, scale, h)


# ---------------------------------- kernel ------------------------------------

def decoder_block_kernel(x_ref, enc_ref,
                         wqkv1, bqkv1, wo1, bo1,
                         wq2, bq2, wkv2, bkv2, wo2, bo2,
                         w1, b1, w2, b2,
                         o_ref, *, h, d_k, scale):
    c = COMPUTE_DTYPE
    x = x_ref[0].astype(jnp.float32)   # residual stream kept in f32
    enc = enc_ref[0]                   # (Se, D) bf16 (matmul operand only)

    # residual 0: self-attention (tgt_mask is a no-op in the reference; dropout=id)
    n = _layernorm(x)
    x = x + _self_attention(n, wqkv1[...], bqkv1[...], wo1[...], bo1[...],
                            h=h, d_k=d_k, scale=scale)

    # residual 1: cross-attention with encoder output (src_mask no-op)
    n = _layernorm(x)
    x = x + _cross_attention(n, enc, wq2[...], bq2[...], wkv2[...], bkv2[...],
                             wo2[...], bo2[...], h=h, d_k=d_k, scale=scale)

    # residual 2: feed-forward  relu(n W1 + b1) W2 + b2
    # TODO(synk): at realistic D_ff, stream w1/w2 over d_ff chunks
    # (memory_space=pl.ANY + pltpu.emit_pipeline) instead of full residency.
    n = _layernorm(x)
    hdn = jnp.maximum(
        jnp.dot(n.astype(c), w1[...], preferred_element_type=jnp.float32) + b1[...],
        0.0)
    x = x + jnp.dot(hdn.astype(c), w2[...],
                    preferred_element_type=jnp.float32) + b2[...]

    o_ref[0] = x.astype(o_ref.dtype)


# --------------------------------- wrapper -------------------------------------

def _per_head(w, h, d_k):
    # (D, h*d_k) -> (h, D, d_k) head split, done in plain JAX (wrapper-side).
    d = w.shape[0]
    return jnp.transpose(w.reshape(d, h, d_k), (1, 0, 2))


def _fuse_w(ws, h, d_k):
    # list of (D, h*d_k) -> (D, h*len(ws)*d_k), columns head-major, within each
    # head the parts are concatenated (e.g. [q|k|v]).
    parts = [_per_head(w, h, d_k) for w in ws]            # each (h, D, d_k)
    fused = jnp.concatenate(parts, axis=-1)               # (h, D, n*d_k)
    d = ws[0].shape[0]
    return jnp.transpose(fused, (1, 0, 2)).reshape(d, h * len(ws) * d_k)


def _fuse_b(bs, h, d_k):
    parts = [jnp.transpose(b.reshape(1, h, d_k), (1, 0, 2)) for b in bs]  # (h,1,d_k)
    fused = jnp.concatenate(parts, axis=-1)               # (h, 1, n*d_k)
    return jnp.transpose(fused, (1, 0, 2)).reshape(1, h * len(bs) * d_k)


def _vmem_limit_bytes():
    # Review: raise above the 32 MiB scoped default on 128-MiB chips (v5e/v6e),
    # stay <= ~48 MiB on v7x (64 MiB physical).
    try:
        cap = pltpu.get_tpu_info().vmem_capacity_bytes
    except Exception:
        cap = 64 * 1024 * 1024   # conservative fallback (v7x-sized)
    return min(64 * 1024 * 1024, (3 * cap) // 4)


def decoder_block(x, enc, params, h):
    (wq1, bq1, wk1, bk1, wv1, bv1, wo1, bo1,
     wq2, bq2, wk2, bk2, wv2, bv2, wo2, bo2,
     w1, b1, w2, b2) = params
    B, S, D = x.shape
    _, Se, _ = enc.shape
    d_k = D // h
    d_ff = w1.shape[1]
    scale = 1.0 / math.sqrt(d_k)
    c = COMPUTE_DTYPE

    # Fused, head-major weight layout; bf16 matmul operands, f32 biases.
    kparams = (
        _fuse_w([wq1, wk1, wv1], h, d_k).astype(c),        # wqkv1 (D, 3D)
        _fuse_b([bq1, bk1, bv1], h, d_k).astype(jnp.float32),
        wo1.astype(c), bo1.astype(jnp.float32),
        wq2.astype(c), bq2.astype(jnp.float32),            # already head-major
        _fuse_w([wk2, wv2], h, d_k).astype(c),             # wkv2 (D, 2D)
        _fuse_b([bk2, bv2], h, d_k).astype(jnp.float32),
        wo2.astype(c), bo2.astype(jnp.float32),
        w1.astype(c), b1.astype(jnp.float32),
        w2.astype(c), b2.astype(jnp.float32),
    )

    # bf16 activations at the boundary (halves input DMA; f32 math inside).
    x_c = x.astype(c)
    enc_c = enc.astype(c)

    kernel = functools.partial(decoder_block_kernel, h=h, d_k=d_k, scale=scale)

    def weight_spec(shape):
        nd = len(shape)
        # TODO(synk): single-buffer these grid-invariant blocks with
        # pipeline_mode=pl.Buffered(1) when VMEM-constrained (v7x, large D/D_ff).
        return pl.BlockSpec(shape, lambda b, _nd=nd: (0,) * _nd)

    in_specs = [
        pl.BlockSpec((1, S, D), lambda b: (b, 0, 0)),      # x: one batch row
        pl.BlockSpec((1, Se, D), lambda b: (b, 0, 0)),     # encoder output
    ] + [weight_spec(p.shape) for p in kparams]

    # advisory cost estimate so XLA schedules sensibly around the custom call
    flops = int(B * (12 * S * D * D + 4 * Se * D * D
                     + 4 * S * S * D + 4 * S * Se * D + 4 * S * D * d_ff))
    transcendentals = int(B * (h * S * (S + Se) + 8 * S))
    bytes_accessed = int(
        x_c.size * x_c.dtype.itemsize + enc_c.size * enc_c.dtype.itemsize
        + sum(int(p.size) * p.dtype.itemsize for p in kparams)
        + B * S * D * 4)

    return pl.pallas_call(
        kernel,
        out_shape=jax.ShapeDtypeStruct((B, S, D), jnp.float32),
        grid=(B,),
        in_specs=in_specs,
        out_specs=pl.BlockSpec((1, S, D), lambda b: (b, 0, 0)),
        compiler_params=pltpu.CompilerParams(
            # TODO(synk): for v7x with B in {1,2}, add a second "parallel" axis
            # (query tiles) so both TensorCores get balanced work.
            dimension_semantics=("parallel",),
            vmem_limit_bytes=_vmem_limit_bytes()),
        cost_estimate=pl.CostEstimate(flops=flops,
                                      transcendentals=transcendentals,
                                      bytes_accessed=bytes_accessed),
    )(x_c, enc_c, *kparams)


# -------------------------------- reference ------------------------------------
# Pure f32 JAX reference with the original (un-split) parameter layout.

def _ref_layernorm(x):
    d = x.shape[-1]
    mean = jnp.mean(x, axis=-1, keepdims=True)
    var = jnp.sum((x - mean) ** 2, axis=-1, keepdims=True) / (d - 1)
    std = jnp.sqrt(var)
    return (x - mean) / jnp.sqrt(std + EPS) + 1.0


def _ref_mha(xq, xkv, wq, bq, wk, bk, wv, bv, wo, bo, h, d_k):
    q = xq @ wq + bq
    k = xkv @ wk + bk
    v = xkv @ wv + bv
    scale = 1.0 / math.sqrt(d_k)
    outs = []
    for hd in range(h):
        lo = hd * d_k
        s = (q[:, lo:lo + d_k] @ k[:, lo:lo + d_k].T) * scale
        p = jax.nn.softmax(s, axis=-1)
        outs.append(p @ v[:, lo:lo + d_k])
    o = jnp.concatenate(outs, axis=-1)
    return o @ wo + bo


def _ref_one(x, enc, params, h):
    (wq1, bq1, wk1, bk1, wv1, bv1, wo1, bo1,
     wq2, bq2, wk2, bk2, wv2, bv2, wo2, bo2,
     w1, b1, w2, b2) = params
    d_k = x.shape[-1] // h
    n = _ref_layernorm(x)
    x = x + _ref_mha(n, n, wq1, bq1, wk1, bk1, wv1, bv1, wo1, bo1, h, d_k)
    n = _ref_layernorm(x)
    x = x + _ref_mha(n, enc, wq2, bq2, wk2, bk2, wv2, bv2, wo2, bo2, h, d_k)
    n = _ref_layernorm(x)
    hdn = jnp.maximum(n @ w1 + b1, 0.0)
    return x + hdn @ w2 + b2


# ----------------------------------- main ---------------------------------------

def _make_linear(key, d_in, d_out):
    kw, kb = jax.random.split(key)
    bound = 1.0 / math.sqrt(d_in)
    w = jax.random.uniform(kw, (d_in, d_out), jnp.float32, -bound, bound)
    b = jax.random.uniform(kb, (1, d_out), jnp.float32, -bound, bound)
    return w, b


if __name__ == "__main__":
    # Small but lane-dense shapes (review item: d_k multiple of 128, D/D_ff
    # multiples of 128) so matmuls/stores are unmasked and MXU-friendly.
    B, S, S_enc = 2, 16, 8
    D, D_FF, H = 256, 512, 2        # d_k = 128

    root = jax.random.PRNGKey(0)
    kx, kenc, kparams_key = jax.random.split(root, 3)
    x = jax.random.normal(kx, (B, S, D), jnp.float32)
    enc_out = jax.random.normal(kenc, (B, S_enc, D), jnp.float32)

    pkeys = jax.random.split(kparams_key, 10)
    # self-attention: w_q, w_k, w_v, w_o
    wq1, bq1 = _make_linear(pkeys[0], D, D)
    wk1, bk1 = _make_linear(pkeys[1], D, D)
    wv1, bv1 = _make_linear(pkeys[2], D, D)
    wo1, bo1 = _make_linear(pkeys[3], D, D)
    # cross-attention: w_q, w_k, w_v, w_o
    wq2, bq2 = _make_linear(pkeys[4], D, D)
    wk2, bk2 = _make_linear(pkeys[5], D, D)
    wv2, bv2 = _make_linear(pkeys[6], D, D)
    wo2, bo2 = _make_linear(pkeys[7], D, D)
    # feed-forward
    w1, b1 = _make_linear(pkeys[8], D, D_FF)
    w2, b2 = _make_linear(pkeys[9], D_FF, D)

    params = (wq1, bq1, wk1, bk1, wv1, bv1, wo1, bo1,
              wq2, bq2, wk2, bk2, wv2, bv2, wo2, bo2,
              w1, b1, w2, b2)

    out = decoder_block(x, enc_out, params, h=H)
    out = jax.block_until_ready(out)

    ref = jax.vmap(lambda xb, eb: _ref_one(xb, eb, params, H))(x, enc_out)
    assert out.shape == (B, S, D)

    # bf16 matmul operands (f32 accumulation) + approx softmax reciprocal ->
    # tolerance looser than pure f32.
    max_abs = float(jnp.max(jnp.abs(out - ref)))
    rel = float(jnp.linalg.norm(out - ref) / jnp.linalg.norm(ref))
    assert max_abs < 1e-1 and rel < 3e-2, (max_abs, rel)

    print("KERNEL_OK")
</pallas_src>

<mosaic_0001>
module attributes {stable_mosaic.version = 11 : i64} {
  func.func @decoder_block_kernel(%arg0: i32, %arg1: memref<1x16x256xbf16, #tpu.memory_space<vmem>>, %arg2: memref<1x8x256xbf16, #tpu.memory_space<vmem>>, %arg3: memref<256x768xbf16, #tpu.memory_space<vmem>>, %arg4: memref<1x768xf32, #tpu.memory_space<vmem>>, %arg5: memref<256x256xbf16, #tpu.memory_space<vmem>>, %arg6: memref<1x256xf32, #tpu.memory_space<vmem>>, %arg7: memref<256x256xbf16, #tpu.memory_space<vmem>>, %arg8: memref<1x256xf32, #tpu.memory_space<vmem>>, %arg9: memref<256x512xbf16, #tpu.memory_space<vmem>>, %arg10: memref<1x512xf32, #tpu.memory_space<vmem>>, %arg11: memref<256x256xbf16, #tpu.memory_space<vmem>>, %arg12: memref<1x256xf32, #tpu.memory_space<vmem>>, %arg13: memref<256x512xbf16, #tpu.memory_space<vmem>>, %arg14: memref<1x512xf32, #tpu.memory_space<vmem>>, %arg15: memref<512x256xbf16, #tpu.memory_space<vmem>>, %arg16: memref<1x256xf32, #tpu.memory_space<vmem>>, %arg17: memref<1x16x256xf32, #tpu.memory_space<vmem>>) attributes {dimension_semantics = [#tpu.dimension_semantics<parallel>], iteration_bounds = array<i64: 2>, scalar_prefetch = 0 : i64, scratch_operands = 0 : i64, tpu.core_type = #tpu.core_type<tc>, window_params = [{transform_indices = @transform_0, window_bounds = array<i64: 1, 16, 256>}, {transform_indices = @transform_1, window_bounds = array<i64: 1, 8, 256>}, {pipeline_mode = #tpu.pipeline_mode<synchronous>, transform_indices = @transform_2, window_bounds = array<i64: 256, 768>}, {pipeline_mode = #tpu.pipeline_mode<synchronous>, transform_indices = @transform_3, window_bounds = array<i64: 1, 768>}, {pipeline_mode = #tpu.pipeline_mode<synchronous>, transform_indices = @transform_4, window_bounds = array<i64: 256, 256>}, {pipeline_mode = #tpu.pipeline_mode<synchronous>, transform_indices = @transform_5, window_bounds = array<i64: 1, 256>}, {pipeline_mode = #tpu.pipeline_mode<synchronous>, transform_indices = @transform_6, window_bounds = array<i64: 256, 256>}, {pipeline_mode = #tpu.pipeline_mode<synchronous>, transform_indices = @transform_7, window_bounds = array<i64: 1, 256>}, {pipeline_mode = #tpu.pipeline_mode<synchronous>, transform_indices = @transform_8, window_bounds = array<i64: 256, 512>}, {pipeline_mode = #tpu.pipeline_mode<synchronous>, transform_indices = @transform_9, window_bounds = array<i64: 1, 512>}, {pipeline_mode = #tpu.pipeline_mode<synchronous>, transform_indices = @transform_10, window_bounds = array<i64: 256, 256>}, {pipeline_mode = #tpu.pipeline_mode<synchronous>, transform_indices = @transform_11, window_bounds = array<i64: 1, 256>}, {pipeline_mode = #tpu.pipeline_mode<synchronous>, transform_indices = @transform_12, window_bounds = array<i64: 256, 512>}, {pipeline_mode = #tpu.pipeline_mode<synchronous>, transform_indices = @transform_13, window_bounds = array<i64: 1, 512>}, {pipeline_mode = #tpu.pipeline_mode<synchronous>, transform_indices = @transform_14, window_bounds = array<i64: 512, 256>}, {pipeline_mode = #tpu.pipeline_mode<synchronous>, transform_indices = @transform_15, window_bounds = array<i64: 1, 256>}, {transform_indices = @transform_16, window_bounds = array<i64: 1, 16, 256>}]} {
    %c0 = arith.constant 0 : index
    %c0_0 = arith.constant 0 : index
    %c0_1 = arith.constant 0 : index
    %0 = vector.load %arg1[%c0, %c0_0, %c0_1] : memref<1x16x256xbf16, #tpu.memory_space<vmem>>, vector<1x16x256xbf16>
    %1 = vector.shape_cast %0 : vector<1x16x256xbf16> to vector<16x256xbf16>
    %2 = arith.extf %1 : vector<16x256xbf16> to vector<16x256xf32>
    %c0_2 = arith.constant 0 : index
    %c0_3 = arith.constant 0 : index
    %c0_4 = arith.constant 0 : index
    %3 = vector.load %arg2[%c0_2, %c0_3, %c0_4] : memref<1x8x256xbf16, #tpu.memory_space<vmem>>, vector<1x8x256xbf16>
    %4 = vector.shape_cast %3 : vector<1x8x256xbf16> to vector<8x256xbf16>
    %cst = arith.constant dense<0.000000e+00> : vector<16xf32>
    %5 = vector.multi_reduction <add>, %2, %cst [1] : vector<16x256xf32> to vector<16xf32>
    %6 = vector.shape_cast %5 : vector<16xf32> to vector<16x1xf32>
    %cst_5 = arith.constant 2.560000e+02 : f32
    %7 = vector.broadcast %cst_5 : f32 to vector<16x1xf32>
    %8 = arith.divf %6, %7 : vector<16x1xf32>
    %9 = vector.broadcast %8 : vector<16x1xf32> to vector<16x256xf32>
    %10 = arith.subf %2, %9 : vector<16x256xf32>
    %11 = arith.mulf %10, %10 : vector<16x256xf32>
    %cst_6 = arith.constant dense<0.000000e+00> : vector<16xf32>
    %12 = vector.multi_reduction <add>, %11, %cst_6 [1] : vector<16x256xf32> to vector<16xf32>
    %13 = vector.shape_cast %12 : vector<16xf32> to vector<16x1xf32>
    %cst_7 = arith.constant 0.00392156886 : f32
    %14 = vector.broadcast %cst_7 : f32 to vector<16x1xf32>
    %15 = arith.mulf %13, %14 : vector<16x1xf32>
    %16 = math.sqrt %15 : vector<16x1xf32>
    %17 = vector.broadcast %8 : vector<16x1xf32> to vector<16x256xf32>
    %18 = arith.subf %2, %17 : vector<16x256xf32>
    %cst_8 = arith.constant 9.99999997E-7 : f32
    %19 = vector.broadcast %cst_8 : f32 to vector<16x1xf32>
    %20 = arith.addf %16, %19 : vector<16x1xf32>
    %21 = math.rsqrt %20 : vector<16x1xf32>
    %22 = vector.broadcast %21 : vector<16x1xf32> to vector<16x256xf32>
    %23 = arith.mulf %18, %22 : vector<16x256xf32>
    %cst_9 = arith.constant 1.000000e+00 : f32
    %24 = vector.broadcast %cst_9 : f32 to vector<16x256xf32>
    %25 = arith.addf %23, %24 : vector<16x256xf32>
    %c0_10 = arith.constant 0 : index
    %c0_11 = arith.constant 0 : index
    %26 = vector.load %arg3[%c0_10, %c0_11] : memref<256x768xbf16, #tpu.memory_space<vmem>>, vector<256x768xbf16>
    %c0_12 = arith.constant 0 : index
    %c0_13 = arith.constant 0 : index
    %27 = vector.load %arg4[%c0_12, %c0_13] : memref<1x768xf32, #tpu.memory_space<vmem>>, vector<1x768xf32>
    %c0_14 = arith.constant 0 : index
    %c0_15 = arith.constant 0 : index
    %28 = vector.load %arg5[%c0_14, %c0_15] : memref<256x256xbf16, #tpu.memory_space<vmem>>, vector<256x256xbf16>
    %c0_16 = arith.constant 0 : index
    %c0_17 = arith.constant 0 : index
    %29 = vector.load %arg6[%c0_16, %c0_17] : memref<1x256xf32, #tpu.memory_space<vmem>>, vector<1x256xf32>
    %30 = arith.truncf %25 : vector<16x256xf32> to vector<16x256xbf16>
    %cst_18 = arith.constant dense<0.000000e+00> : vector<16x768xf32>
    %31 = tpu.matmul %30, %26, %cst_18 {dimension_numbers = #tpu.dot_dimension_numbers<[1], [0], [0], [1], [0, 0, 1, 1], [], []>} : vector<16x256xbf16>, vector<256x768xbf16>, vector<16x768xf32> -> vector<16x768xf32>
    %32 = vector.broadcast %27 : vector<1x768xf32> to vector<16x768xf32>
    %33 = arith.addf %31, %32 : vector<16x768xf32>
    %34 = arith.truncf %33 : vector<16x768xf32> to vector<16x768xbf16>
    %35 = vector.extract_strided_slice %34 {offsets = [0, 0], sizes = [16, 384], strides = [1, 1]} : vector<16x768xbf16> to vector<16x384xbf16>
    %36 = vector.extract_strided_slice %34 {offsets = [0, 384], sizes = [16, 384], strides = [1, 1]} : vector<16x768xbf16> to vector<16x384xbf16>
    %37 = vector.shape_cast %35 : vector<16x384xbf16> to vector<1x16x384xbf16>
    %38 = vector.shape_cast %36 : vector<16x384xbf16> to vector<1x16x384xbf16>
    %39 = tpu.concatenate %37, %38 in 0 : vector<1x16x384xbf16>, vector<1x16x384xbf16> -> vector<2x16x384xbf16>
    %40 = vector.extract_strided_slice %39 {offsets = [0, 0, 0], sizes = [2, 16, 128], strides = [1, 1, 1]} : vector<2x16x384xbf16> to vector<2x16x128xbf16>
    %41 = vector.extract_strided_slice %39 {offsets = [0, 0, 128], sizes = [2, 16, 128], strides = [1, 1, 1]} : vector<2x16x384xbf16> to vector<2x16x128xbf16>
    %42 = vector.extract_strided_slice %39 {offsets = [0, 0, 256], sizes = [2, 16, 128], strides = [1, 1, 1]} : vector<2x16x384xbf16> to vector<2x16x128xbf16>
    "tpu.trace_start"() <{level = 10 : i32, message = "hqc,hkc->hqk"}> : () -> ()
    %cst_19 = arith.constant dense<0.000000e+00> : vector<2x16x16xf32>
    %43 = tpu.matmul %40, %41, %cst_19 {dimension_numbers = #tpu.dot_dimension_numbers<[2], [2], [1], [1], [0, 0, 0, 1, 1, 1], [0], [0]>} : vector<2x16x128xbf16>, vector<2x16x128xbf16>, vector<2x16x16xf32> -> vector<2x16x16xf32>
    "tpu.trace_stop"() : () -> ()
    %cst_20 = arith.constant 0.0883883461 : f32
    %44 = vector.broadcast %cst_20 : f32 to vector<2x16x16xf32>
    %45 = arith.mulf %43, %44 : vector<2x16x16xf32>
    %cst_21 = arith.constant dense<0xFF800000> : vector<2x16xf32>
    %46 = vector.multi_reduction <maximumf>, %45, %cst_21 [2] : vector<2x16x16xf32> to vector<2x16xf32>
    %47 = vector.shape_cast %46 : vector<2x16xf32> to vector<2x16x1xf32>
    %48 = vector.broadcast %47 : vector<2x16x1xf32> to vector<2x16x16xf32>
    %49 = arith.subf %45, %48 : vector<2x16x16xf32>
    %50 = math.exp %49 : vector<2x16x16xf32>
    %cst_22 = arith.constant dense<0.000000e+00> : vector<2x16xf32>
    %51 = vector.multi_reduction <add>, %50, %cst_22 [2] : vector<2x16x16xf32> to vector<2x16xf32>
    %52 = vector.shape_cast %51 : vector<2x16xf32> to vector<2x16x1xf32>
    %53 = arith.truncf %50 : vector<2x16x16xf32> to vector<2x16x16xbf16>
    "tpu.trace_start"() <{level = 10 : i32, message = "hqk,hkc->hqc"}> : () -> ()
    %cst_23 = arith.constant dense<0.000000e+00> : vector<2x16x128xf32>
    %54 = tpu.matmul %53, %42, %cst_23 {dimension_numbers = #tpu.dot_dimension_numbers<[2], [1], [1], [2], [0, 0, 0, 1, 1, 2], [0], [0]>} : vector<2x16x16xbf16>, vector<2x16x128xbf16>, vector<2x16x128xf32> -> vector<2x16x128xf32>
    "tpu.trace_stop"() : () -> ()
    %55 = tpu.reciprocal %52 {approx = true} : vector<2x16x1xf32> -> vector<2x16x1xf32>
    %56 = vector.broadcast %55 : vector<2x16x1xf32> to vector<2x16x128xf32>
    %57 = arith.mulf %54, %56 : vector<2x16x128xf32>
    %58 = arith.truncf %57 : vector<2x16x128xf32> to vector<2x16x128xbf16>
    %59 = vector.extract_strided_slice %58 {offsets = [0, 0, 0], sizes = [1, 16, 128], strides = [1, 1, 1]} : vector<2x16x128xbf16> to vector<1x16x128xbf16>
    %60 = vector.shape_cast %59 : vector<1x16x128xbf16> to vector<16x128xbf16>
    %61 = vector.extract_strided_slice %58 {offsets = [1, 0, 0], sizes = [1, 16, 128], strides = [1, 1, 1]} : vector<2x16x128xbf16> to vector<1x16x128xbf16>
    %62 = vector.shape_cast %61 : vector<1x16x128xbf16> to vector<16x128xbf16>
    %63 = tpu.concatenate %60, %62 in 1 : vector<16x128xbf16>, vector<16x128xbf16> -> vector<16x256xbf16>
    %cst_24 = arith.constant dense<0.000000e+00> : vector<16x256xf32>
    %64 = tpu.matmul %63, %28, %cst_24 {dimension_numbers = #tpu.dot_dimension_numbers<[1], [0], [0], [1], [0, 0, 1, 1], [], []>} : vector<16x256xbf16>, vector<256x256xbf16>, vector<16x256xf32> -> vector<16x256xf32>
    %65 = vector.broadcast %29 : vector<1x256xf32> to vector<16x256xf32>
    %66 = arith.addf %64, %65 : vector<16x256xf32>
    %67 = arith.addf %2, %66 : vector<16x256xf32>
    %cst_25 = arith.constant dense<0.000000e+00> : vector<16xf32>
    %68 = vector.multi_reduction <add>, %67, %cst_25 [1] : vector<16x256xf32> to vector<16xf32>
    %69 = vector.shape_cast %68 : vector<16xf32> to vector<16x1xf32>
    %cst_26 = arith.constant 2.560000e+02 : f32
    %70 = vector.broadcast %cst_26 : f32 to vector<16x1xf32>
    %71 = arith.divf %69, %70 : vector<16x1xf32>
    %72 = vector.broadcast %71 : vector<16x1xf32> to vector<16x256xf32>
    %73 = arith.subf %67, %72 : vector<16x256xf32>
    %74 = arith.mulf %73, %73 : vector<16x256xf32>
    %cst_27 = arith.constant dense<0.000000e+00> : vector<16xf32>
    %75 = vector.multi_reduction <add>, %74, %cst_27 [1] : vector<16x256xf32> to vector<16xf32>
    %76 = vector.shape_cast %75 : vector<16xf32> to vector<16x1xf32>
    %cst_28 = arith.constant 0.00392156886 : f32
    %77 = vector.broadcast %cst_28 : f32 to vector<16x1xf32>
    %78 = arith.mulf %76, %77 : vector<16x1xf32>
    %79 = math.sqrt %78 : vector<16x1xf32>
    %80 = vector.broadcast %71 : vector<16x1xf32> to vector<16x256xf32>
    %81 = arith.subf %67, %80 : vector<16x256xf32>
    %cst_29 = arith.constant 9.99999997E-7 : f32
    %82 = vector.broadcast %cst_29 : f32 to vector<16x1xf32>
    %83 = arith.addf %79, %82 : vector<16x1xf32>
    %84 = math.rsqrt %83 : vector<16x1xf32>
    %85 = vector.broadcast %84 : vector<16x1xf32> to vector<16x256xf32>
    %86 = arith.mulf %81, %85 : vector<16x256xf32>
    %cst_30 = arith.constant 1.000000e+00 : f32
    %87 = vector.broadcast %cst_30 : f32 to vector<16x256xf32>
    %88 = arith.addf %86, %87 : vector<16x256xf32>
    %c0_31 = arith.constant 0 : index
    %c0_32 = arith.constant 0 : index
    %89 = vector.load %arg7[%c0_31, %c0_32] : memref<256x256xbf16, #tpu.memory_space<vmem>>, vector<256x256xbf16>
    %c0_33 = arith.constant 0 : index
    %c0_34 = arith.constant 0 : index
    %90 = vector.load %arg8[%c0_33, %c0_34] : memref<1x256xf32, #tpu.memory_space<vmem>>, vector<1x256xf32>
    %c0_35 = arith.constant 0 : index
    %c0_36 = arith.constant 0 : index
    %91 = vector.load %arg9[%c0_35, %c0_36] : memref<256x512xbf16, #tpu.memory_space<vmem>>, vector<256x512xbf16>
    %c0_37 = arith.constant 0 : index
    %c0_38 = arith.constant 0 : index
    %92 = vector.load %arg10[%c0_37, %c0_38] : memref<1x512xf32, #tpu.memory_space<vmem>>, vector<1x512xf32>
    %c0_39 = arith.constant 0 : index
    %c0_40 = arith.constant 0 : index
    %93 = vector.load %arg11[%c0_39, %c0_40] : memref<256x256xbf16, #tpu.memory_space<vmem>>, vector<256x256xbf16>
    %c0_41 = arith.constant 0 : index
    %c0_42 = arith.constant 0 : index
    %94 = vector.load %arg12[%c0_41, %c0_42] : memref<1x256xf32, #tpu.memory_space<vmem>>, vector<1x256xf32>
    %95 = arith.truncf %88 : vector<16x256xf32> to vector<16x256xbf16>
    %cst_43 = arith.constant dense<0.000000e+00> : vector<16x256xf32>
    %96 = tpu.matmul %95, %89, %cst_43 {dimension_numbers = #tpu.dot_dimension_numbers<[1], [0], [0], [1], [0, 0, 1, 1], [], []>} : vector<16x256xbf16>, vector<256x256xbf16>, vector<16x256xf32> -> vector<16x256xf32>
    %97 = vector.broadcast %90 : vector<1x256xf32> to vector<16x256xf32>
    %98 = arith.addf %96, %97 : vector<16x256xf32>
    %99 = arith.truncf %98 : vector<16x256xf32> to vector<16x256xbf16>
    %cst_44 = arith.constant dense<0.000000e+00> : vector<8x512xf32>
    %100 = tpu.matmul %4, %91, %cst_44 {dimension_numbers = #tpu.dot_dimension_numbers<[1], [0], [0], [1], [0, 0, 1, 1], [], []>} : vector<8x256xbf16>, vector<256x512xbf16>, vector<8x512xf32> -> vector<8x512xf32>
    %101 = vector.broadcast %92 : vector<1x512xf32> to vector<8x512xf32>
    %102 = arith.addf %100, %101 : vector<8x512xf32>
    %103 = arith.truncf %102 : vector<8x512xf32> to vector<8x512xbf16>
    %104 = vector.extract_strided_slice %99 {offsets = [0, 0], sizes = [16, 128], strides = [1, 1]} : vector<16x256xbf16> to vector<16x128xbf16>
    %105 = vector.extract_strided_slice %99 {offsets = [0, 128], sizes = [16, 128], strides = [1, 1]} : vector<16x256xbf16> to vector<16x128xbf16>
    %106 = vector.shape_cast %104 : vector<16x128xbf16> to vector<1x16x128xbf16>
    %107 = vector.shape_cast %105 : vector<16x128xbf16> to vector<1x16x128xbf16>
    %108 = tpu.concatenate %106, %107 in 0 : vector<1x16x128xbf16>, vector<1x16x128xbf16> -> vector<2x16x128xbf16>
    %109 = vector.extract_strided_slice %103 {offsets = [0, 0], sizes = [8, 256], strides = [1, 1]} : vector<8x512xbf16> to vector<8x256xbf16>
    %110 = vector.extract_strided_slice %103 {offsets = [0, 256], sizes = [8, 256], strides = [1, 1]} : vector<8x512xbf16> to vector<8x256xbf16>
    %111 = vector.shape_cast %109 : vector<8x256xbf16> to vector<1x8x256xbf16>
    %112 = vector.shape_cast %110 : vector<8x256xbf16> to vector<1x8x256xbf16>
    %113 = tpu.concatenate %111, %112 in 0 : vector<1x8x256xbf16>, vector<1x8x256xbf16> -> vector<2x8x256xbf16>
    %114 = vector.extract_strided_slice %113 {offsets = [0, 0, 0], sizes = [2, 8, 128], strides = [1, 1, 1]} : vector<2x8x256xbf16> to vector<2x8x128xbf16>
    %115 = vector.extract_strided_slice %113 {offsets = [0, 0, 128], sizes = [2, 8, 128], strides = [1, 1, 1]} : vector<2x8x256xbf16> to vector<2x8x128xbf16>
    "tpu.trace_start"() <{level = 10 : i32, message = "hqc,hkc->hqk"}> : () -> ()
    %cst_45 = arith.constant dense<0.000000e+00> : vector<2x16x8xf32>
    %116 = tpu.matmul %108, %114, %cst_45 {dimension_numbers = #tpu.dot_dimension_numbers<[2], [2], [1], [1], [0, 0, 0, 1, 1, 1], [0], [0]>} : vector<2x16x128xbf16>, vector<2x8x128xbf16>, vector<2x16x8xf32> -> vector<2x16x8xf32>
    "tpu.trace_stop"() : () -> ()
    %cst_46 = arith.constant 0.0883883461 : f32
    %117 = vector.broadcast %cst_46 : f32 to vector<2x16x8xf32>
    %118 = arith.mulf %116, %117 : vector<2x16x8xf32>
    %cst_47 = arith.constant dense<0xFF800000> : vector<2x16xf32>
    %119 = vector.multi_reduction <maximumf>, %118, %cst_47 [2] : vector<2x16x8xf32> to vector<2x16xf32>
    %120 = vector.shape_cast %119 : vector<2x16xf32> to vector<2x16x1xf32>
    %121 = vector.broadcast %120 : vector<2x16x1xf32> to vector<2x16x8xf32>
    %122 = arith.subf %118, %121 : vector<2x16x8xf32>
    %123 = math.exp %122 : vector<2x16x8xf32>
    %cst_48 = arith.constant dense<0.000000e+00> : vector<2x16xf32>
    %124 = vector.multi_reduction <add>, %123, %cst_48 [2] : vector<2x16x8xf32> to vector<2x16xf32>
    %125 = vector.shape_cast %124 : vector<2x16xf32> to vector<2x16x1xf32>
    %126 = arith.truncf %123 : vector<2x16x8xf32> to vector<2x16x8xbf16>
    "tpu.trace_start"() <{level = 10 : i32, message = "hqk,hkc->hqc"}> : () -> ()
    %cst_49 = arith.constant dense<0.000000e+00> : vector<2x16x128xf32>
    %127 = tpu.matmul %126, %115, %cst_49 {dimension_numbers = #tpu.dot_dimension_numbers<[2], [1], [1], [2], [0, 0, 0, 1, 1, 2], [0], [0]>} : vector<2x16x8xbf16>, vector<2x8x128xbf16>, vector<2x16x128xf32> -> vector<2x16x128xf32>
    "tpu.trace_stop"() : () -> ()
    %128 = tpu.reciprocal %125 {approx = true} : vector<2x16x1xf32> -> vector<2x16x1xf32>
    %129 = vector.broadcast %128 : vector<2x16x1xf32> to vector<2x16x128xf32>
    %130 = arith.mulf %127, %129 : vector<2x16x128xf32>
    %131 = arith.truncf %130 : vector<2x16x128xf32> to vector<2x16x128xbf16>
    %132 = vector.extract_strided_slice %131 {offsets = [0, 0, 0], sizes = [1, 16, 128], strides = [1, 1, 1]} : vector<2x16x128xbf16> to vector<1x16x128xbf16>
    %133 = vector.shape_cast %132 : vector<1x16x128xbf16> to vector<16x128xbf16>
    %134 = vector.extract_strided_slice %131 {offsets = [1, 0, 0], sizes = [1, 16, 128], strides = [1, 1, 1]} : vector<2x16x128xbf16> to vector<1x16x128xbf16>
    %135 = vector.shape_cast %134 : vector<1x16x128xbf16> to vector<16x128xbf16>
    %136 = tpu.concatenate %133, %135 in 1 : vector<16x128xbf16>, vector<16x128xbf16> -> vector<16x256xbf16>
    %cst_50 = arith.constant dense<0.000000e+00> : vector<16x256xf32>
    %137 = tpu.matmul %136, %93, %cst_50 {dimension_numbers = #tpu.dot_dimension_numbers<[1], [0], [0], [1], [0, 0, 1, 1], [], []>} : vector<16x256xbf16>, vector<256x256xbf16>, vector<16x256xf32> -> vector<16x256xf32>
    %138 = vector.broadcast %94 : vector<1x256xf32> to vector<16x256xf32>
    %139 = arith.addf %137, %138 : vector<16x256xf32>
    %140 = arith.addf %67, %139 : vector<16x256xf32>
    %cst_51 = arith.constant dense<0.000000e+00> : vector<16xf32>
    %141 = vector.multi_reduction <add>, %140, %cst_51 [1] : vector<16x256xf32> to vector<16xf32>
    %142 = vector.shape_cast %141 : vector<16xf32> to vector<16x1xf32>
    %cst_52 = arith.constant 2.560000e+02 : f32
    %143 = vector.broadcast %cst_52 : f32 to vector<16x1xf32>
    %144 = arith.divf %142, %143 : vector<16x1xf32>
    %145 = vector.broadcast %144 : vector<16x1xf32> to vector<16x256xf32>
    %146 = arith.subf %140, %145 : vector<16x256xf32>
    %147 = arith.mulf %146, %146 : vector<16x256xf32>
    %cst_53 = arith.constant dense<0.000000e+00> : vector<16xf32>
    %148 = vector.multi_reduction <add>, %147, %cst_53 [1] : vector<16x256xf32> to vector<16xf32>
    %149 = vector.shape_cast %148 : vector<16xf32> to vector<16x1xf32>
    %cst_54 = arith.constant 0.00392156886 : f32
    %150 = vector.broadcast %cst_54 : f32 to vector<16x1xf32>
    %151 = arith.mulf %149, %150 : vector<16x1xf32>
    %152 = math.sqrt %151 : vector<16x1xf32>
    %153 = vector.broadcast %144 : vector<16x1xf32> to vector<16x256xf32>
    %154 = arith.subf %140, %153 : vector<16x256xf32>
    %cst_55 = arith.constant 9.99999997E-7 : f32
    %155 = vector.broadcast %cst_55 : f32 to vector<16x1xf32>
    %156 = arith.addf %152, %155 : vector<16x1xf32>
    %157 = math.rsqrt %156 : vector<16x1xf32>
    %158 = vector.broadcast %157 : vector<16x1xf32> to vector<16x256xf32>
    %159 = arith.mulf %154, %158 : vector<16x256xf32>
    %cst_56 = arith.constant 1.000000e+00 : f32
    %160 = vector.broadcast %cst_56 : f32 to vector<16x256xf32>
    %161 = arith.addf %159, %160 : vector<16x256xf32>
    %162 = arith.truncf %161 : vector<16x256xf32> to vector<16x256xbf16>
    %c0_57 = arith.constant 0 : index
    %c0_58 = arith.constant 0 : index
    %163 = vector.load %arg13[%c0_57, %c0_58] : memref<256x512xbf16, #tpu.memory_space<vmem>>, vector<256x512xbf16>
    %cst_59 = arith.constant dense<0.000000e+00> : vector<16x512xf32>
    %164 = tpu.matmul %162, %163, %cst_59 {dimension_numbers = #tpu.dot_dimension_numbers<[1], [0], [0], [1], [0, 0, 1, 1], [], []>} : vector<16x256xbf16>, vector<256x512xbf16>, vector<16x512xf32> -> vector<16x512xf32>
    %c0_60 = arith.constant 0 : index
    %c0_61 = arith.constant 0 : index
    %165 = vector.load %arg14[%c0_60, %c0_61] : memref<1x512xf32, #tpu.memory_space<vmem>>, vector<1x512xf32>
    %166 = vector.broadcast %165 : vector<1x512xf32> to vector<16x512xf32>
    %167 = arith.addf %164, %166 : vector<16x512xf32>
    %cst_62 = arith.constant 0.000000e+00 : f32
    %168 = vector.broadcast %cst_62 : f32 to vector<16x512xf32>
    %169 = arith.maximumf %167, %168 : vector<16x512xf32>
    %170 = arith.truncf %169 : vector<16x512xf32> to vector<16x512xbf16>
    %c0_63 = arith.constant 0 : index
    %c0_64 = arith.constant 0 : index
    %171 = vector.load %arg15[%c0_63, %c0_64] : memref<512x256xbf16, #tpu.memory_space<vmem>>, vector<512x256xbf16>
    %cst_65 = arith.constant dense<0.000000e+00> : vector<16x256xf32>
    %172 = tpu.matmul %170, %171, %cst_65 {dimension_numbers = #tpu.dot_dimension_numbers<[1], [0], [0], [1], [0, 0, 1, 1], [], []>} : vector<16x512xbf16>, vector<512x256xbf16>, vector<16x256xf32> -> vector<16x256xf32>
    %173 = arith.addf %140, %172 : vector<16x256xf32>
    %c0_66 = arith.constant 0 : index
    %c0_67 = arith.constant 0 : index
    %174 = vector.load %arg16[%c0_66, %c0_67] : memref<1x256xf32, #tpu.memory_space<vmem>>, vector<1x256xf32>
    %175 = vector.broadcast %174 : vector<1x256xf32> to vector<16x256xf32>
    %176 = arith.addf %173, %175 : vector<16x256xf32>
    %c0_68 = arith.constant 0 : index
    %c0_69 = arith.constant 0 : index
    %c0_70 = arith.constant 0 : index
    %177 = vector.load %arg17[%c0_68, %c0_69, %c0_70] : memref<1x16x256xf32, #tpu.memory_space<vmem>>, vector<1x16x256xf32>
    %178 = vector.shape_cast %177 : vector<1x16x256xf32> to vector<16x256xf32>
    %179 = vector.shape_cast %176 : vector<16x256xf32> to vector<1x16x256xf32>
    tpu.vector_store %arg17[%c0_68, %c0_69, %c0_70], %179 {strides = array<i32>} : memref<1x16x256xf32, #tpu.memory_space<vmem>>, vector<1x16x256xf32>,
    return
  }
  func.func @transform_0(%arg0: i32) -> (i32, i32, i32) {
    %c0_i32 = arith.constant 0 : i32
    %c0_i32_0 = arith.constant 0 : i32
    %c0_i32_1 = arith.constant 0 : i32
    return %arg0, %c0_i32, %c0_i32_0 : i32, i32, i32
  }
  func.func @transform_1(%arg0: i32) -> (i32, i32, i32) {
    %c0_i32 = arith.constant 0 : i32
    %c0_i32_0 = arith.constant 0 : i32
    %c0_i32_1 = arith.constant 0 : i32
    return %arg0, %c0_i32, %c0_i32_0 : i32, i32, i32
  }
  func.func @transform_2(%arg0: i32) -> (i32, i32) {
    %c0_i32 = arith.constant 0 : i32
    %c0_i32_0 = arith.constant 0 : i32
    %c0_i32_1 = arith.constant 0 : i32
    return %c0_i32, %c0_i32_0 : i32, i32
  }
  func.func @transform_3(%arg0: i32) -> (i32, i32) {
    %c0_i32 = arith.constant 0 : i32
    %c0_i32_0 = arith.constant 0 : i32
    %c0_i32_1 = arith.constant 0 : i32
    return %c0_i32, %c0_i32_0 : i32, i32
  }
  func.func @transform_4(%arg0: i32) -> (i32, i32) {
    %c0_i32 = arith.constant 0 : i32
    %c0_i32_0 = arith.constant 0 : i32
    %c0_i32_1 = arith.constant 0 : i32
    return %c0_i32, %c0_i32_0 : i32, i32
  }
  func.func @transform_5(%arg0: i32) -> (i32, i32) {
    %c0_i32 = arith.constant 0 : i32
    %c0_i32_0 = arith.constant 0 : i32
    %c0_i32_1 = arith.constant 0 : i32
    return %c0_i32, %c0_i32_0 : i32, i32
  }
  func.func @transform_6(%arg0: i32) -> (i32, i32) {
    %c0_i32 = arith.constant 0 : i32
    %c0_i32_0 = arith.constant 0 : i32
    %c0_i32_1 = arith.constant 0 : i32
    return %c0_i32, %c0_i32_0 : i32, i32
  }
  func.func @transform_7(%arg0: i32) -> (i32, i32) {
    %c0_i32 = arith.constant 0 : i32
    %c0_i32_0 = arith.constant 0 : i32
    %c0_i32_1 = arith.constant 0 : i32
    return %c0_i32, %c0_i32_0 : i32, i32
  }
  func.func @transform_8(%arg0: i32) -> (i32, i32) {
    %c0_i32 = arith.constant 0 : i32
    %c0_i32_0 = arith.constant 0 : i32
    %c0_i32_1 = arith.constant 0 : i32
    return %c0_i32, %c0_i32_0 : i32, i32
  }
  func.func @transform_9(%arg0: i32) -> (i32, i32) {
    %c0_i32 = arith.constant 0 : i32
    %c0_i32_0 = arith.constant 0 : i32
    %c0_i32_1 = arith.constant 0 : i32
    return %c0_i32, %c0_i32_0 : i32, i32
  }
  func.func @transform_10(%arg0: i32) -> (i32, i32) {
    %c0_i32 = arith.constant 0 : i32
    %c0_i32_0 = arith.constant 0 : i32
    %c0_i32_1 = arith.constant 0 : i32
    return %c0_i32, %c0_i32_0 : i32, i32
  }
  func.func @transform_11(%arg0: i32) -> (i32, i32) {
    %c0_i32 = arith.constant 0 : i32
    %c0_i32_0 = arith.constant 0 : i32
    %c0_i32_1 = arith.constant 0 : i32
    return %c0_i32, %c0_i32_0 : i32, i32
  }
  func.func @transform_12(%arg0: i32) -> (i32, i32) {
    %c0_i32 = arith.constant 0 : i32
    %c0_i32_0 = arith.constant 0 : i32
    %c0_i32_1 = arith.constant 0 : i32
    return %c0_i32, %c0_i32_0 : i32, i32
  }
  func.func @transform_13(%arg0: i32) -> (i32, i32) {
    %c0_i32 = arith.constant 0 : i32
    %c0_i32_0 = arith.constant 0 : i32
    %c0_i32_1 = arith.constant 0 : i32
    return %c0_i32, %c0_i32_0 : i32, i32
  }
  func.func @transform_14(%arg0: i32) -> (i32, i32) {
    %c0_i32 = arith.constant 0 : i32
    %c0_i32_0 = arith.constant 0 : i32
    %c0_i32_1 = arith.constant 0 : i32
    return %c0_i32, %c0_i32_0 : i32, i32
  }
  func.func @transform_15(%arg0: i32) -> (i32, i32) {
    %c0_i32 = arith.constant 0 : i32
    %c0_i32_0 = arith.constant 0 : i32
    %c0_i32_1 = arith.constant 0 : i32
    return %c0_i32, %c0_i32_0 : i32, i32
  }
  func.func @transform_16(%arg0: i32) -> (i32, i32, i32) {
    %c0_i32 = arith.constant 0 : i32
    %c0_i32_0 = arith.constant 0 : i32
    %c0_i32_1 = arith.constant 0 : i32
    return %arg0, %c0_i32, %c0_i32_0 : i32, i32, i32
  }
}

</mosaic_0001>

<bundles_post_ra>
// kernel: tpu_custom_call.1
= control target key start
LH: loop header
LB: loop body
LE: loop exit
PB: predicated region body
PF: predicated region fallthrough
CT: control target
= control target key end

     0   :  { %s7910_s0 = inlined_call_operand.hbm [shape: bf16[2,16,256], index: 0, kind: input, shape index: {}]   ;;  %s7911_s1 = inlined_call_operand.hbm [shape: bf16[2,8,256], index: 1, kind: input, shape index: {}]   ;;  %s7912_s2 = inlined_call_operand.hbm [shape: bf16[256,768], index: 2, kind: input, shape index: {}]   ;;  %s7913_s3 = inlined_call_operand.hbm [shape: f32[1,768], index: 3, kind: input, shape index: {}]   ;;  %s7914_s4 = inlined_call_operand.hbm [shape: bf16[256,256], index: 4, kind: input, shape index: {}]   ;;  %s7915_s5 = inlined_call_operand.hbm [shape: f32[1,256], index: 5, kind: input, shape index: {}]   ;;  %s7916_s6 = inlined_call_operand.hbm [shape: bf16[256,256], index: 6, kind: input, shape index: {}]   ;;  %s7917_s7 = inlined_call_operand.hbm [shape: f32[1,256], index: 7, kind: input, shape index: {}]   ;;  %s7918_s8 = inlined_call_operand.hbm [shape: bf16[256,512], index: 8, kind: input, shape index: {}]   ;;  %s7919_s9 = inlined_call_operand.vmem [shape: f32[1,512], index: 9, kind: input, shape index: {}]   ;;  %s7920_s10 = inlined_call_operand.hbm [shape: bf16[256,256], index: 10, kind: input, shape index: {}]   ;;  %s7921_s11 = inlined_call_operand.vmem [shape: f32[1,256], index: 11, kind: input, shape index: {}]   ;;  %s7922_s12 = inlined_call_operand.hbm [shape: bf16[256,512], index: 12, kind: input, shape index: {}]   ;;  %s7923_s13 = inlined_call_operand.vmem [shape: f32[1,512], index: 13, kind: input, shape index: {}]   ;;  %s7924_s14 = inlined_call_operand.hbm [shape: bf16[512,256], index: 14, kind: input, shape index: {}]   ;;  %s7925_s15 = inlined_call_operand.vmem [shape: f32[1,256], index: 15, kind: input, shape index: {}]   ;;  %s7926_s16 = inlined_call_operand.hbm [shape: f32[2,16,256], index: 16, kind: output, shape index: {}]  }
   0x1   :  { %7931 = sst [smem:[#allocation32_spill]] %s7910_s0 }
   0x2   :  { %7932 = sst [smem:[#allocation33_spill]] %s7912_s2 }
   0x3   :  { %7933 = sst [smem:[#allocation34_spill]] %s7913_s3 }
   0x4   :  { %7934 = sst [smem:[#allocation35_spill]] %s7914_s4 }
   0x5   :  { %7935 = sst [smem:[#allocation36_spill]] %s7915_s5 }
   0x6   :  { %7936 = sst [smem:[#allocation37_spill]] %s7916_s6 }
   0x7   :  { %7937 = sst [smem:[#allocation38_spill]] %s7917_s7 }
   0x8   :  { %7938 = sst [smem:[#allocation39_spill]] %s7918_s8 }
   0x9   :  { %7939 = sst [smem:[#allocation40_spill]] %s7919_s9 }
   0xa   :  { %7940 = sst [smem:[#allocation41_spill]] %s7920_s10 }
   0xb   :  { %7941 = sst [smem:[#allocation42_spill]] %s7921_s11 }
   0xc   :  { %7942 = sst [smem:[#allocation43_spill]] %s7922_s12 }
   0xd   :  { %7943 = sst [smem:[#allocation44_spill]] %s7923_s13 }
   0xe   :  { %7944 = sst [smem:[#allocation45_spill]] %s7924_s14 }
   0xf   :  { %7945 = sst [smem:[#allocation46_spill]] %s7925_s15 }
  0x10   :  { %7946 = sst [smem:[#allocation47_spill]] %s7926_s16 }
  0x11   :  { %21 = vsyncpa [#allocation3], 0 }
  0x12   :  { %23 = vsyncpa [#allocation3 + $0x1], 0 }
  0x13   :  { %24 = vsyncpa [#allocation6], 0 }
  0x14   :  { %26 = vsyncpa [#allocation6 + $0x1], 0 }
  0x15   :  { %27 = vsyncpa [#allocation9], 0 }
  0x16   :  { %28 = vsyncpa [#allocation12], 0 }
  0x17   :  { %29 = vsyncpa [#allocation15], 0 }
  0x18   :  { %30 = vsyncpa [#allocation18], 0 }
  0x19   :  { %31 = vsyncpa [#allocation21], 0 }
  0x1a   :  { %32 = vsyncpa [#allocation4], 0 }
  0x1b   :  { %34 = vsyncpa [#allocation4 + $0x1], 0  ;;  %s7368_s21 = smov 0   ;;  %s7370_s22 = smov 0  }
  0x1c   :  { %s7372_s23 = smov 0   ;;  %s7374_s24 = smov 0  }
  0x1d LB: > { %s7947_s2 = sld [smem:[#allocation33_spill]]  ;;  %s7392_s28 = sadd.s32 4294967295, %s7262_s24   ;;  %s7262_s24 = sphi %s7374_s24, %s7976_s24   ;;  %s7258_s23 = sphi %s7372_s23, %s7975_s23   ;;  %s7254_s22 = sphi %s7370_s22, %s7974_s22   ;;  %s7250_s21 = sphi %s7368_s21, %s7973_s21  }
  0x1e   : > { %p4625_p0 = scmp.ge.s32.totalorder %s7262_s24, 1  ;;  %p61_p1 = scmp.eq.s32.totalorder %s7392_s28, 0 }
  0x1f   : > { %p417_p2 = scmp.lt.s32.totalorder %s7262_s24, 3  ;;  %s7264_s30 = smov [#allocation7]  }
  0x20   : > { %s430_s0 = sshll.u32 %s7264_s30, 4  ;;  %s7949_s3 = sld [smem:[#allocation34_spill]]  ;;  %s431_s0 = int_to_ptr.vmem [resolvable:$true] %s430_s0 }
  0x21   : > { %p7397_p3 = pnand %p4625_p0, %p417_p2  ;;  %s7951_s5 = sld [smem:[#allocation36_spill]] }
  0x22   : > { %s7266_s15 = smov 384   ;;  %s7267_s13 = smov 24  }
  0x23   : > { %s428_s27 = sshll.u32 %s7947_s2, 4  ;;  %p6635_p4 = pneg %p7397_p3  ;;  %s429_s27 = int_to_ptr.hbm [resolvable:$true] %s428_s27 }
  0x24   : > { %s7265_s2 = smov [#allocation8]   ;;  %s7952_s7 = sld [smem:[#allocation38_spill]] }
  0x25   : > { %p7409_p6 = pnand %p6635_p4, %p61_p1  ;;  %s445_s16 = sshll.u32 %s7265_s2, 4  ;;  %s446_s16 = int_to_ptr.vmem [resolvable:$true] %s445_s16 }
  0x26   : > { %s443_s19 = sshll.u32 %s7949_s3, 4  ;;  %s7268_s11 = smov [#allocation11]   ;;  %s444_s19 = int_to_ptr.hbm [resolvable:$true] %s443_s19 }
  0x27   : > { %s469_s30 = sshll.u32 %s7951_s5, 4  ;;  %s471_s9 = sshll.u32 %s7268_s11, 4  ;;  %s470_s30 = int_to_ptr.hbm [resolvable:$true] %s469_s30  ;;  %s472_s9 = int_to_ptr.vmem [resolvable:$true] %s471_s9 }
  0x28   : > { %6638 = dma.hbm_to_vmem [thread:$0]  (!%p7409_p6), %s429_s27, 12288, %s431_s0, [#allocation6], %s7266_s15, %s7266_s15, %s7267_s13  }
  0x29   : > { %6641 = dma.hbm_to_vmem [thread:$0]  (!%p7409_p6), %s444_s19, 96, %s446_s16, [#allocation9]  }
  0x2a   : > { %s495_s3 = sshll.u32 %s7952_s7, 4  ;;  %s7269_s2 = smov [#allocation14]   ;;  %s496_s3 = int_to_ptr.hbm [resolvable:$true] %s495_s3 }
  0x2b   : > { %6647 = dma.hbm_to_vmem [thread:$0]  (!%p7409_p6), %s470_s30, 32, %s472_s9, [#allocation12]  }
  0x2c   : > { %s497_s25 = sshll.u32 %s7269_s2, 4  ;;  %s7953_s10 = sld [smem:[#allocation41_spill]]  ;;  %s498_s25 = int_to_ptr.vmem [resolvable:$true] %s497_s25 }
  0x2d   : > { %6653 = dma.hbm_to_vmem [thread:$0]  (!%p7409_p6), %s496_s3, 32, %s498_s25, [#allocation15]  }
  0x2e   : > { %s7270_s27 = smov [#allocation17]   ;;  %s7954_s4 = sld [smem:[#allocation35_spill]] }
  0x2f   : > { %s525_s0 = sshll.u32 %s7270_s27, 4  ;;  %s7929_s9 = smov 128   ;;  %s526_s0 = int_to_ptr.vmem [resolvable:$true] %s525_s0 }
  0x30   : > { %s7930_s30 = smov 8   ;;  %s7273_s3 = smov [#allocation10]  }
  0x31   : > { %s456_s17 = sshll.u32 %s7273_s3, 4  ;;  %s7955_s6 = sld [smem:[#allocation37_spill]]  ;;  %s457_s17 = int_to_ptr.vmem [resolvable:$true] %s456_s17 }
  0x32   : > { %s523_s16 = sshll.u32 %s7953_s10, 4  ;;  %s7956_s8 = sld [smem:[#allocation39_spill]]  ;;  %s524_s16 = int_to_ptr.hbm [resolvable:$true] %s523_s16 }
  0x33   : > { %6659 = dma.hbm_to_vmem [thread:$0]  (!%p7409_p6), %s524_s16, 4096, %s526_s0, [#allocation18], %s7929_s9, %s7929_s9, %s7930_s30  }
  0x34   : > { %s454_s26 = sshll.u32 %s7954_s4, 4  ;;  %s7274_s16 = smov [#allocation13]   ;;  %s455_s26 = int_to_ptr.hbm [resolvable:$true] %s454_s26 }
  0x35   : > { %6644 = dma.hbm_to_vmem [thread:$0]  (!%p7409_p6), %s455_s26, 4096, %s457_s17, [#allocation9], %s7929_s9, %s7929_s9, %s7930_s30  }
  0x36   : > { %s482_s0 = sshll.u32 %s7274_s16, 4  ;;  %s7275_s11 = smov [#allocation16]   ;;  %s483_s0 = int_to_ptr.vmem [resolvable:$true] %s482_s0 }
  0x37   : > { %s480_s25 = sshll.u32 %s7955_s6, 4  ;;  %s508_s19 = sshll.u32 %s7275_s11, 4  ;;  %s481_s25 = int_to_ptr.hbm [resolvable:$true] %s480_s25  ;;  %s509_s19 = int_to_ptr.vmem [resolvable:$true] %s508_s19 }
  0x38   : > { %s506_s27 = sshll.u32 %s7956_s8, 4  ;;  %s7276_s26 = smov 256   ;;  %s507_s27 = int_to_ptr.hbm [resolvable:$true] %s506_s27 }
  0x39   : > { %6650 = dma.hbm_to_vmem [thread:$0]  (!%p7409_p6), %s481_s25, 4096, %s483_s0, [#allocation12], %s7929_s9, %s7929_s9, %s7930_s30  }
  0x3a   : > { %s7277_s3 = smov 16   ;;  %s7957_s12 = sld [smem:[#allocation43_spill]] }
  0x3b   : > { %6656 = dma.hbm_to_vmem [thread:$0]  (!%p7409_p6), %s507_s27, 8192, %s509_s19, [#allocation15], %s7276_s26, %s7276_s26, %s7277_s3  }
  0x3c   : > { %s7278_s25 = smov [#allocation19]   ;;  %s7958_s14 = sld [smem:[#allocation45_spill]] }
  0x3d   : > { %s542_s13 = sshll.u32 %s7278_s25, 4  ;;  %s7279_s27 = smov [#allocation20]   ;;  %s543_s13 = int_to_ptr.vmem [resolvable:$true] %s542_s13 }
  0x3e   : > { %s559_s11 = sshll.u32 %s7279_s27, 4  ;;  %s4624_s19 = sadd.s32 4294967294, %s7262_s24   ;;  %s560_s11 = int_to_ptr.vmem [resolvable:$true] %s559_s11 }
  0x3f   : > { %s7471_s17 = sadd.s32 1, %s7262_s24   ;;  %p54_p8 = scmp.ne.s32.totalorder %s7258_s23, %s7254_s22 }
  0x40   : > { %s540_s2 = sshll.u32 %s7957_s12, 4  ;;  %s44_s18 = ssub.s32 %s7262_s24, %s7471_s17  ;;  %s541_s2 = int_to_ptr.hbm [resolvable:$true] %s540_s2 }
  0x41   : > { %6662 = dma.hbm_to_vmem [thread:$0]  (!%p7409_p6), %s541_s2, 8192, %s543_s13, [#allocation18], %s7276_s26, %s7276_s26, %s7277_s3  }
  0x42   : > { %s557_s0 = sshll.u32 %s7958_s14, 4  ;;  %s47_s26 = sadd.s32 1, %s7258_s23  ;;  %s558_s0 = int_to_ptr.hbm [resolvable:$true] %s557_s0 }
  0x43   : > { %6665 = dma.hbm_to_vmem [thread:$0]  (!%p7409_p6), %s558_s0, 8192, %s560_s11, [#allocation21], %s7929_s9, %s7929_s9, %s7930_s30  }
  0x44   : > { %p45_p7 = scmp.eq.s32.totalorder %s44_s18, 0  ;;  %p55_p9 = scmp.eq.s32.totalorder %s7262_s24, 0 }
  0x45   : > { %p60_p10 = scmp.ne.s32.totalorder %s7254_s22, %s7250_s21  ;;  %p404_p13 = scmp.eq.s32.totalorder %s7392_s28, 1 }
  0x46   : > { %s7482_s3 = scalar_select %p45_p7, %s7258_s23, %s47_s26  }
  0x47   : > { %p7484_p11 = por %p55_p9, %p54_p8  ;;  %p7490_p12 = por %p61_p1, %p60_p10 }
  0x48   : > { %p410_p0 = scmp.eq.s32.totalorder %s4624_s19, 1  ;;  %p6687_p2 = scmp.lt.s32.totalorder %s7262_s24, 2 }
  0x49   : > { %s7497_s25 = sand.u32 1, %s7258_s23   ;;  %p7499_p4 = por %p404_p13, %p54_p8 }
  0x4a   : > { %p7503_p6 = por %p410_p0, %p60_p10  ;;  %s4637_s16 = sshll.u32 %s7497_s25, 4 }
  0x4b   : > { %s6202_s0 = sshll.u32 %s7262_s24, 4  ;;  %s7963_s18 = sld [smem:[#allocation32_spill]] }
  0x4c   : > { %s580_s26 = scalar_lea.vmem [#allocation2], %s4637_s16  ;;  %p7514_p7 = pnand %p6687_p2, %p7484_p11 }
  0x4d   : > { %s588_s9 = sshll.u32 %s580_s26, 4  ;;  %s598_s5 = sand.u32 1, %s7262_s24   ;;  %s589_s9 = int_to_ptr.vmem [resolvable:$true] %s588_s9 }
  0x4e   : > { %s4640_s6 = sshll.u32 %s7497_s25, 3  ;;  %s577_s7 = scalar_lea.sflag [#allocation3], %s7497_s25 }
  0x4f   : > { %p7112_p9 = pneg %p7514_p7 }
  0x51   : > { %s585_s19 = scalar_lea.hbm %s7963_s18, %s6202_s0  ;;  %s7115_s0 = scalar_lea.hbm %s7963_s18, 32 }
  0x52   : > { %s586_s30 = sshll.u32 %s585_s19, 4  ;;  %s587_s30 = int_to_ptr.hbm [resolvable:$true] %s586_s30 }
  0x53   : > { %s7108_s8 = sshra.s32 %s587_s30, 4  ;;  %s7109_s8 = int_to_ptr.hbm [resolvable:$true] %s7108_s8 }
  0x54   : > { %s7110_s10 = scalar_lea.hbm %s7109_s8, 16  ;;  %p7116_p11 = scmp.lt.s32.totalorder %s7109_s8, %s7963_s18 }
  0x55   : > { %p7111_p8 = scmp.ne.s32.totalorder %s7109_s8, %s7110_s10  ;;  %p7117_p0 = scmp.lt.s32.totalorder %s7115_s0, %s7110_s10 }
  0x57   : > { %p7113_p10 = pnand %p7112_p9, %p7111_p8  ;;  %p7118_p2 = por %p7117_p0, %p7116_p11 }
  0x59   : > { %p7114_p13 = pneg %p7113_p10 }
  0x5b   : > { %p7119_p5 = pnand %p7118_p2, %p7114_p13 }
  0x5d   : > { %7122 = shalt.err (!%p7119_p5)
}
  0x5e   : > { %s7965_s25 = smov 8   ;;  %s7966_s19 = smov 128  }
  0x5f   : > { %6669 = dma.hbm_to_vmem [thread:$0]  (!%p7514_p7), %s587_s30, 256, %s589_s9, %s577_s7, %s7966_s19, %s7966_s19, %s7965_s25  }
  0x60   : > { %s6203_s26 = sshll.u32 %s7262_s24, 3  ;;  %s602_s14 = scalar_lea.vmem [#allocation5], %s4640_s6 }
  0x61   : > { %s607_s16 = scalar_lea.hbm %s7911_s1, %s6203_s26  ;;  %s611_s27 = sshll.u32 %s602_s14, 4  ;;  %s612_s27 = int_to_ptr.vmem [resolvable:$true] %s611_s27 }
  0x62   : > { %s609_s8 = sshll.u32 %s607_s16, 4  ;;  %s599_s10 = scalar_lea.sflag [#allocation6], %s598_s5  ;;  %s610_s8 = int_to_ptr.hbm [resolvable:$true] %s609_s8 }
  0x63   : > { %s7138_s0 = sshra.s32 %s610_s8, 4  ;;  %s7145_s30 = scalar_lea.hbm %s7911_s1, 16  ;;  %s7139_s0 = int_to_ptr.hbm [resolvable:$true] %s7138_s0 }
  0x64   : > { %s7140_s11 = scalar_lea.hbm %s7139_s0, 8  ;;  %p7146_p13 = scmp.lt.s32.totalorder %s7139_s0, %s7911_s1 }
  0x65   : > { %p7141_p5 = scmp.ne.s32.totalorder %s7139_s0, %s7140_s11  ;;  %p7147_p11 = scmp.lt.s32.totalorder %s7145_s30, %s7140_s11 }
  0x67   : > { %p7143_p8 = pnand %p7141_p5, %p7112_p9  ;;  %p7148_p0 = por %p7147_p11, %p7146_p13 }
  0x69   : > { %p7144_p10 = pneg %p7143_p8 }
  0x6b   : > { %p7149_p2 = pnand %p7148_p0, %p7144_p10 }
  0x6d   : > { %7152 = shalt.err (!%p7149_p2)
}
  0x6e   : > { %6672 = dma.hbm_to_vmem [thread:$0]  (!%p7514_p7), %s610_s8, 128, %s612_s27, %s599_s10  }
  0x6f   : > { %620 = sbr.rel (%p7397_p3) target bundleno = 2846 (0xb1e), region = 84  ;;  %s7555_s5 = sand.u32 (!%p7397_p3), 1, %s7254_s22  }
  0x70   : > { %s4644_s6 = sshll.u32 (!%p7397_p3), %s7555_s5, 4  ;;  %s623_s14 = scalar_lea.sflag (!%p7397_p3), [#allocation3], %s7555_s5 }
  0x71   : > { %s626_s19 = scalar_lea.vmem (!%p7397_p3), [#allocation2], %s4644_s6 }
  0x74   : > { %7213 = dma.done.wait (%p7490_p12), %s623_s14, 256  }
  0x75   : > { %7215 = vsyncadd (%p7490_p12), %s623_s14, 4294967040  ;;  %s632_s4 = sand.u32 1, %s7392_s28   ;;  %s4645_s29 = sshll.u32 %s7555_s5, 3 }
  0x76   : > { %s633_s26 = scalar_lea.sflag [#allocation6], %s632_s4  ;;  %s7565_s20 = scalar_lea.vmem [#allocation5], %s4645_s29 }
  0x77   : > { %7217 = dma.done.wait (%p7490_p12), %s633_s26, 128  }
  0x78   : > { %7219 = vsyncadd (%p7490_p12), %s633_s26, 4294967168 }
  0x79   : > { %7221 = dma.done.wait (%p61_p1), [#allocation6], 12288  }
  0x7a   : > { %7223 = vsyncadd (%p61_p1), [#allocation6], 4294955008 }
  0x7b   : > { %7225 = dma.done.wait (%p61_p1), [#allocation9], 4192  }
  0x7c   : > { %7227 = vsyncadd (%p61_p1), [#allocation9], 4294963104 }
  0x7d   : > { %7229 = dma.done.wait (%p61_p1), [#allocation12], 4128  }
  0x7e   : > { %7231 = vsyncadd (%p61_p1), [#allocation12], 4294963168 }
  0x7f   : > { %7233 = dma.done.wait (%p61_p1), [#allocation15], 8224  }
  0x80   : > { %7235 = vsyncadd (%p61_p1), [#allocation15], 4294959072 }
  0x81   : > { %7237 = dma.done.wait (%p61_p1), [#allocation18], 12288  }
  0x82   : > { %7239 = vsyncadd (%p61_p1), [#allocation18], 4294955008 }
  0x83   : > { %7241 = dma.done.wait (%p61_p1), [#allocation21], 8192  }
  0x84   : > { %7243 = vsyncadd (%p61_p1), [#allocation21], 4294959104  ;;  %v742_v0 = vld [vmem:[%s626_s19] sm:$0xff]  ;;  %v743_v3 = vld [vmem:[%s626_s19 + $0x8] sm:$0xff]  ;;  %v7280_v8 = vmov 256.0   ;;  %vm1641_vm11 = vcmask 1043456  }
  0x85   : > { %v7595_v1 = vunpack.c.l.bf16 %v742_v0  ;;  %v7597_v2 = vunpack.c.h.bf16 %v742_v0  ;;  %v7601_v5 = vunpack.c.l.bf16 %v743_v3  ;;  %v7603_v6 = vunpack.c.h.bf16 %v743_v3  ;;  %v4827_v29 = vld [vmem:[#allocation7 + $0x150] sm:$0xf]  ;;  %v6249_v30 = vld [vmem:[#allocation7 + $0x164] sm:$0xf0]  ;;  %v6246_v34 = vld [vmem:[#allocation7 + $0x154] sm:$0xf] }
  0x86   : > { %6750 = vrcp.f32 %v7280_v8  ;;  %v5019_v31 = vld [vmem:[#allocation7 + $0x2d0] sm:$0xf]  ;;  %v4828_v32 = vor.u32 %v6249_v30, %v4827_v29  ;;  %v6297_v33 = vld [vmem:[#allocation7 + $0x2e4] sm:$0xf0]  ;;  %v4829_v35 = vld [vmem:[#allocation7 + $0x168] sm:$0xf0] }
  0x87   : > { %v749_v4 = vadd.f32 %v7597_v2, %v7595_v1  ;;  %v752_v7 = vadd.f32 %v7603_v6, %v7601_v5  ;;  %v5020_v36 = vor.u32 %v6297_v33, %v5019_v31  ;;  %v4832_v37 = vor.u32 %v6246_v34, %v4829_v35  ;;  %v6294_v38 = vld [vmem:[#allocation7 + $0x2d4] sm:$0xf]  ;;  %v5021_v39 = vld [vmem:[#allocation7 + $0x2e8] sm:$0xf0]  ;;  %v4803_v41 = vld [vmem:[#allocation7 + $0x120] sm:$0xf] }
  0x88   : > { %1459 = vmatpush.bf16.msra.mxu0 %v4828_v32  ;;  %v5024_v40 = vor.u32 %v6294_v38, %v5021_v39  ;;  %v6243_v42 = vld [vmem:[#allocation7 + $0x134] sm:$0xf0]  ;;  %v4995_v43 = vld [vmem:[#allocation7 + $0x2a0] sm:$0xf]  ;;  %v6240_v46 = vld [vmem:[#allocation7 + $0x124] sm:$0xf] }
  0x89   : > { %750 = vadd.xlane.f32.xlu0 %v749_v4  ;;  %1473 = vmatpush.bf16.msra.mxu1 %v5020_v36  ;;  %v4804_v44 = vor.u32 %v6243_v42, %v4803_v41  ;;  %v6291_v45 = vld [vmem:[#allocation7 + $0x2b4] sm:$0xf0]  ;;  %v4805_v47 = vld [vmem:[#allocation7 + $0x138] sm:$0xf0]  ;;  %v6288_v50 = vld [vmem:[#allocation7 + $0x2a4] sm:$0xf] }
  0x8a   : > { %1487 = vmatpush.bf16.msra.mxu2 %v4832_v37  ;;  %1501 = vmatpush.bf16.msra.mxu3 %v5024_v40  ;;  %v4996_v48 = vor.u32 %v6291_v45, %v4995_v43  ;;  %v4808_v49 = vor.u32 %v6240_v46, %v4805_v47  ;;  %v4997_v51 = vld [vmem:[#allocation7 + $0x2b8] sm:$0xf0]  ;;  %v4779_v53 = vld [vmem:[#allocation7 + $0xf0] sm:$0xf]  ;;  %v6237_v54 = vld [vmem:[#allocation7 + $0x104] sm:$0xf0] }
  0x8b   : > { %v5000_v52 = vor.u32 %v6288_v50, %v4997_v51  ;;  %v4971_v55 = vld [vmem:[#allocation7 + $0x270] sm:$0xf]  ;;  %v4780_v56 = vor.u32 %v6237_v54, %v4779_v53  ;;  %v6285_v57 = vld [vmem:[#allocation7 + $0x284] sm:$0xf0]  ;;  %v6234_v58 = vld [vmem:[#allocation7 + $0xf4] sm:$0xf] }
  0x8c   : > { %v6751_v9 = vpop.eup %6750  ;;  %1460 = vmatpush.bf16.msra.mxu0 %v4804_v44  ;;  %v4781_v59 = vld [vmem:[#allocation7 + $0x108] sm:$0xf0]  ;;  %v4972_v60 = vor.u32 %v6285_v57, %v4971_v55  ;;  %v6282_v62 = vld [vmem:[#allocation7 + $0x274] sm:$0xf]  ;;  %v4755_v3 = vld [vmem:[#allocation7 + $0xc0] sm:$0xf] }
  0x8d   : > { %v756_v10 = vmul.f32 256.0, %v6751_v9  ;;  %vm760_vm0 = vweird.f32 %v6751_v9  ;;  %1474 = vmatpush.bf16.msra.mxu1 %v4996_v48  ;;  %v4784_v61 = vor.u32 %v6234_v58, %v4781_v59  ;;  %v4973_v63 = vld [vmem:[#allocation7 + $0x288] sm:$0xf0]  ;;  %v6231_v4 = vld [vmem:[#allocation7 + $0xd4] sm:$0xf0]  ;;  %vm1698_vm12 = vcmask 130048  }
  0x8e   : > { %1488 = vmatpush.bf16.msra.mxu2 %v4808_v49  ;;  %1502 = vmatpush.bf16.msra.mxu3 %v5000_v52  ;;  %v4976_v0 = vor.u32 %v6282_v62, %v4973_v63  ;;  %v4756_v8 = vor.u32 %v6231_v4, %v4755_v3  ;;  %v6270_v31 = vld [vmem:[#allocation7 + $0x214] sm:$0xf]  ;;  %v4925_v32 = vld [vmem:[#allocation7 + $0x228] sm:$0xf0]  ;;  %v4707_v34 = vld [vmem:[#allocation7 + $0x60] sm:$0xf] }
  0x8f   : > { %v757_v11 = vsub.f32 1.0, %v756_v10  ;;  %v6228_v10 = vld [vmem:[#allocation7 + $0xc4] sm:$0xf]  ;;  %v4928_v33 = vor.u32 %v6270_v31, %v4925_v32  ;;  %v6219_v35 = vld [vmem:[#allocation7 + $0x74] sm:$0xf0]  ;;  %s7967_s27 = sld [smem:[#allocation40_spill]] }
  0x90   : > { %1461 = vmatpush.bf16.msra.mxu0 %v4780_v56  ;;  %v4899_v36 = vld [vmem:[#allocation7 + $0x1e0] sm:$0xf]  ;;  %v4708_v37 = vor.u32 %v6219_v35, %v4707_v34  ;;  %v6267_v38 = vld [vmem:[#allocation7 + $0x1f4] sm:$0xf0]  ;;  %v6216_v39 = vld [vmem:[#allocation7 + $0x64] sm:$0xf] }
  0x91   : > { %753 = vadd.xlane.f32.xlu0 %v752_v7  ;;  %v758_v12 = vmul.f32 %v6751_v9, %v757_v11  ;;  %1475 = vmatpush.bf16.msra.mxu1 %v4972_v60  ;;  %v4947_v7 = vld [vmem:[#allocation7 + $0x240] sm:$0xf]  ;;  %v4757_v11 = vld [vmem:[#allocation7 + $0xd8] sm:$0xf0]  ;;  %v4900_v41 = vor.u32 %v6267_v38, %v4899_v36  ;;  %v6264_v43 = vld [vmem:[#allocation7 + $0x1e4] sm:$0xf] }
  0x92   : > { %1489 = vmatpush.bf16.msra.mxu2 %v4784_v61  ;;  %1503 = vmatpush.bf16.msra.mxu3 %v4976_v0  ;;  %v4709_v40 = vld [vmem:[#allocation7 + $0x78] sm:$0xf0]  ;;  %v4683_v46 = vld [vmem:[#allocation7 + $0x30] sm:$0xf]  ;;  %v6213_v47 = vld [vmem:[#allocation7 + $0x44] sm:$0xf0] }
  0x93   : > { %v759_v13 = vadd.f32 %v6751_v9, %v758_v12  ;;  %v4712_v42 = vor.u32 %v6216_v39, %v4709_v40  ;;  %v4901_v44 = vld [vmem:[#allocation7 + $0x1f8] sm:$0xf0]  ;;  %v4875_v48 = vld [vmem:[#allocation7 + $0x1b0] sm:$0xf]  ;;  %v4684_v49 = vor.u32 %v6213_v47, %v4683_v46  ;;  %v6261_v50 = vld [vmem:[#allocation7 + $0x1c4] sm:$0xf0] }
  0x94   : > { %1462 = vmatpush.bf16.msra.mxu0 %v4756_v8  ;;  %v4904_v45 = vor.u32 %v6264_v43, %v4901_v44  ;;  %v6210_v51 = vld [vmem:[#allocation7 + $0x34] sm:$0xf]  ;;  %v4685_v52 = vld [vmem:[#allocation7 + $0x48] sm:$0xf0]  ;;  %v4876_v53 = vor.u32 %v6261_v50, %v4875_v48  ;;  %v4659_v58 = vld [vmem:[#allocation7] sm:$0xf] }
  0x95   : > { %v7607_v14 = vsel %vm760_vm0, %v6751_v9, %v759_v13  ;;  %v6279_v9 = vld [vmem:[#allocation7 + $0x254] sm:$0xf0]  ;;  %v4760_v13 = vor.u32 %v6228_v10, %v4757_v11  ;;  %v4688_v54 = vor.u32 %v6210_v51, %v4685_v52  ;;  %v6258_v55 = vld [vmem:[#allocation7 + $0x1b4] sm:$0xf]  ;;  %v4877_v56 = vld [vmem:[#allocation7 + $0x1c8] sm:$0xf0] }
  0x96   : > { %v4948_v12 = vor.u32 %v6279_v9, %v4947_v7  ;;  %v4880_v57 = vor.u32 %v6258_v55, %v4877_v56  ;;  %v6207_v59 = vld [vmem:[#allocation7 + $0x14] sm:$0xf0]  ;;  %v4851_v60 = vld [vmem:[#allocation7 + $0x180] sm:$0xf]  ;;  %v6204_v63 = vld [vmem:[#allocation7 + $0x4] sm:$0xf] }
  0x97   : > { %1490 = vmatpush.bf16.msra.mxu2 %v4760_v13  ;;  %v4660_v61 = vor.u32 %v6207_v59, %v4659_v58  ;;  %v6255_v62 = vld [vmem:[#allocation7 + $0x194] sm:$0xf0]  ;;  %v4661_v0 = vld [vmem:[#allocation7 + $0x18] sm:$0xf0]  ;;  %v6252_v7 = vld [vmem:[#allocation7 + $0x184] sm:$0xf] }
  0x98   : > { %1476 = vmatpush.bf16.msra.mxu1 %v4948_v12  ;;  %v4852_v3 = vor.u32 %v6255_v62, %v4851_v60  ;;  %v4664_v4 = vor.u32 %v6204_v63, %v4661_v0  ;;  %v4853_v8 = vld [vmem:[#allocation7 + $0x198] sm:$0xf0]  ;;  %v4835_v9 = vld [vmem:[#allocation7 + $0x158] sm:$0xf]  ;;  %v6250_v11 = vld [vmem:[#allocation7 + $0x16c] sm:$0xf0] }
  0x99   : > { %v4856_v10 = vor.u32 %v6252_v7, %v4853_v8  ;;  %v5027_v12 = vld [vmem:[#allocation7 + $0x2d8] sm:$0xf]  ;;  %v6298_v13 = vld [vmem:[#allocation7 + $0x2ec] sm:$0xf0]  ;;  %v5003_v31 = vld [vmem:[#allocation7 + $0x2a8] sm:$0xf] }
  0x9a   : > { %v6292_v32 = vld [vmem:[#allocation7 + $0x2bc] sm:$0xf0]  ;;  %v4813_v36 = vld [vmem:[#allocation7 + $0x140] sm:$0xf0]  ;;  %v4787_v40 = vld [vmem:[#allocation7 + $0xf8] sm:$0xf] }
  0x9b   : > { %v5004_v35 = vor.u32 %v6292_v32, %v5003_v31  ;;  %v5005_v39 = vld [vmem:[#allocation7 + $0x2c0] sm:$0xf0]  ;;  %v6235_v46 = vld [vmem:[#allocation7 + $0xfc] sm:$0xf]  ;;  %v4789_v47 = vld [vmem:[#allocation7 + $0x110] sm:$0xf0] }
  0x9c   : > { %v6283_v50 = vld [vmem:[#allocation7 + $0x27c] sm:$0xf]  ;;  %v4981_v51 = vld [vmem:[#allocation7 + $0x290] sm:$0xf0]  ;;  %v4763_v52 = vld [vmem:[#allocation7 + $0xc8] sm:$0xf] }
  0x9d   : > { %v4955_v55 = vld [vmem:[#allocation7 + $0x248] sm:$0xf]  ;;  %v6280_v56 = vld [vmem:[#allocation7 + $0x25c] sm:$0xf0]  ;;  %v4765_v58 = vld [vmem:[#allocation7 + $0xe0] sm:$0xf0] }
  0x9e   : > { %v6277_v59 = vld [vmem:[#allocation7 + $0x24c] sm:$0xf]  ;;  %v4956_v62 = vor.u32 %v6280_v56, %v4955_v55  ;;  %v4957_v63 = vld [vmem:[#allocation7 + $0x260] sm:$0xf0]  ;;  %v4739_v0 = vld [vmem:[#allocation7 + $0x98] sm:$0xf] }
  0x9f   : > { %v6217_v32 = vld [vmem:[#allocation7 + $0x6c] sm:$0xf]  ;;  %s7968_s0 = sld [smem:[#allocation42_spill]]  ;;  %s4656_s6 = sshll.u32 %s7555_s5, 5 }
  0xa0   : > { %s7969_s9 = sld [smem:[#allocation44_spill]]  ;;  %s7867_s14 = scalar_lea.vmem [#allocation22], %s4656_s6 }
  0xa1   : > { %s7970_s25 = sld [smem:[#allocation46_spill]]  ;;  %s6588_s19 = sshll.u32 %s7392_s28, 5 }
  0xa2   : > { %s7971_s26 = sld [smem:[#allocation47_spill]]  ;;  %s4430_s2 = sshll.u32 %s7867_s14, 4  ;;  %s4431_s2 = int_to_ptr.vmem [resolvable:$true] %s4430_s2 }
  0xa3   : > { %s4418_s28 = scalar_lea.sflag [#allocation4], %s7555_s5 }
  0xa8   : > { %s7188_s11 = scalar_lea.hbm %s7971_s26, 64 }
  0xfc   : > { %v751_v15 = vpop.xlane.xlu0 %750 }
  0xfd   : > { %v762_v16 = vmul.f32 %v7607_v14, %v751_v15  ;;  %v6276_v15 = vld [vmem:[#allocation7 + $0x244] sm:$0xf] }
  0xff   : > { %v7611_v17 = vsub.f32 %v7595_v1, %v762_v16  ;;  %v7614_v18 = vsub.f32 %v7597_v2, %v762_v16  ;;  %v4949_v16 = vld [vmem:[#allocation7 + $0x258] sm:$0xf0] }
 0x101   : > { %v768_v19 = vmul.f32 %v7611_v17, %v7611_v17  ;;  %v769_v20 = vmul.f32 %v7614_v18, %v7614_v18 }
 0x103   : > { %v772_v21 = vadd.f32 %v769_v20, %v768_v19  ;;  %v4952_v19 = vor.u32 %v6276_v15, %v4949_v16  ;;  %v4731_v20 = vld [vmem:[#allocation7 + $0x90] sm:$0xf]  ;;  %v4836_v15 = vor.u32 %v6250_v11, %v4835_v9  ;;  %v5028_v16 = vor.u32 %v6298_v13, %v5027_v12  ;;  %v4931_v9 = vld [vmem:[#allocation7 + $0x218] sm:$0xf]  ;;  %v6223_v13 = vld [vmem:[#allocation7 + $0x9c] sm:$0xf] }
 0x104   : > { %v754_v22 = vpop.xlane.xlu0 %753  ;;  %v4960_v12 = vor.u32 %v6277_v59, %v4957_v63 }
 0x105   : > { %v763_v23 = vmul.f32 %v7607_v14, %v754_v22  ;;  %773 = vadd.xlane.f32.xlu1 %v772_v21  ;;  %v6225_v21 = vld [vmem:[#allocation7 + $0xa4] sm:$0xf0]  ;;  %v4923_v22 = vld [vmem:[#allocation7 + $0x210] sm:$0xf]  ;;  %1504 = vmatpush.bf16.msra.mxu3 %v4952_v19  ;;  %v6247_v19 = vld [vmem:[#allocation7 + $0x15c] sm:$0xf] }
 0x107   : > { %v7622_v24 = vsub.f32 %v7601_v5, %v763_v23  ;;  %v7625_v25 = vsub.f32 %v7603_v6, %v763_v23  ;;  %v4732_v23 = vor.u32 %v6225_v21, %v4731_v20  ;;  %v4837_v20 = vld [vmem:[#allocation7 + $0x170] sm:$0xf0]  ;;  %v6295_v21 = vld [vmem:[#allocation7 + $0x2dc] sm:$0xf] }
 0x109   : > { %v770_v26 = vmul.f32 %v7622_v24, %v7622_v24  ;;  %v771_v27 = vmul.f32 %v7625_v25, %v7625_v25  ;;  %1463 = vmatpush.bf16.msra.mxu0 %v4732_v23  ;;  %1505 = vmatpush.bf16.msra.mxu3 %v4928_v33  ;;  %v5029_v23 = vld [vmem:[#allocation7 + $0x2f0] sm:$0xf0]  ;;  %v6241_v33 = vld [vmem:[#allocation7 + $0x12c] sm:$0xf] }
 0x10a   : > { %v4816_v38 = vor.u32 %v6241_v33, %v4813_v36  ;;  %v4717_v33 = vld [vmem:[#allocation7 + $0x80] sm:$0xf0] }
 0x10b   : > { %v775_v28 = vadd.f32 %v771_v27, %v770_v26  ;;  %v6273_v26 = vld [vmem:[#allocation7 + $0x224] sm:$0xf0]  ;;  %v6222_v27 = vld [vmem:[#allocation7 + $0x94] sm:$0xf]  ;;  %v4909_v36 = vld [vmem:[#allocation7 + $0x200] sm:$0xf0] }
 0x10c   : > { %v4924_v29 = vor.u32 %v6273_v26, %v4923_v22  ;;  %v4840_v22 = vor.u32 %v6247_v19, %v4837_v20  ;;  %v4811_v26 = vld [vmem:[#allocation7 + $0x128] sm:$0xf]  ;;  %v4933_v19 = vld [vmem:[#allocation7 + $0x230] sm:$0xf0] }
 0x10d   : > { %776 = vadd.xlane.f32.xlu1 %v775_v28  ;;  %v4733_v28 = vld [vmem:[#allocation7 + $0xa8] sm:$0xf0]  ;;  %1464 = vmatpush.bf16.msra.mxu0 %v4708_v37 }
 0x10e   : > { %v4736_v30 = vor.u32 %v6222_v27, %v4733_v28  ;;  %1477 = vmatpush.bf16.msra.mxu1 %v4924_v29  ;;  %1506 = vmatpush.bf16.msra.mxu3 %v4904_v45  ;;  %v6244_v27 = vld [vmem:[#allocation7 + $0x13c] sm:$0xf0]  ;;  %v5032_v29 = vor.u32 %v6295_v21, %v5029_v23  ;;  %v6289_v37 = vld [vmem:[#allocation7 + $0x2ac] sm:$0xf]  ;;  %v6286_v45 = vld [vmem:[#allocation7 + $0x28c] sm:$0xf0] }
 0x10f   : > { %v5008_v43 = vor.u32 %v6289_v37, %v5005_v39  ;;  %v4715_v23 = vld [vmem:[#allocation7 + $0x68] sm:$0xf] }
 0x110   : > { %1491 = vmatpush.bf16.msra.mxu2 %v4736_v30  ;;  %v4812_v30 = vor.u32 %v6244_v27, %v4811_v26  ;;  %v6220_v27 = vld [vmem:[#allocation7 + $0x7c] sm:$0xf0] }
 0x111   : > { %1465 = vmatpush.bf16.msra.mxu0 %v4684_v49  ;;  %v4792_v49 = vor.u32 %v6235_v46, %v4789_v47 }
 0x112   : > { %1478 = vmatpush.bf16.msra.mxu1 %v4900_v41  ;;  %1507 = vmatpush.bf16.msra.mxu3 %v4880_v57  ;;  %v6238_v41 = vld [vmem:[#allocation7 + $0x10c] sm:$0xf0]  ;;  %v6229_v57 = vld [vmem:[#allocation7 + $0xcc] sm:$0xf] }
 0x113   : > { %v4788_v44 = vor.u32 %v6238_v41, %v4787_v40  ;;  %v4768_v8 = vor.u32 %v6229_v57, %v4765_v58  ;;  %v4691_v40 = vld [vmem:[#allocation7 + $0x38] sm:$0xf]  ;;  %v6214_v41 = vld [vmem:[#allocation7 + $0x4c] sm:$0xf0] }
 0x114   : > { %1492 = vmatpush.bf16.msra.mxu2 %v4712_v42  ;;  %v4979_v42 = vld [vmem:[#allocation7 + $0x278] sm:$0xf] }
 0x115   : > { %1466 = vmatpush.bf16.msra.mxu0 %v4660_v61  ;;  %v4980_v48 = vor.u32 %v6286_v45, %v4979_v42  ;;  %v6262_v45 = vld [vmem:[#allocation7 + $0x1cc] sm:$0xf0] }
 0x116   : > { %1479 = vmatpush.bf16.msra.mxu1 %v4876_v53  ;;  %1508 = vmatpush.bf16.msra.mxu3 %v4856_v10  ;;  %v4984_v53 = vor.u32 %v6283_v50, %v4981_v51  ;;  %v6274_v10 = vld [vmem:[#allocation7 + $0x22c] sm:$0xf0]  ;;  %v4693_v50 = vld [vmem:[#allocation7 + $0x50] sm:$0xf0]  ;;  %v4692_v51 = vor.u32 %v6214_v41, %v4691_v40 }
 0x118   : > { %1493 = vmatpush.bf16.msra.mxu2 %v4688_v54  ;;  %v6232_v54 = vld [vmem:[#allocation7 + $0xdc] sm:$0xf0] }
 0x119   : > { %1515 = vmatpush.bf16.msrb.mxu0 %v4836_v15  ;;  %v4764_v61 = vor.u32 %v6232_v54, %v4763_v52  ;;  %v4741_v15 = vld [vmem:[#allocation7 + $0xb0] sm:$0xf0]  ;;  %v6259_v52 = vld [vmem:[#allocation7 + $0x1bc] sm:$0xf] }
 0x11a   : > { %1480 = vmatpush.bf16.msra.mxu1 %v4852_v3  ;;  %1557 = vmatpush.bf16.msrb.mxu3 %v5032_v29  ;;  %v6226_v3 = vld [vmem:[#allocation7 + $0xac] sm:$0xf0]  ;;  %v4744_v26 = vor.u32 %v6223_v13, %v4741_v15  ;;  %v6268_v29 = vld [vmem:[#allocation7 + $0x1fc] sm:$0xf0]  ;;  %v4669_v13 = vld [vmem:[#allocation7 + $0x20] sm:$0xf0] }
 0x11b   : > { %v4740_v21 = vor.u32 %v6226_v3, %v4739_v0  ;;  %v4667_v3 = vld [vmem:[#allocation7 + $0x8] sm:$0xf] }
 0x11c   : > { %1494 = vmatpush.bf16.msra.mxu2 %v4664_v4 }
 0x11d   : > { %1516 = vmatpush.bf16.msrb.mxu0 %v4812_v30 }
 0x11e   : > { %1529 = vmatpush.bf16.msrb.mxu1 %v5028_v16  ;;  %1558 = vmatpush.bf16.msrb.mxu3 %v5008_v43  ;;  %v6271_v16 = vld [vmem:[#allocation7 + $0x21c] sm:$0xf]  ;;  %v4720_v43 = vor.u32 %v6217_v32, %v4717_v33 }
 0x11f   : > { %v4936_v31 = vor.u32 %v6271_v16, %v4933_v19  ;;  %v4861_v19 = vld [vmem:[#allocation7 + $0x1a0] sm:$0xf0] }
 0x120   : > { %1543 = vmatpush.bf16.msrb.mxu2 %v4840_v22  ;;  %v4932_v22 = vor.u32 %v6274_v10, %v4931_v9  ;;  %v6256_v9 = vld [vmem:[#allocation7 + $0x19c] sm:$0xf0] }
 0x121   : > { %1517 = vmatpush.bf16.msrb.mxu0 %v4788_v44  ;;  %v4883_v44 = vld [vmem:[#allocation7 + $0x1b8] sm:$0xf] }
 0x122   : > { %1530 = vmatpush.bf16.msrb.mxu1 %v5004_v35  ;;  %1559 = vmatpush.bf16.msrb.mxu3 %v4984_v53  ;;  %v6265_v35 = vld [vmem:[#allocation7 + $0x1ec] sm:$0xf]  ;;  %v4885_v53 = vld [vmem:[#allocation7 + $0x1d0] sm:$0xf0]  ;;  %v4884_v56 = vor.u32 %v6262_v45, %v4883_v44  ;;  %v4843_v44 = vld [vmem:[#allocation7 + $0x160] sm:$0xf] }
 0x124   : > { %1544 = vmatpush.bf16.msrb.mxu2 %v4816_v38  ;;  %v4716_v38 = vor.u32 %v6220_v27, %v4715_v23 }
 0x125   : > { %1518 = vmatpush.bf16.msrb.mxu0 %v4764_v61  ;;  %v4888_v61 = vor.u32 %v6259_v52, %v4885_v53  ;;  %v6296_v52 = vld [vmem:[#allocation7 + $0x2e4] sm:$0xf] }
 0x126   : > { %1531 = vmatpush.bf16.msrb.mxu1 %v4980_v48  ;;  %1560 = vmatpush.bf16.msrb.mxu3 %v4960_v12  ;;  %v4912_v48 = vor.u32 %v6265_v35, %v4909_v36  ;;  %v6205_v12 = vld [vmem:[#allocation7 + $0xc] sm:$0xf] }
 0x127   : > { %v4672_v16 = vor.u32 %v6205_v12, %v4669_v13  ;;  %v6239_v12 = vld [vmem:[#allocation7 + $0x114] sm:$0xf0] }
 0x128   : > { %1545 = vmatpush.bf16.msrb.mxu2 %v4792_v49  ;;  %v6211_v49 = vld [vmem:[#allocation7 + $0x3c] sm:$0xf] }
 0x129   : > { %1519 = vmatpush.bf16.msrb.mxu0 %v4740_v21  ;;  %v4696_v58 = vor.u32 %v6211_v49, %v4693_v50  ;;  %v6299_v49 = vld [vmem:[#allocation7 + $0x2f4] sm:$0xf0]  ;;  %v6248_v50 = vld [vmem:[#allocation7 + $0x164] sm:$0xf] }
 0x12a   : > { %1532 = vmatpush.bf16.msrb.mxu1 %v4956_v62  ;;  %1561 = vmatpush.bf16.msrb.mxu3 %v4936_v31 }
 0x12c   : > { %1546 = vmatpush.bf16.msrb.mxu2 %v4768_v8  ;;  %v4859_v8 = vld [vmem:[#allocation7 + $0x188] sm:$0xf] }
 0x12d   : > { %1520 = vmatpush.bf16.msrb.mxu0 %v4716_v38  ;;  %v4860_v15 = vor.u32 %v6256_v9, %v4859_v8  ;;  %v5013_v8 = vld [vmem:[#allocation7 + $0x2c8] sm:$0xf0] }
 0x12e   : > { %1533 = vmatpush.bf16.msrb.mxu1 %v4932_v22  ;;  %1562 = vmatpush.bf16.msrb.mxu3 %v4912_v48  ;;  %v5035_v48 = vld [vmem:[#allocation7 + $0x2e0] sm:$0xf] }
 0x130   : > { %1547 = vmatpush.bf16.msrb.mxu2 %v4744_v26 }
 0x131   : > { %1521 = vmatpush.bf16.msrb.mxu0 %v4692_v51  ;;  %v4845_v51 = vld [vmem:[#allocation7 + $0x178] sm:$0xf0] }
 0x132   : > { %1563 = vmatpush.bf16.msrb.mxu3 %v4888_v61 }
 0x134   : > { %1548 = vmatpush.bf16.msrb.mxu2 %v4720_v43 }
 0x138   : > { %1549 = vmatpush.bf16.msrb.mxu2 %v4696_v58 }
 0x13c   : > { %1550 = vmatpush.bf16.msrb.mxu2 %v4672_v16  ;;  %v6287_v16 = vld [vmem:[#allocation7 + $0x294] sm:$0xf0] }
 0x178   : > { %v774_v28 = vpop.xlane.xlu1 %773 }
 0x179   : > { %v7631_v34 = vmul.f32 0.003921569, %v774_v28  ;;  %v4907_v28 = vld [vmem:[#allocation7 + $0x1e8] sm:$0xf] }
 0x17a   : > { %v4908_v39 = vor.u32 %v6268_v29, %v4907_v28 }
 0x17b   : > { %6752 = vrsqrt.f32 %v7631_v34  ;;  %vm787_vm1 = vcmp.eq.f32.partialorder %v7631_v34, inf  ;;  %v790_v57 = vand.u32 2147483648, %v7631_v34  ;;  %vm789_vm2 = vcmp.eq.f32.partialorder %v7631_v34, 0.0 }
 0x17c   : > { %1534 = vmatpush.bf16.msrb.mxu1 %v4908_v39 }
 0x180   : > { %v777_v60 = vpop.xlane.xlu1 %776  ;;  %1535 = vmatpush.bf16.msrb.mxu1 %v4884_v56 }
 0x181   : > { %v6753_v4 = vpop.eup %6752  ;;  %v7634_v7 = vmul.f32 0.003921569, %v777_v60 }
 0x182   : > { %v781_v11 = vmul.f32 %v6753_v4, %v7631_v34 }
 0x183   : > { %6754 = vrsqrt.f32 %v7634_v7  ;;  %vm799_vm3 = vcmp.eq.f32.partialorder %v7634_v7, inf  ;;  %v802_v22 = vand.u32 2147483648, %v7634_v7  ;;  %vm801_vm4 = vcmp.eq.f32.partialorder %v7634_v7, 0.0 }
 0x184   : > { %v782_v20 = vmul.f32 %v6753_v4, %v781_v11  ;;  %1536 = vmatpush.bf16.msrb.mxu1 %v4860_v15  ;;  %v4987_v15 = vld [vmem:[#allocation7 + $0x280] sm:$0xf] }
 0x186   : > { %v783_v30 = vmul.f32 0.5, %v782_v20 }
 0x188   : > { %v784_v37 = vsub.f32 1.5, %v783_v30 }
 0x189   : > { %v6755_v42 = vpop.eup %6754 }
 0x18a   : > { %v785_v46 = vmul.f32 %v6753_v4, %v784_v37  ;;  %v793_v47 = vmul.f32 %v6755_v42, %v7634_v7  ;;  %v6208_v4 = vld [vmem:[#allocation7 + $0x1c] sm:$0xf0] }
 0x18b   : > { %v4668_v11 = vor.u32 %v6208_v4, %v4667_v3  ;;  %v4821_v3 = vld [vmem:[#allocation7 + $0x148] sm:$0xf0]  ;;  %v6290_v4 = vld [vmem:[#allocation7 + $0x2b4] sm:$0xf] }
 0x18c   : > { %v786_v54 = vmul.f32 %v785_v46, %v7631_v34  ;;  %v794_v55 = vmul.f32 %v6755_v42, %v793_v47  ;;  %v6251_v47 = vld [vmem:[#allocation7 + $0x174] sm:$0xf0] }
 0x18d   : > { %1522 = vmatpush.bf16.msrb.mxu0 %v4668_v11  ;;  %v4844_v58 = vor.u32 %v6251_v47, %v4843_v44  ;;  %v4795_v11 = vld [vmem:[#allocation7 + $0x100] sm:$0xf]  ;;  %v6275_v44 = vld [vmem:[#allocation7 + $0x234] sm:$0xf0]  ;;  %v6272_v47 = vld [vmem:[#allocation7 + $0x224] sm:$0xf] }
 0x18e   : > { %v788_v59 = vsel %vm787_vm1, %v7631_v34, %v786_v54  ;;  %v795_v60 = vmul.f32 0.5, %v794_v55  ;;  %v6253_v34 = vld [vmem:[#allocation7 + $0x18c] sm:$0xf] }
 0x18f   : > { %v791_v62 = vsel %vm789_vm2, %v790_v57, %v788_v59  ;;  %v4864_v21 = vor.u32 %v6253_v34, %v4861_v19  ;;  %v5037_v57 = vld [vmem:[#allocation7 + $0x2f8] sm:$0xf0]  ;;  %v5036_v59 = vor.u32 %v6299_v49, %v5035_v48  ;;  %v5016_v34 = vor.u32 %v6290_v4, %v5013_v8  ;;  %v6236_v19 = vld [vmem:[#allocation7 + $0x104] sm:$0xf]  ;;  %v6263_v4 = vld [vmem:[#allocation7 + $0x1d4] sm:$0xf0] }
 0x190   : > { %v804_v63 = vadd.f32 1e-06, %v791_v62  ;;  %v796_v0 = vsub.f32 1.5, %v795_v60  ;;  %v6245_v60 = vld [vmem:[#allocation7 + $0x144] sm:$0xf0]  ;;  %v5040_v61 = vor.u32 %v6296_v52, %v5037_v57 }
 0x191   : > { %1564 = vmatpush.bf16.msrb.mxu3 %v4864_v21  ;;  %v5011_v62 = vld [vmem:[#allocation7 + $0x2b0] sm:$0xf]  ;;  %v6284_v21 = vld [vmem:[#allocation7 + $0x284] sm:$0xf]  ;;  %v4941_v48 = vld [vmem:[#allocation7 + $0x238] sm:$0xf0] }
 0x192   : > { %6756 = vrsqrt.f32 %v804_v63  ;;  %v797_v10 = vmul.f32 %v6755_v42, %v796_v0  ;;  %vm812_vm6 = vweird.f32 %v804_v63  ;;  %v6242_v0 = vld [vmem:[#allocation7 + $0x134] sm:$0xf]  ;;  %v6221_v52 = vld [vmem:[#allocation7 + $0x84] sm:$0xf0]  ;;  %v6212_v8 = vld [vmem:[#allocation7 + $0x44] sm:$0xf] }
 0x193   : > { %v4824_v13 = vor.u32 %v6242_v0, %v4821_v3  ;;  %v6218_v57 = vld [vmem:[#allocation7 + $0x74] sm:$0xf]  ;;  %v4891_v3 = vld [vmem:[#allocation7 + $0x1c0] sm:$0xf] }
 0x194   : > { %v798_v20 = vmul.f32 %v797_v10, %v7634_v7 }
 0x196   : > { %v800_v23 = vsel %vm799_vm3, %v7634_v7, %v798_v20  ;;  %v4797_v20 = vld [vmem:[#allocation7 + $0x118] sm:$0xf0] }
 0x197   : > { %v803_v26 = vsel %vm801_vm4, %v802_v22, %v800_v23  ;;  %v4989_v22 = vld [vmem:[#allocation7 + $0x298] sm:$0xf0]  ;;  %v4796_v23 = vor.u32 %v6239_v12, %v4795_v11 }
 0x198   : > { %v6757_v27 = vpop.eup %6756  ;;  %v805_v28 = vadd.f32 1e-06, %v803_v26  ;;  %v4988_v26 = vor.u32 %v6287_v16, %v4987_v15  ;;  %v4893_v11 = vld [vmem:[#allocation7 + $0x1d8] sm:$0xf0]  ;;  %v6209_v15 = vld [vmem:[#allocation7 + $0x24] sm:$0xf0] }
 0x199   : > { %v807_v29 = vmul.f32 %v6757_v27, %v804_v63  ;;  %vm813_vm5 = vweird.f32 %v6757_v27  ;;  %v6293_v63 = vld [vmem:[#allocation7 + $0x2c4] sm:$0xf0] }
 0x19a   : > { %6758 = vrsqrt.f32 %v805_v28  ;;  %vm814_vm7 = vmor %vm812_vm6, %vm813_vm5  ;;  %vm822_vm9 = vweird.f32 %v805_v28  ;;  %v5012_v10 = vor.u32 %v6293_v63, %v5011_v62  ;;  %v6215_v62 = vld [vmem:[#allocation7 + $0x54] sm:$0xf0] }
 0x19b   : > { %v808_v30 = vmul.f32 %v6757_v27, %v807_v29  ;;  %v4800_v29 = vor.u32 %v6236_v19, %v4797_v20  ;;  %v4867_v20 = vld [vmem:[#allocation7 + $0x190] sm:$0xf] }
 0x19d   : > { %v809_v31 = vmul.f32 0.5, %v808_v30  ;;  %v4992_v30 = vor.u32 %v6284_v21, %v4989_v22  ;;  %v6257_v21 = vld [vmem:[#allocation7 + $0x1a4] sm:$0xf0]  ;;  %v6206_v22 = vld [vmem:[#allocation7 + $0x14] sm:$0xf] }
 0x19f   : > { %v810_v32 = vsub.f32 1.5, %v809_v31  ;;  %v4963_v31 = vld [vmem:[#allocation7 + $0x250] sm:$0xf] }
 0x1a0   : > { %v6759_v33 = vpop.eup %6758 }
 0x1a1   : > { %v817_v35 = vmul.f32 %v6759_v33, %v805_v28  ;;  %v811_v36 = vmul.f32 %v6757_v27, %v810_v32  ;;  %vm823_vm8 = vweird.f32 %v6759_v33  ;;  %v6233_v28 = vld [vmem:[#allocation7 + $0xe4] sm:$0xf0] }
 0x1a2   : > { %vm824_vm10 = vmor %vm822_vm9, %vm823_vm8  ;;  %v6281_v32 = vld [vmem:[#allocation7 + $0x264] sm:$0xf0] }
 0x1a3   : > { %v818_v37 = vmul.f32 %v6759_v33, %v817_v35  ;;  %v815_v39 = vsel %vm814_vm7, %v6757_v27, %v811_v36  ;;  %v4771_v27 = vld [vmem:[#allocation7 + $0xd0] sm:$0xf]  ;;  %v4773_v35 = vld [vmem:[#allocation7 + $0xe8] sm:$0xf0]  ;;  %v6278_v36 = vld [vmem:[#allocation7 + $0x254] sm:$0xf] }
 0x1a4   : > { %v826_v41 = vmul.f32 %v815_v39, %v7611_v17  ;;  %v827_v42 = vmul.f32 %v815_v39, %v7614_v18  ;;  %v4964_v39 = vor.u32 %v6281_v32, %v4963_v31  ;;  %vm2960_vm7 = vcmask 64512  }
 0x1a5   : > { %v819_v38 = vmul.f32 0.5, %v818_v37  ;;  %v4965_v37 = vld [vmem:[#allocation7 + $0x268] sm:$0xf0] }
 0x1a6   : > { %v830_v53 = vadd.f32 1.0, %v826_v41  ;;  %v831_v55 = vadd.f32 1.0, %v827_v42  ;;  %v4968_v42 = vor.u32 %v6278_v36, %v4965_v37 }
 0x1a7   : > { %v820_v40 = vsub.f32 1.5, %v819_v38  ;;  %v4772_v38 = vor.u32 %v6233_v28, %v4771_v27  ;;  %v4869_v27 = vld [vmem:[#allocation7 + $0x1a8] sm:$0xf0] }
 0x1a9   : > { %v821_v7 = vmul.f32 %v6759_v33, %v820_v40  ;;  %v4747_v40 = vld [vmem:[#allocation7 + $0xa0] sm:$0xf] }
 0x1ab   : > { %v825_v43 = vsel %vm824_vm10, %v6759_v33, %v821_v7  ;;  %v6230_v33 = vld [vmem:[#allocation7 + $0xd4] sm:$0xf]  ;;  %v6227_v7 = vld [vmem:[#allocation7 + $0xb4] sm:$0xf0] }
 0x1ac   : > { %v828_v45 = vmul.f32 %v825_v43, %v7622_v24  ;;  %v829_v46 = vmul.f32 %v825_v43, %v7625_v25  ;;  %v4819_v24 = vld [vmem:[#allocation7 + $0x130] sm:$0xf]  ;;  %v4848_v25 = vor.u32 %v6248_v50, %v4845_v51  ;;  %v4776_v41 = vor.u32 %v6230_v33, %v4773_v35  ;;  %v4939_v43 = vld [vmem:[#allocation7 + $0x220] sm:$0xf] }
 0x1ad   : > { %v4820_v9 = vor.u32 %v6245_v60, %v4819_v24  ;;  %v4748_v49 = vor.u32 %v6227_v7, %v4747_v40  ;;  %v4940_v50 = vor.u32 %v6275_v44, %v4939_v43  ;;  %v4723_v51 = vld [vmem:[#allocation7 + $0x70] sm:$0xf]  ;;  %v4917_v24 = vld [vmem:[#allocation7 + $0x208] sm:$0xf0]  ;;  %v7669_v35 = vld [vmem:[#allocation8] sm:$0x3f] }
 0x1ae   : > { %v832_v54 = vadd.f32 1.0, %v828_v45  ;;  %v833_v56 = vadd.f32 1.0, %v829_v46  ;;  %v6224_v45 = vld [vmem:[#allocation7 + $0xa4] sm:$0xf]  ;;  %v4749_v46 = vld [vmem:[#allocation7 + $0xb8] sm:$0xf0]  ;;  %v4724_v60 = vor.u32 %v6221_v52, %v4723_v51 }
 0x1af   : > { %v968_v36 = vperm.slane %v7669_v35, 1  ;;  %v967_v37 = vperm.slane %v7669_v35, 0 }
 0x1b0   : > { %v7653_v17 = vpack.c.bf16 %v832_v54, %v830_v53  ;;  %v7655_v18 = vpack.c.bf16 %v833_v56, %v831_v55  ;;  %v4752_v53 = vor.u32 %v6224_v45, %v4749_v46  ;;  %v4944_v54 = vor.u32 %v6272_v47, %v4941_v48  ;;  %v4915_v55 = vld [vmem:[#allocation7 + $0x1f0] sm:$0xf]  ;;  %v6269_v56 = vld [vmem:[#allocation7 + $0x204] sm:$0xf0] }
 0x1b2   : > { %1467 = vmatmul.bf16.vlgmr.msra.gmra.mxu0 %v7653_v17  ;;  %1481 = vmatmul.bf16.vlgmr.msra.gmra.mxu1 %v7655_v18 }
 0x1b3   : > { %1495 = vmatmul.bf16.vlgmr.msra.gmra.mxu2 %v7653_v17  ;;  %1509 = vmatmul.bf16.vlgmr.msra.gmra.mxu3 %v7655_v18 }
 0x1b4   : > { %1571 = vmatpush.bf16.msra.mxu0 %v4844_v58  ;;  %1585 = vmatpush.bf16.msra.mxu1 %v5036_v59  ;;  %v4725_v58 = vld [vmem:[#allocation7 + $0x88] sm:$0xf0]  ;;  %v6266_v59 = vld [vmem:[#allocation7 + $0x1f4] sm:$0xf] }
 0x1b5   : > { %1599 = vmatpush.bf16.msra.mxu2 %v4848_v25  ;;  %1613 = vmatpush.bf16.msra.mxu3 %v5040_v61  ;;  %v4916_v25 = vor.u32 %v6269_v56, %v4915_v55  ;;  %v4699_v61 = vld [vmem:[#allocation7 + $0x40] sm:$0xf]  ;;  %v4728_v63 = vor.u32 %v6218_v57, %v4725_v58  ;;  %v4920_v0 = vor.u32 %v6266_v59, %v4917_v24  ;;  %v970_v55 = vperm.slane %v7669_v35, 3 }
 0x1b6   : > { %v4700_v12 = vor.u32 %v6215_v62, %v4699_v61  ;;  %v969_v24 = vperm.slane %v7669_v35, 2 }
 0x1b8   : > { %1572 = vmatpush.bf16.msra.mxu0 %v4820_v9  ;;  %1586 = vmatpush.bf16.msra.mxu1 %v5012_v10  ;;  %v4701_v9 = vld [vmem:[#allocation7 + $0x58] sm:$0xf0]  ;;  %v6260_v10 = vld [vmem:[#allocation7 + $0x1c4] sm:$0xf] }
 0x1b9   : > { %1600 = vmatpush.bf16.msra.mxu2 %v4824_v13  ;;  %1614 = vmatpush.bf16.msra.mxu3 %v5016_v34  ;;  %v4892_v13 = vor.u32 %v6263_v4, %v4891_v3  ;;  %v4675_v34 = vld [vmem:[#allocation7 + $0x10] sm:$0xf]  ;;  %v4704_v16 = vor.u32 %v6212_v8, %v4701_v9  ;;  %v4896_v19 = vor.u32 %v6260_v10, %v4893_v11 }
 0x1ba   : > { %v4676_v28 = vor.u32 %v6209_v15, %v4675_v34 }
 0x1bc   : > { %1573 = vmatpush.bf16.msra.mxu0 %v4796_v23  ;;  %1587 = vmatpush.bf16.msra.mxu1 %v4988_v26  ;;  %v4677_v23 = vld [vmem:[#allocation7 + $0x28] sm:$0xf0]  ;;  %v6254_v26 = vld [vmem:[#allocation7 + $0x194] sm:$0xf] }
 0x1bd   : > { %1601 = vmatpush.bf16.msra.mxu2 %v4800_v29  ;;  %1615 = vmatpush.bf16.msra.mxu3 %v4992_v30  ;;  %v4868_v29 = vor.u32 %v6257_v21, %v4867_v20  ;;  %v4680_v30 = vor.u32 %v6206_v22, %v4677_v23  ;;  %v4872_v31 = vor.u32 %v6254_v26, %v4869_v27  ;;  %v971_v20 = vperm.slane %v7669_v35, 4 }
 0x1be   : > { %v972_v22 = vperm.slane %v7669_v35, 5 }
 0x1c0   : > { %1574 = vmatpush.bf16.msra.mxu0 %v4772_v38  ;;  %1588 = vmatpush.bf16.msra.mxu1 %v4964_v39 }
 0x1c1   : > { %1602 = vmatpush.bf16.msra.mxu2 %v4776_v41  ;;  %1616 = vmatpush.bf16.msra.mxu3 %v4968_v42 }
 0x1c2   : > { %1523 = vmatmul.bf16.vlgmr.msrb.gmra.mxu0 %v7653_v17  ;;  %1537 = vmatmul.bf16.vlgmr.msrb.gmra.mxu1 %v7655_v18 }
 0x1c3   : > { %1551 = vmatmul.bf16.vlgmr.msrb.gmra.mxu2 %v7653_v17  ;;  %1565 = vmatmul.bf16.vlgmr.msrb.gmra.mxu3 %v7655_v18 }
 0x1c4   : > { %1575 = vmatpush.bf16.msra.mxu0 %v4748_v49  ;;  %1589 = vmatpush.bf16.msra.mxu1 %v4940_v50 }
 0x1c5   : > { %1603 = vmatpush.bf16.msra.mxu2 %v4752_v53  ;;  %1617 = vmatpush.bf16.msra.mxu3 %v4944_v54 }
 0x1c8   : > { %1576 = vmatpush.bf16.msra.mxu0 %v4724_v60  ;;  %1590 = vmatpush.bf16.msra.mxu1 %v4916_v25 }
 0x1c9   : > { %1604 = vmatpush.bf16.msra.mxu2 %v4728_v63  ;;  %1618 = vmatpush.bf16.msra.mxu3 %v4920_v0 }
 0x1cc   : > { %1577 = vmatpush.bf16.msra.mxu0 %v4700_v12  ;;  %1591 = vmatpush.bf16.msra.mxu1 %v4892_v13 }
 0x1cd   : > { %1605 = vmatpush.bf16.msra.mxu2 %v4704_v16  ;;  %1619 = vmatpush.bf16.msra.mxu3 %v4896_v19 }
 0x1d0   : > { %1578 = vmatpush.bf16.msra.mxu0 %v4676_v28  ;;  %1592 = vmatpush.bf16.msra.mxu1 %v4868_v29 }
 0x1d1   : > { %1606 = vmatpush.bf16.msra.mxu2 %v4680_v30  ;;  %1620 = vmatpush.bf16.msra.mxu3 %v4872_v31 }
 0x1d3   : > { %1579 = vmatmul.bf16.vlgmr.msra.gmra.mxu0 %v7653_v17  ;;  %1593 = vmatmul.bf16.vlgmr.msra.gmra.mxu1 %v7655_v18 }
 0x1d4   : > { %1607 = vmatmul.bf16.vlgmr.msra.gmra.mxu2 %v7653_v17  ;;  %1621 = vmatmul.bf16.vlgmr.msra.gmra.mxu3 %v7655_v18 }
 0x22f   : > { %v1468_v32 = vpop.f32.mrf.mxu0  ;;  %v1482_v33 = vpop.f32.mrf.mxu1 }
 0x230   : > { %v1469_v42 = vadd.f32 %v1468_v32, %v967_v37 }
 0x232   : > { %v1483_v44 = vadd.f32 %v1482_v33, %v1469_v42 }
 0x236   : > { %v1496_v38 = vpop.f32.mrf.mxu2  ;;  %v1510_v39 = vpop.f32.mrf.mxu3 }
 0x237   : > { %v1497_v40 = vadd.f32 %v1496_v38, %v968_v36  ;;  %v1470_v7 = vpop.f32.mrf.mxu0  ;;  %v1484_v41 = vpop.f32.mrf.mxu1 }
 0x238   : > { %v1471_v45 = vadd.f32 %v1470_v7, %v967_v37 }
 0x239   : > { %v1511_v43 = vadd.f32 %v1510_v39, %v1497_v40 }
 0x23a   : > { %v1485_v49 = vadd.f32 %v1484_v41, %v1471_v45 }
 0x23b   : > { %v1627_v18 = vpack.c.bf16 %v1511_v43, %v1483_v44 }
 0x23d   : > { %v1646_v52 = vrot.slane %v1627_v18, 4  ;;  %v1648_v8 = vunpack.c.l.b16 %v1627_v18 }
 0x23e   : > { %v1498_v17 = vpop.f32.mrf.mxu2  ;;  %v1512_v46 = vpop.f32.mrf.mxu3 }
 0x23f   : > { %v1499_v47 = vadd.f32 %v1498_v17, %v968_v36  ;;  %v1524_v48 = vpop.f32.mrf.mxu0  ;;  %v1538_v51 = vpop.f32.mrf.mxu1  ;;  %v1652_v58 = vunpack.c.l.b16 %v1646_v52 }
 0x240   : > { %v1525_v62 = vadd.f32 %v1524_v48, %v969_v24 }
 0x241   : > { %v1513_v50 = vadd.f32 %v1512_v46, %v1499_v47 }
 0x242   : > { %v1539_v11 = vadd.f32 %v1538_v51, %v1525_v62 }
 0x243   : > { %v1630_v53 = vpack.c.bf16 %v1513_v50, %v1485_v49 }
 0x245   : > { %v1647_v54 = vrot.slane %v1630_v53, 4  ;;  %v1649_v63 = vunpack.c.l.b16 %v1630_v53 }
 0x246   : > { %v1552_v56 = vpop.f32.mrf.mxu2  ;;  %v1566_v57 = vpop.f32.mrf.mxu3 }
 0x247   : > { %v1653_v59 = vunpack.c.l.b16 %v1647_v54  ;;  %v1526_v60 = vpop.f32.mrf.mxu0  ;;  %v1553_v25 = vadd.f32 %v1552_v56, %v970_v55  ;;  %v1540_v0 = vpop.f32.mrf.mxu1  ;;  %v1650_v13 = vpack.c.b16 %v1649_v63, %v1648_v8 }
 0x248   : > { %v1527_v4 = vadd.f32 %v1526_v60, %v969_v24 }
 0x249   : > { %v1654_v61 = vpack.c.b16 %v1653_v59, %v1652_v58  ;;  %v1567_v3 = vadd.f32 %v1566_v57, %v1553_v25 }
 0x24a   : > { %v1541_v15 = vadd.f32 %v1540_v0, %v1527_v4 }
 0x24b   : > { %1663 = vmatpush.bf16.xpose.msrb.mxu0 %v1654_v61  ;;  %v1628_v34 = vpack.c.bf16 %v1567_v3, %v1539_v11 }
 0x24d   : > { %v1744_v23 = vunpack.c.l.b16 %v1628_v34  ;;  %v1637_v43 = vrot.slane %v1628_v34, 4 }
 0x24e   : > { %v1554_v9 = vpop.f32.mrf.mxu2  ;;  %v1568_v10 = vpop.f32.mrf.mxu3 }
 0x24f   : > { %v1555_v12 = vadd.f32 %v1554_v9, %v970_v55 }
 0x250   : > { %v1580_v19 = vpop.f32.mrf.mxu0  ;;  %v1594_v28 = vpop.f32.mrf.mxu1 }
 0x251   : > { %v1569_v16 = vadd.f32 %v1568_v10, %v1555_v12  ;;  %v1581_v27 = vadd.f32 %v1580_v19, %v971_v20 }
 0x252   : > { %1664 = vmatmul.bf16.vlgmr.msrb.gmra.mxu0 %v1650_v13 }
 0x253   : > { %v1631_v21 = vpack.c.bf16 %v1569_v16, %v1541_v15  ;;  %v1595_v33 = vadd.f32 %v1594_v28, %v1581_v27 }
 0x255   : > { %v1745_v26 = vunpack.c.l.b16 %v1631_v21  ;;  %v1639_v18 = vrot.slane %v1631_v21, 4 }
 0x257   : > { %v1608_v29 = vpop.f32.mrf.mxu2  ;;  %v1622_v30 = vpop.f32.mrf.mxu3  ;;  %v1746_v31 = vpack.c.b16 %v1745_v26, %v1744_v23 }
 0x258   : > { %v1609_v32 = vadd.f32 %v1608_v29, %v972_v22  ;;  %v1582_v37 = vpop.f32.mrf.mxu0  ;;  %v1596_v42 = vpop.f32.mrf.mxu1 }
 0x259   : > { %1758 = vmatpush.bf16.msrb.mxu2 %v1746_v31  ;;  %v1583_v39 = vadd.f32 %v1582_v37, %v971_v20 }
 0x25a   : > { %v1623_v36 = vadd.f32 %v1622_v30, %v1609_v32 }
 0x25b   : > { %v1597_v44 = vadd.f32 %v1596_v42, %v1583_v39 }
 0x25c   : > { %v1629_v38 = vpack.c.bf16 %v1623_v36, %v1595_v33 }
 0x25e   : > { %v1638_v7 = vrot.slane %v1629_v38, 4 }
 0x25f   : > { %v1610_v40 = vpop.f32.mrf.mxu2  ;;  %v1624_v35 = vpop.f32.mrf.mxu3 }
 0x260   : > { %v1611_v41 = vadd.f32 %v1610_v40, %v972_v22  ;;  %v1642_v17 = vsel %vm1641_vm11, %v1637_v43, %v1638_v7  ;;  %v1770_v49 = vunpack.c.l.b16 %v1638_v7 }
 0x261   : > { %v1670_v48 = vrot.slane %v1642_v17, 4  ;;  %v1672_v58 = vunpack.c.l.b16 %v1642_v17  ;;  %v6315_v17 = vld [vmem:[#allocation10 + $0x74] sm:$0xf0] }
 0x262   : > { %v1625_v45 = vadd.f32 %v1624_v35, %v1611_v41 }
 0x263   : > { %v1676_v54 = vunpack.c.l.b16 %v1670_v48  ;;  %v5093_v48 = vld [vmem:[#allocation10 + $0x60] sm:$0xf] }
 0x264   : > { %v1632_v46 = vpack.c.bf16 %v1625_v45, %v1597_v44  ;;  %v5101_v45 = vld [vmem:[#allocation10 + $0x70] sm:$0xf] }
 0x266   : > { %v1640_v47 = vrot.slane %v1632_v46, 4  ;;  %v6314_v46 = vld [vmem:[#allocation10 + $0x74] sm:$0xf] }
 0x268   : > { %v1643_v50 = vsel %vm1641_vm11, %v1639_v18, %v1640_v47  ;;  %v1771_v51 = vunpack.c.l.b16 %v1640_v47  ;;  %v5102_v18 = vor.u32 %v6315_v17, %v5101_v45  ;;  %v5103_v47 = vld [vmem:[#allocation10 + $0x78] sm:$0xf0]  ;;  %v5149_v17 = vld [vmem:[#allocation10 + $0xd0] sm:$0xf] }
 0x269   : > { %v1671_v52 = vrot.slane %v1643_v50, 4  ;;  %v1673_v57 = vunpack.c.l.b16 %v1643_v50  ;;  %v5106_v50 = vor.u32 %v6314_v46, %v5103_v47  ;;  %v6327_v46 = vld [vmem:[#allocation10 + $0xd4] sm:$0xf0]  ;;  %v5151_v47 = vld [vmem:[#allocation10 + $0xd8] sm:$0xf0] }
 0x26a   : > { %v1772_v53 = vpack.c.b16 %v1771_v51, %v1770_v49  ;;  %v6313_v49 = vld [vmem:[#allocation10 + $0x64] sm:$0xf0]  ;;  %v6312_v51 = vld [vmem:[#allocation10 + $0x64] sm:$0xf]  ;;  %1980 = vmatpush.bf16.msra.mxu0 %v5102_v18  ;;  %v6326_v18 = vld [vmem:[#allocation10 + $0xd4] sm:$0xf] }
 0x26b   : > { %v1677_v55 = vunpack.c.l.b16 %v1671_v52  ;;  %v1674_v59 = vpack.c.b16 %v1673_v57, %v1672_v58  ;;  %v5095_v52 = vld [vmem:[#allocation10 + $0x68] sm:$0xf0]  ;;  %2008 = vmatpush.bf16.msra.mxu2 %v5106_v50  ;;  %v6310_v57 = vld [vmem:[#allocation10 + $0x54] sm:$0xf]  ;;  %v5087_v58 = vld [vmem:[#allocation10 + $0x58] sm:$0xf0] }
 0x26c   : > { %1784 = vmatpush.bf16.msrb.mxu3 %v1772_v53  ;;  %v5094_v53 = vor.u32 %v6313_v49, %v5093_v48  ;;  %v5150_v48 = vor.u32 %v6327_v46, %v5149_v17  ;;  %v5154_v49 = vor.u32 %v6326_v18, %v5151_v47  ;;  %v5141_v50 = vld [vmem:[#allocation10 + $0xc0] sm:$0xf] }
 0x26d   : > { %v1678_v56 = vpack.c.b16 %v1677_v55, %v1676_v54  ;;  %v5098_v54 = vor.u32 %v6312_v51, %v5095_v52  ;;  %v5085_v55 = vld [vmem:[#allocation10 + $0x50] sm:$0xf]  ;;  %v6325_v51 = vld [vmem:[#allocation10 + $0xc4] sm:$0xf0]  ;;  %v6324_v52 = vld [vmem:[#allocation10 + $0xc4] sm:$0xf] }
 0x26e   : > { %1981 = vmatpush.bf16.msra.mxu0 %v5094_v53  ;;  %v5143_v53 = vld [vmem:[#allocation10 + $0xc8] sm:$0xf0]  ;;  %v963_v47 = vld [vmem:[#allocation11] sm:$0x3] }
 0x26f   : > { %1687 = vmatpush.bf16.xpose.msrb.mxu1 %v1678_v56  ;;  %v6311_v56 = vld [vmem:[#allocation10 + $0x54] sm:$0xf0]  ;;  %2009 = vmatpush.bf16.msra.mxu2 %v5098_v54 }
 0x276   : > { %1688 = vmatmul.bf16.vlgmr.msrb.gmra.mxu1 %v1674_v59  ;;  %v5086_v59 = vor.u32 %v6311_v56, %v5085_v55  ;;  %v5142_v55 = vor.u32 %v6325_v51, %v5141_v50  ;;  %v5146_v56 = vor.u32 %v6324_v52, %v5143_v53  ;;  %v1817_v52 = vperm.slane %v963_v47, 1 }
 0x278   : > { %1982 = vmatpush.bf16.msra.mxu0 %v5086_v59  ;;  %v5133_v59 = vld [vmem:[#allocation10 + $0xb0] sm:$0xf] }
 0x2cf   : > { %v1665_v24 = vpop.f32.mrf.mxu0 }
 0x2d0   : > { %v1694_v60 = vmul.f32 0.088388346, %v1665_v24  ;;  %v5090_v24 = vor.u32 %v6310_v57, %v5087_v58 }
 0x2d2   : > { %v1699_v25 = vsel %vm1698_vm12, %v1694_v60, -inf  ;;  %2010 = vmatpush.bf16.msra.mxu2 %v5090_v24  ;;  %v6323_v24 = vld [vmem:[#allocation10 + $0xb4] sm:$0xf0] }
 0x2d3   : > { %1700 = vmax.xlane.f32.xlu2 %v1699_v25  ;;  %v6309_v25 = vld [vmem:[#allocation10 + $0x44] sm:$0xf0] }
 0x2d7   : > { %v1667_v61 = vpop.f32.mrf.mxu0 }
 0x2d8   : > { %v1695_v62 = vmul.f32 0.088388346, %v1667_v61  ;;  %v6308_v61 = vld [vmem:[#allocation10 + $0x44] sm:$0xf] }
 0x2da   : > { %v1702_v63 = vsel %vm1698_vm12, %v1695_v62, -inf }
 0x2db   : > { %1703 = vmax.xlane.f32.xlu2 %v1702_v63 }
 0x2f3   : > { %v1689_v0 = vpop.f32.mrf.mxu1 }
 0x2f4   : > { %v1696_v3 = vmul.f32 0.088388346, %v1689_v0 }
 0x2f6   : > { %v1705_v4 = vsel %vm1698_vm12, %v1696_v3, -inf }
 0x2f7   : > { %1706 = vmax.xlane.f32.xlu0 %v1705_v4  ;;  %v6307_v4 = vld [vmem:[#allocation10 + $0x34] sm:$0xf0] }
 0x2fb   : > { %v1691_v8 = vpop.f32.mrf.mxu1 }
 0x2fc   : > { %v1697_v9 = vmul.f32 0.088388346, %v1691_v8  ;;  %v6306_v8 = vld [vmem:[#allocation10 + $0x34] sm:$0xf] }
 0x2fe   : > { %v1708_v10 = vsel %vm1698_vm12, %v1697_v9, -inf }
 0x2ff   : > { %1709 = vmax.xlane.f32.xlu1 %v1708_v10  ;;  %v5071_v10 = vld [vmem:[#allocation10 + $0x38] sm:$0xf0] }
 0x346   : > { %v1701_v11 = vpop.xlane.xlu2 %1700 }
 0x347   : > { %v1711_v12 = vsub.f32 %v1694_v60, %v1701_v11  ;;  %v5077_v60 = vld [vmem:[#allocation10 + $0x40] sm:$0xf]  ;;  %v5074_v11 = vor.u32 %v6306_v8, %v5071_v10  ;;  %v6320_v8 = vld [vmem:[#allocation10 + $0xa4] sm:$0xf] }
 0x348   : > { %v5078_v63 = vor.u32 %v6309_v25, %v5077_v60  ;;  %v6322_v60 = vld [vmem:[#allocation10 + $0xb4] sm:$0xf] }
 0x349   : > { %v1715_v13 = vmul.f32 1.442695, %v1711_v12  ;;  %v6304_v12 = vld [vmem:[#allocation10 + $0x24] sm:$0xf] }
 0x34a   : > { %1983 = vmatpush.bf16.msra.mxu0 %v5078_v63 }
 0x34b   : > { %6760 = vpow2.f32 %v1715_v13  ;;  %v5063_v13 = vld [vmem:[#allocation10 + $0x28] sm:$0xf0] }
 0x34e   : > { %v1704_v34 = vpop.xlane.xlu2 %1703 }
 0x34f   : > { %v1712_v15 = vsub.f32 %v1695_v62, %v1704_v34  ;;  %v5079_v62 = vld [vmem:[#allocation10 + $0x48] sm:$0xf0]  ;;  %v5061_v34 = vld [vmem:[#allocation10 + $0x20] sm:$0xf] }
 0x350   : > { %v5082_v0 = vor.u32 %v6308_v61, %v5079_v62  ;;  %v5134_v61 = vor.u32 %v6323_v24, %v5133_v59  ;;  %v5135_v62 = vld [vmem:[#allocation10 + $0xb8] sm:$0xf0] }
 0x351   : > { %v6761_v16 = vpop.eup %6760  ;;  %v1717_v19 = vmul.f32 1.442695, %v1712_v15  ;;  %v5066_v15 = vor.u32 %v6304_v12, %v5063_v13  ;;  %v5127_v12 = vld [vmem:[#allocation10 + $0xa8] sm:$0xf0] }
 0x352   : > { %v1723_v20 = vsel %vm1698_vm12, %v6761_v16, 0.0  ;;  %v1735_v21 = vpack.c.bf16 %v6761_v16, %v6761_v16  ;;  %2011 = vmatpush.bf16.msra.mxu2 %v5082_v0  ;;  %v6305_v16 = vld [vmem:[#allocation10 + $0x24] sm:$0xf0]  ;;  %v5138_v0 = vor.u32 %v6322_v60, %v5135_v62 }
 0x353   : > { %6762 = vpow2.f32 %v1717_v19  ;;  %1724 = vadd.xlane.f32.xlu2 %v1723_v20  ;;  %v5062_v19 = vor.u32 %v6305_v16, %v5061_v34  ;;  %v5053_v20 = vld [vmem:[#allocation10 + $0x10] sm:$0xf] }
 0x354   : > { %v1741_v27 = vunpack.c.l.b16 %v1735_v21  ;;  %v6303_v21 = vld [vmem:[#allocation10 + $0x14] sm:$0xf0] }
 0x356   : > { %2012 = vmatpush.bf16.msra.mxu2 %v5074_v11 }
 0x359   : > { %v6763_v22 = vpop.eup %6762 }
 0x35a   : > { %v1736_v23 = vpack.c.bf16 %v6763_v22, %v6763_v22  ;;  %v1726_v26 = vsel %vm1698_vm12, %v6763_v22, 0.0  ;;  %2013 = vmatpush.bf16.msra.mxu2 %v5066_v15  ;;  %v6302_v22 = vld [vmem:[#allocation10 + $0x14] sm:$0xf]  ;;  %v5130_v15 = vor.u32 %v6320_v8, %v5127_v12 }
 0x35b   : > { %1727 = vadd.xlane.f32.xlu0 %v1726_v26  ;;  %v5055_v26 = vld [vmem:[#allocation10 + $0x18] sm:$0xf0] }
 0x35c   : > { %v1742_v28 = vunpack.c.l.b16 %v1736_v23  ;;  %v5054_v23 = vor.u32 %v6303_v21, %v5053_v20  ;;  %v6319_v20 = vld [vmem:[#allocation10 + $0x94] sm:$0xf0]  ;;  %v6318_v21 = vld [vmem:[#allocation10 + $0x94] sm:$0xf] }
 0x35e   : > { %v1743_v29 = vpack.c.b16 %v1742_v28, %v1741_v27  ;;  %v5058_v27 = vor.u32 %v6302_v22, %v5055_v26  ;;  %v5045_v28 = vld [vmem:[#allocation10] sm:$0xf] }
 0x360   : > { %5041 = vmatmul.msk.bf16.vlgmr.msrb.gmra.mxu2 %vm1698_vm12, %v1743_v29  ;;  %v6301_v29 = vld [vmem:[#allocation10 + $0x4] sm:$0xf0] }
 0x361   : > { %2014 = vmatpush.bf16.msra.mxu2 %v5058_v27 }
 0x36a   : > { %v1707_v30 = vpop.xlane.xlu0 %1706 }
 0x36b   : > { %v1713_v31 = vsub.f32 %v1696_v3, %v1707_v30  ;;  %v5069_v3 = vld [vmem:[#allocation10 + $0x30] sm:$0xf]  ;;  %v6300_v30 = vld [vmem:[#allocation10 + $0x4] sm:$0xf] }
 0x36d   : > { %v1719_v32 = vmul.f32 1.442695, %v1713_v31  ;;  %v5046_v31 = vor.u32 %v6301_v29, %v5045_v28 }
 0x36f   : > { %6764 = vpow2.f32 %v1719_v32  ;;  %v5047_v32 = vld [vmem:[#allocation10 + $0x8] sm:$0xf0] }
 0x372   : > { %v1710_v33 = vpop.xlane.xlu1 %1709 }
 0x373   : > { %v1714_v36 = vsub.f32 %v1697_v9, %v1710_v33  ;;  %v5070_v9 = vor.u32 %v6307_v4, %v5069_v3  ;;  %v5050_v33 = vor.u32 %v6300_v30, %v5047_v32  ;;  %v5125_v3 = vld [vmem:[#allocation10 + $0xa0] sm:$0xf]  ;;  %v6321_v4 = vld [vmem:[#allocation10 + $0xa4] sm:$0xf0]  ;;  %v6316_v32 = vld [vmem:[#allocation10 + $0x84] sm:$0xf] }
 0x374   : > { %v5126_v11 = vor.u32 %v6321_v4, %v5125_v3  ;;  %v5109_v30 = vld [vmem:[#allocation10 + $0x80] sm:$0xf] }
 0x375   : > { %v6765_v37 = vpop.eup %6764  ;;  %v1721_v38 = vmul.f32 1.442695, %v1714_v36  ;;  %1984 = vmatpush.bf16.msra.mxu0 %v5070_v9  ;;  %2015 = vmatpush.bf16.msra.mxu2 %v5050_v33  ;;  %v5165_v36 = vld [vmem:[#allocation10 + $0xf0] sm:$0xf] }
 0x376   : > { %v1729_v39 = vsel %vm1698_vm12, %v6765_v37, 0.0  ;;  %v1737_v40 = vpack.c.bf16 %v6765_v37, %v6765_v37  ;;  %v6331_v37 = vld [vmem:[#allocation10 + $0xf4] sm:$0xf0] }
 0x377   : > { %6766 = vpow2.f32 %v1721_v38  ;;  %1730 = vadd.xlane.f32.xlu1 %v1729_v39  ;;  %v6330_v38 = vld [vmem:[#allocation10 + $0xf4] sm:$0xf]  ;;  %v5166_v39 = vor.u32 %v6331_v37, %v5165_v36  ;;  %v5111_v36 = vld [vmem:[#allocation10 + $0x88] sm:$0xf0] }
 0x378   : > { %v1767_v35 = vunpack.c.l.b16 %v1737_v40  ;;  %v5167_v40 = vld [vmem:[#allocation10 + $0xf8] sm:$0xf0]  ;;  %v5114_v37 = vor.u32 %v6316_v32, %v5111_v36  ;;  %v6362_v36 = vld [vmem:[#allocation13 + $0xf4] sm:$0xf] }
 0x379   : > { %1985 = vmatpush.bf16.msra.mxu0 %v5062_v19  ;;  %1994 = vmatpush.bf16.msra.mxu1 %v5166_v39  ;;  %v5117_v19 = vld [vmem:[#allocation10 + $0x90] sm:$0xf] }
 0x37a   : > { %v5118_v22 = vor.u32 %v6319_v20, %v5117_v19 }
 0x37d   : > { %v6767_v7 = vpop.eup %6766  ;;  %1986 = vmatpush.bf16.msra.mxu0 %v5054_v23  ;;  %v5119_v23 = vld [vmem:[#allocation10 + $0x98] sm:$0xf0] }
 0x37e   : > { %v1738_v41 = vpack.c.bf16 %v6767_v7, %v6767_v7  ;;  %v1732_v42 = vsel %vm1698_vm12, %v6767_v7, 0.0  ;;  %v5157_v7 = vld [vmem:[#allocation10 + $0xe0] sm:$0xf]  ;;  %v5122_v28 = vor.u32 %v6318_v21, %v5119_v23  ;;  %v5229_v23 = vld [vmem:[#allocation13 + $0x70] sm:$0xf] }
 0x37f   : > { %1733 = vadd.xlane.f32.xlu2 %v1732_v42  ;;  %v5170_v42 = vor.u32 %v6330_v38, %v5167_v40 }
 0x380   : > { %v1768_v43 = vunpack.c.l.b16 %v1738_v41  ;;  %v6329_v41 = vld [vmem:[#allocation10 + $0xe4] sm:$0xf0] }
 0x381   : > { %1987 = vmatpush.bf16.msra.mxu0 %v5046_v31  ;;  %2022 = vmatpush.bf16.msra.mxu3 %v5170_v42  ;;  %v6317_v31 = vld [vmem:[#allocation10 + $0x84] sm:$0xf0] }
 0x382   : > { %v1769_v44 = vpack.c.b16 %v1768_v43, %v1767_v35  ;;  %v6328_v35 = vld [vmem:[#allocation10 + $0xe4] sm:$0xf]  ;;  %v5159_v43 = vld [vmem:[#allocation10 + $0xe8] sm:$0xf0]  ;;  %v5110_v33 = vor.u32 %v6317_v31, %v5109_v30  ;;  %v6346_v30 = vld [vmem:[#allocation13 + $0x74] sm:$0xf] }
 0x383   : > { %v5162_v45 = vor.u32 %v6328_v35, %v5159_v43  ;;  %v5231_v31 = vld [vmem:[#allocation13 + $0x78] sm:$0xf0] }
 0x384   : > { %5042 = vmatmul.msk.bf16.vlgmr.msrb.gmra.mxu3 %vm1698_vm12, %v1769_v44  ;;  %v5158_v44 = vor.u32 %v6329_v41, %v5157_v7 }
 0x385   : > { %2023 = vmatpush.bf16.msra.mxu3 %v5162_v45 }
 0x386   : > { %1995 = vmatpush.bf16.msra.mxu1 %v5158_v44 }
 0x389   : > { %2024 = vmatpush.bf16.msra.mxu3 %v5154_v49  ;;  %v1816_v49 = vperm.slane %v963_v47, 0  ;;  %v5213_v47 = vld [vmem:[#allocation13 + $0x50] sm:$0xf] }
 0x38a   : > { %1996 = vmatpush.bf16.msra.mxu1 %v5150_v48 }
 0x38d   : > { %2025 = vmatpush.bf16.msra.mxu3 %v5146_v56 }
 0x38e   : > { %1997 = vmatpush.bf16.msra.mxu1 %v5142_v55 }
 0x391   : > { %2026 = vmatpush.bf16.msra.mxu3 %v5138_v0 }
 0x392   : > { %1998 = vmatpush.bf16.msra.mxu1 %v5134_v61 }
 0x395   : > { %2027 = vmatpush.bf16.msra.mxu3 %v5130_v15 }
 0x396   : > { %1999 = vmatpush.bf16.msra.mxu1 %v5126_v11 }
 0x399   : > { %2028 = vmatpush.bf16.msra.mxu3 %v5122_v28 }
 0x39a   : > { %2000 = vmatpush.bf16.msra.mxu1 %v5118_v22 }
 0x39d   : > { %2029 = vmatpush.bf16.msra.mxu3 %v5114_v37  ;;  %v5295_v37 = vld [vmem:[#allocation13 + $0xf8] sm:$0xf0] }
 0x39e   : > { %2001 = vmatpush.bf16.msra.mxu1 %v5110_v33  ;;  %v5234_v33 = vor.u32 %v6346_v30, %v5231_v31  ;;  %v5189_v30 = vld [vmem:[#allocation13 + $0x20] sm:$0xf]  ;;  %v6337_v31 = vld [vmem:[#allocation13 + $0x24] sm:$0xf0] }
 0x3a0   : > { %2444 = vmatpush.bf16.msrb.mxu2 %v5234_v33  ;;  %v5190_v33 = vor.u32 %v6337_v31, %v5189_v30 }
 0x3c6   : > { %v1725_v54 = vpop.xlane.xlu2 %1724 }
 0x3c7   : > { %6768 = vrcp.f32 %v1725_v54 }
 0x3cd   : > { %v6769_v25 = vpop.eup %6768 }
 0x3ce   : > { %v1728_v57 = vpop.xlane.xlu0 %1727 }
 0x3cf   : > { %6770 = vrcp.f32 %v1728_v57 }
 0x3d5   : > { %v6771_v9 = vpop.eup %6770 }
 0x3e3   : > { %v1760_v58 = vpop.f32.mrf.mxu2 }
 0x3e4   : > { %v1795_v63 = vmul.f32 %v6769_v25, %v1760_v58 }
 0x3e6   : > { %v1799_v13 = vpack.c.bf16 %v1795_v63, %v1795_v63 }
 0x3e8   : > { %v1805_v26 = vunpack.c.l.b16 %v1799_v13 }
 0x3ea   : > { %v1731_v38 = vpop.xlane.xlu1 %1730 }
 0x3eb   : > { %v1762_v10 = vpop.f32.mrf.mxu2  ;;  %6772 = vrcp.f32 %v1731_v38  ;;  %v5298_v38 = vor.u32 %v6362_v36, %v5295_v37  ;;  %v6353_v36 = vld [vmem:[#allocation13 + $0xa4] sm:$0xf0]  ;;  %v6336_v37 = vld [vmem:[#allocation13 + $0x24] sm:$0xf] }
 0x3ec   : > { %v1796_v34 = vmul.f32 %v6771_v9, %v1762_v10 }
 0x3ed   : > { %2458 = vmatpush.bf16.msrb.mxu3 %v5298_v38  ;;  %v5191_v38 = vld [vmem:[#allocation13 + $0x28] sm:$0xf0] }
 0x3ee   : > { %v1800_v16 = vpack.c.bf16 %v1796_v34, %v1796_v34 }
 0x3f0   : > { %v1806_v27 = vunpack.c.l.b16 %v1800_v16 }
 0x3f1   : > { %v6773_v7 = vpop.eup %6772 }
 0x3f2   : > { %v1807_v29 = vpack.c.b16 %v1806_v27, %v1805_v26  ;;  %v1734_v39 = vpop.xlane.xlu2 %1733  ;;  %v6347_v26 = vld [vmem:[#allocation13 + $0x74] sm:$0xf0]  ;;  %v5293_v27 = vld [vmem:[#allocation13 + $0xf0] sm:$0xf] }
 0x3f3   : > { %6774 = vrcp.f32 %v1734_v39  ;;  %v5230_v28 = vor.u32 %v6347_v26, %v5229_v23  ;;  %v5221_v39 = vld [vmem:[#allocation13 + $0x60] sm:$0xf] }
 0x3f4   : > { %1988 = vmatmul.bf16.vlgmr.msra.gmra.mxu0 %v1807_v29  ;;  %2016 = vmatmul.bf16.vlgmr.msra.gmra.mxu2 %v1807_v29  ;;  %v6363_v29 = vld [vmem:[#allocation13 + $0xf4] sm:$0xf0] }
 0x3f5   : > { %v5294_v32 = vor.u32 %v6363_v29, %v5293_v27  ;;  %2416 = vmatpush.bf16.msrb.mxu0 %v5230_v28  ;;  %v6354_v27 = vld [vmem:[#allocation13 + $0xb4] sm:$0xf]  ;;  %v5263_v28 = vld [vmem:[#allocation13 + $0xb8] sm:$0xf0] }
 0x3f6   : > { %v5266_v29 = vor.u32 %v6354_v27, %v5263_v28  ;;  %v5525_v27 = vld [vmem:[#allocation16 + $0x1c0] sm:$0xf]  ;;  %v6422_v28 = vld [vmem:[#allocation16 + $0x1cc] sm:$0xf0] }
 0x3f7   : > { %2430 = vmatpush.bf16.msrb.mxu1 %v5294_v32  ;;  %v5253_v32 = vld [vmem:[#allocation13 + $0xa0] sm:$0xf]  ;;  %v5526_v31 = vor.u32 %v6422_v28, %v5525_v27  ;;  %v6372_v28 = vld [vmem:[#allocation16 + $0x44] sm:$0xf] }
 0x3f9   : > { %v6775_v42 = vpop.eup %6774 }
 0x407   : > { %v1786_v40 = vpop.f32.mrf.mxu3 }
 0x408   : > { %v1797_v41 = vmul.f32 %v6773_v7, %v1786_v40  ;;  %v6345_v40 = vld [vmem:[#allocation13 + $0x64] sm:$0xf0]  ;;  %v5285_v7 = vld [vmem:[#allocation13 + $0xe0] sm:$0xf] }
 0x40a   : > { %v1801_v43 = vpack.c.bf16 %v1797_v41, %v1797_v41  ;;  %v5222_v41 = vor.u32 %v6345_v40, %v5221_v39  ;;  %v5254_v39 = vor.u32 %v6353_v36, %v5253_v32  ;;  %v5194_v40 = vor.u32 %v6336_v37, %v5191_v38  ;;  %v5399_v32 = vld [vmem:[#allocation16 + $0xd0] sm:$0xf0]  ;;  %v5381_v38 = vld [vmem:[#allocation16 + $0xa0] sm:$0xf] }
 0x40b   : > { %v5527_v37 = vld [vmem:[#allocation16 + $0x1d0] sm:$0xf0] }
 0x40c   : > { %v1811_v17 = vunpack.c.l.b16 %v1801_v43  ;;  %v5223_v43 = vld [vmem:[#allocation13 + $0x68] sm:$0xf0]  ;;  %2417 = vmatpush.bf16.msrb.mxu0 %v5222_v41 }
 0x40d   : > { %v5255_v41 = vld [vmem:[#allocation13 + $0xa8] sm:$0xf0] }
 0x40f   : > { %v1788_v35 = vpop.f32.mrf.mxu3 }
 0x410   : > { %v1798_v44 = vmul.f32 %v6775_v42, %v1788_v35  ;;  %v6361_v42 = vld [vmem:[#allocation13 + $0xe4] sm:$0xf0]  ;;  %v6344_v35 = vld [vmem:[#allocation13 + $0x64] sm:$0xf] }
 0x412   : > { %v1802_v45 = vpack.c.bf16 %v1798_v44, %v1798_v44  ;;  %v5286_v44 = vor.u32 %v6361_v42, %v5285_v7  ;;  %v6352_v7 = vld [vmem:[#allocation13 + $0xa4] sm:$0xf] }
 0x413   : > { %v5258_v42 = vor.u32 %v6352_v7, %v5255_v41  ;;  %v5509_v7 = vld [vmem:[#allocation16 + $0x1a0] sm:$0xf]  ;;  %v6418_v41 = vld [vmem:[#allocation16 + $0x1ac] sm:$0xf0] }
 0x414   : > { %v1812_v46 = vunpack.c.l.b16 %v1802_v45  ;;  %v5226_v45 = vor.u32 %v6344_v35, %v5223_v43  ;;  %2431 = vmatpush.bf16.msrb.mxu1 %v5286_v44  ;;  %v5181_v35 = vld [vmem:[#allocation13 + $0x10] sm:$0xf]  ;;  %v6335_v43 = vld [vmem:[#allocation13 + $0x14] sm:$0xf0] }
 0x415   : > { %v5245_v44 = vld [vmem:[#allocation13 + $0x90] sm:$0xf] }
 0x416   : > { %v1813_v18 = vpack.c.b16 %v1812_v46, %v1811_v17  ;;  %v6360_v17 = vld [vmem:[#allocation13 + $0xe4] sm:$0xf]  ;;  %v5287_v46 = vld [vmem:[#allocation13 + $0xe8] sm:$0xf0]  ;;  %2445 = vmatpush.bf16.msrb.mxu2 %v5226_v45  ;;  %v5182_v45 = vor.u32 %v6335_v43, %v5181_v35  ;;  %v5510_v43 = vor.u32 %v6418_v41, %v5509_v7 }
 0x417   : > { %v5445_v41 = vld [vmem:[#allocation16 + $0x120] sm:$0xf] }
 0x418   : > { %2002 = vmatmul.bf16.vlgmr.msra.gmra.mxu1 %v1813_v18  ;;  %2030 = vmatmul.bf16.vlgmr.msra.gmra.mxu3 %v1813_v18  ;;  %v5290_v18 = vor.u32 %v6360_v17, %v5287_v46  ;;  %v6351_v17 = vld [vmem:[#allocation13 + $0x94] sm:$0xf0]  ;;  %v6334_v46 = vld [vmem:[#allocation13 + $0x14] sm:$0xf] }
 0x41a   : > { %2459 = vmatpush.bf16.msrb.mxu3 %v5290_v18  ;;  %v5183_v18 = vld [vmem:[#allocation13 + $0x18] sm:$0xf0] }
 0x471   : > { %v1989_v48 = vpop.f32.mrf.mxu0 }
 0x472   : > { %v1990_v53 = vadd.f32 %v1989_v48, %v1816_v49  ;;  %v6343_v48 = vld [vmem:[#allocation13 + $0x54] sm:$0xf0] }
 0x477   : > { %v2017_v50 = vpop.f32.mrf.mxu2 }
 0x478   : > { %v2018_v54 = vadd.f32 %v2017_v50, %v1817_v52  ;;  %v5214_v50 = vor.u32 %v6343_v48, %v5213_v47  ;;  %v5246_v47 = vor.u32 %v6351_v17, %v5245_v44  ;;  %v5186_v48 = vor.u32 %v6334_v46, %v5183_v18  ;;  %v5383_v44 = vld [vmem:[#allocation16 + $0xb0] sm:$0xf0]  ;;  %v5365_v18 = vld [vmem:[#allocation16 + $0x80] sm:$0xf] }
 0x479   : > { %v1991_v58 = vpop.f32.mrf.mxu0  ;;  %v5511_v17 = vld [vmem:[#allocation16 + $0x1b0] sm:$0xf0] }
 0x47a   : > { %v1992_v61 = vadd.f32 %v1991_v58, %v1816_v49  ;;  %v5277_v49 = vld [vmem:[#allocation13 + $0xd0] sm:$0xf]  ;;  %2418 = vmatpush.bf16.msrb.mxu0 %v5214_v50  ;;  %v5247_v50 = vld [vmem:[#allocation13 + $0x98] sm:$0xf0] }
 0x47f   : > { %v2019_v60 = vpop.f32.mrf.mxu2 }
 0x480   : > { %v2020_v63 = vadd.f32 %v2019_v60, %v1817_v52  ;;  %v6342_v52 = vld [vmem:[#allocation13 + $0x54] sm:$0xf]  ;;  %v5205_v60 = vld [vmem:[#allocation13 + $0x40] sm:$0xf] }
 0x495   : > { %v2003_v51 = vpop.f32.mrf.mxu1 }
 0x496   : > { %v2004_v55 = vadd.f32 %v2003_v51, %v1990_v53  ;;  %v6359_v51 = vld [vmem:[#allocation13 + $0xd4] sm:$0xf0]  ;;  %v5215_v53 = vld [vmem:[#allocation13 + $0x58] sm:$0xf0] }
 0x498   : > { %v7690_v59 = vadd.f32 %v2004_v55, %v7595_v1  ;;  %v5218_v55 = vor.u32 %v6342_v52, %v5215_v53  ;;  %v5173_v52 = vld [vmem:[#allocation13] sm:$0xf]  ;;  %v6333_v53 = vld [vmem:[#allocation13 + $0x4] sm:$0xf0] }
 0x49a   : > { %2446 = vmatpush.bf16.msrb.mxu2 %v5218_v55  ;;  %v5174_v55 = vor.u32 %v6333_v53, %v5173_v52  ;;  %v5367_v52 = vld [vmem:[#allocation16 + $0x90] sm:$0xf0]  ;;  %v6412_v53 = vld [vmem:[#allocation16 + $0x184] sm:$0xf] }
 0x49b   : > { %v2031_v56 = vpop.f32.mrf.mxu3 }
 0x49c   : > { %v2032_v57 = vadd.f32 %v2031_v56, %v2018_v54  ;;  %v5278_v54 = vor.u32 %v6359_v51, %v5277_v49  ;;  %v6358_v56 = vld [vmem:[#allocation13 + $0xd4] sm:$0xf] }
 0x49d   : > { %v2005_v25 = vpop.f32.mrf.mxu1  ;;  %v6350_v49 = vld [vmem:[#allocation13 + $0x94] sm:$0xf] }
 0x49e   : > { %v7693_v24 = vadd.f32 %v2032_v57, %v7597_v2  ;;  %v2006_v0 = vadd.f32 %v2005_v25, %v1992_v61  ;;  %v5279_v57 = vld [vmem:[#allocation13 + $0xd8] sm:$0xf0]  ;;  %2432 = vmatpush.bf16.msrb.mxu1 %v5278_v54  ;;  %v6341_v25 = vld [vmem:[#allocation13 + $0x44] sm:$0xf0]  ;;  %v5269_v61 = vld [vmem:[#allocation13 + $0xc0] sm:$0xf]  ;;  %v5250_v51 = vor.u32 %v6350_v49, %v5247_v50 }
 0x49f   : > { %v5282_v58 = vor.u32 %v6358_v56, %v5279_v57  ;;  %v5237_v54 = vld [vmem:[#allocation13 + $0x80] sm:$0xf]  ;;  %v6349_v56 = vld [vmem:[#allocation13 + $0x84] sm:$0xf0]  ;;  %v6332_v57 = vld [vmem:[#allocation13 + $0x4] sm:$0xf] }
 0x4a0   : > { %v2040_v62 = vadd.f32 %v7693_v24, %v7690_v59  ;;  %v7698_v8 = vadd.f32 %v2006_v0, %v7601_v5  ;;  %v6340_v0 = vld [vmem:[#allocation13 + $0x44] sm:$0xf]  ;;  %v6414_v50 = vld [vmem:[#allocation16 + $0x18c] sm:$0xf0] }
 0x4a1   : > { %2460 = vmatpush.bf16.msrb.mxu3 %v5282_v58  ;;  %v5175_v58 = vld [vmem:[#allocation13 + $0x8] sm:$0xf0] }
 0x4a2   : > { %2041 = vadd.xlane.f32.xlu0 %v2040_v62  ;;  %v5206_v62 = vor.u32 %v6341_v25, %v5205_v60  ;;  %v5238_v60 = vor.u32 %v6349_v56, %v5237_v54  ;;  %v5178_v25 = vor.u32 %v6332_v57, %v5175_v58  ;;  %v5495_v54 = vld [vmem:[#allocation16 + $0x190] sm:$0xf0]  ;;  %v5349_v58 = vld [vmem:[#allocation16 + $0x60] sm:$0xf] }
 0x4a3   : > { %v2033_v3 = vpop.f32.mrf.mxu3 }
 0x4a4   : > { %v2034_v4 = vadd.f32 %v2033_v3, %v2020_v63  ;;  %v6357_v63 = vld [vmem:[#allocation13 + $0xc4] sm:$0xf0]  ;;  %v5207_v3 = vld [vmem:[#allocation13 + $0x48] sm:$0xf0]  ;;  %2419 = vmatpush.bf16.msrb.mxu0 %v5206_v62 }
 0x4a5   : > { %v5239_v62 = vld [vmem:[#allocation13 + $0x88] sm:$0xf0] }
 0x4a6   : > { %v7701_v1 = vadd.f32 %v2034_v4, %v7603_v6  ;;  %v5270_v4 = vor.u32 %v6357_v63, %v5269_v61  ;;  %v6348_v61 = vld [vmem:[#allocation13 + $0x84] sm:$0xf] }
 0x4a7   : > { %v5413_v63 = vld [vmem:[#allocation16 + $0xe0] sm:$0xf] }
 0x4a8   : > { %v2043_v2 = vadd.f32 %v7701_v1, %v7698_v8  ;;  %2433 = vmatpush.bf16.msrb.mxu1 %v5270_v4  ;;  %v5541_v4 = vld [vmem:[#allocation16 + $0x1e0] sm:$0xf] }
 0x4aa   : > { %2044 = vadd.xlane.f32.xlu1 %v2043_v2  ;;  %v5210_v2 = vor.u32 %v6340_v0, %v5207_v3  ;;  %v5242_v0 = vor.u32 %v6348_v61, %v5239_v62  ;;  %v6394_v3 = vld [vmem:[#allocation16 + $0xec] sm:$0xf0] }
 0x4ac   : > { %2447 = vmatpush.bf16.msrb.mxu2 %v5210_v2  ;;  %v6426_v2 = vld [vmem:[#allocation16 + $0x1ec] sm:$0xf0] }
 0x515   : > { %v2042_v9 = vpop.xlane.xlu0 %2041 }
 0x516   : > { %v2046_v10 = vmul.f32 %v2042_v9, %v7607_v14  ;;  %v6356_v9 = vld [vmem:[#allocation13 + $0xc4] sm:$0xf] }
 0x518   : > { %v7707_v11 = vsub.f32 %v7690_v59, %v2046_v10  ;;  %v7710_v12 = vsub.f32 %v7693_v24, %v2046_v10  ;;  %v5271_v10 = vld [vmem:[#allocation13 + $0xc8] sm:$0xf0] }
 0x51a   : > { %v2052_v5 = vmul.f32 %v7707_v11, %v7707_v11  ;;  %v2053_v6 = vmul.f32 %v7710_v12, %v7710_v12 }
 0x51c   : > { %v2056_v13 = vadd.f32 %v2053_v6, %v2052_v5  ;;  %v5274_v5 = vor.u32 %v6356_v9, %v5271_v10  ;;  %v5197_v6 = vld [vmem:[#allocation13 + $0x30] sm:$0xf]  ;;  %v5414_v9 = vor.u32 %v6394_v3, %v5413_v63  ;;  %v5542_v10 = vor.u32 %v6426_v2, %v5541_v4  ;;  %v5477_v63 = vld [vmem:[#allocation16 + $0x160] sm:$0xf]  ;;  %v6376_v2 = vld [vmem:[#allocation16 + $0x64] sm:$0xf] }
 0x51d   : > { %v2045_v34 = vpop.xlane.xlu1 %2044  ;;  %v5498_v4 = vor.u32 %v6412_v53, %v5495_v54 }
 0x51e   : > { %v2047_v15 = vmul.f32 %v2045_v34, %v7607_v14  ;;  %2057 = vadd.xlane.f32.xlu2 %v2056_v13  ;;  %v6339_v13 = vld [vmem:[#allocation13 + $0x34] sm:$0xf0]  ;;  %v5261_v34 = vld [vmem:[#allocation13 + $0xb0] sm:$0xf]  ;;  %2461 = vmatpush.bf16.msrb.mxu3 %v5274_v5  ;;  %v6392_v5 = vld [vmem:[#allocation16 + $0xe4] sm:$0xf] }
 0x520   : > { %v7718_v16 = vsub.f32 %v7698_v8, %v2047_v15  ;;  %v7721_v19 = vsub.f32 %v7701_v1, %v2047_v15  ;;  %v5198_v15 = vor.u32 %v6339_v13, %v5197_v6  ;;  %v5415_v6 = vld [vmem:[#allocation16 + $0xf0] sm:$0xf0]  ;;  %v6424_v13 = vld [vmem:[#allocation16 + $0x1e4] sm:$0xf] }
 0x522   : > { %v2054_v20 = vmul.f32 %v7718_v16, %v7718_v16  ;;  %v2055_v21 = vmul.f32 %v7721_v19, %v7721_v19  ;;  %2420 = vmatpush.bf16.msrb.mxu0 %v5198_v15  ;;  %2462 = vmatpush.bf16.msrb.mxu3 %v5266_v29  ;;  %v5543_v15 = vld [vmem:[#allocation16 + $0x1f0] sm:$0xf0]  ;;  %v6388_v29 = vld [vmem:[#allocation16 + $0xc4] sm:$0xf] }
 0x523   : > { %v5402_v36 = vor.u32 %v6388_v29, %v5399_v32  ;;  %v5335_v29 = vld [vmem:[#allocation16 + $0x50] sm:$0xf0] }
 0x524   : > { %v2059_v22 = vadd.f32 %v2055_v21, %v2054_v20  ;;  %v6355_v20 = vld [vmem:[#allocation13 + $0xb4] sm:$0xf0]  ;;  %v6338_v21 = vld [vmem:[#allocation13 + $0x34] sm:$0xf]  ;;  %v5338_v7 = vor.u32 %v6372_v28, %v5335_v29 }
 0x525   : > { %v5262_v23 = vor.u32 %v6355_v20, %v5261_v34  ;;  %v5418_v34 = vor.u32 %v6392_v5, %v5415_v6  ;;  %v5397_v20 = vld [vmem:[#allocation16 + $0xc0] sm:$0xf]  ;;  %v5479_v5 = vld [vmem:[#allocation16 + $0x170] sm:$0xf0] }
 0x526   : > { %2060 = vadd.xlane.f32.xlu0 %v2059_v22  ;;  %v5199_v22 = vld [vmem:[#allocation13 + $0x38] sm:$0xf0]  ;;  %2421 = vmatpush.bf16.msrb.mxu0 %v5190_v33  ;;  %v6420_v33 = vld [vmem:[#allocation16 + $0x1c4] sm:$0xf]  ;;  %v5463_v32 = vld [vmem:[#allocation16 + $0x150] sm:$0xf0] }
 0x527   : > { %v5202_v26 = vor.u32 %v6338_v21, %v5199_v22  ;;  %2434 = vmatpush.bf16.msrb.mxu1 %v5262_v23  ;;  %2463 = vmatpush.bf16.msrb.mxu3 %v5258_v42  ;;  %v6390_v21 = vld [vmem:[#allocation16 + $0xcc] sm:$0xf0]  ;;  %v5546_v23 = vor.u32 %v6424_v13, %v5543_v15  ;;  %v6384_v42 = vld [vmem:[#allocation16 + $0xa4] sm:$0xf]  ;;  %v5333_v15 = vld [vmem:[#allocation16 + $0x40] sm:$0xf] }
 0x528   : > { %v5386_v46 = vor.u32 %v6384_v42, %v5383_v44  ;;  %v6402_v42 = vld [vmem:[#allocation16 + $0x12c] sm:$0xf0] }
 0x529   : > { %2448 = vmatpush.bf16.msrb.mxu2 %v5202_v26  ;;  %v5398_v26 = vor.u32 %v6390_v21, %v5397_v20  ;;  %v6374_v21 = vld [vmem:[#allocation16 + $0x4c] sm:$0xf0] }
 0x52a   : > { %2422 = vmatpush.bf16.msrb.mxu0 %v5182_v45  ;;  %v6416_v45 = vld [vmem:[#allocation16 + $0x1a4] sm:$0xf] }
 0x52b   : > { %2435 = vmatpush.bf16.msrb.mxu1 %v5254_v39  ;;  %2464 = vmatpush.bf16.msrb.mxu3 %v5250_v51  ;;  %v6386_v39 = vld [vmem:[#allocation16 + $0xac] sm:$0xf0]  ;;  %v5514_v49 = vor.u32 %v6416_v45, %v5511_v17  ;;  %v6380_v51 = vld [vmem:[#allocation16 + $0x84] sm:$0xf]  ;;  %v5319_v17 = vld [vmem:[#allocation16 + $0x30] sm:$0xf0] }
 0x52c   : > { %v5382_v35 = vor.u32 %v6386_v39, %v5381_v38  ;;  %v5370_v62 = vor.u32 %v6380_v51, %v5367_v52  ;;  %v5317_v38 = vld [vmem:[#allocation16 + $0x20] sm:$0xf]  ;;  %v6370_v39 = vld [vmem:[#allocation16 + $0x2c] sm:$0xf0]  ;;  %v6368_v45 = vld [vmem:[#allocation16 + $0x24] sm:$0xf] }
 0x52d   : > { %2449 = vmatpush.bf16.msrb.mxu2 %v5194_v40  ;;  %v5530_v40 = vor.u32 %v6420_v33, %v5527_v37  ;;  %v5322_v51 = vor.u32 %v6368_v45, %v5319_v17  ;;  %v6427_v45 = vld [vmem:[#allocation16 + $0x1f4] sm:$0xf0]  ;;  %v6393_v17 = vld [vmem:[#allocation16 + $0xec] sm:$0xf] }
 0x52e   : > { %2423 = vmatpush.bf16.msrb.mxu0 %v5174_v55 }
 0x52f   : > { %2436 = vmatpush.bf16.msrb.mxu1 %v5246_v47  ;;  %2465 = vmatpush.bf16.msrb.mxu3 %v5242_v0  ;;  %v6382_v47 = vld [vmem:[#allocation16 + $0x8c] sm:$0xf0] }
 0x530   : > { %v5366_v56 = vor.u32 %v6382_v47, %v5365_v18  ;;  %v6410_v0 = vld [vmem:[#allocation16 + $0x16c] sm:$0xf0]  ;;  %v6400_v18 = vld [vmem:[#allocation16 + $0x124] sm:$0xf]  ;;  %v5447_v47 = vld [vmem:[#allocation16 + $0x130] sm:$0xf0] }
 0x531   : > { %2450 = vmatpush.bf16.msrb.mxu2 %v5186_v48  ;;  %v5493_v48 = vld [vmem:[#allocation16 + $0x180] sm:$0xf]  ;;  %v5450_v54 = vor.u32 %v6400_v18, %v5447_v47  ;;  %v6425_v18 = vld [vmem:[#allocation16 + $0x1ec] sm:$0xf] }
 0x532   : > { %2810 = vmatpush.bf16.msra.mxu0 %v5414_v9  ;;  %v5494_v57 = vor.u32 %v6414_v50, %v5493_v48  ;;  %v5351_v9 = vld [vmem:[#allocation16 + $0x70] sm:$0xf0]  ;;  %v5446_v50 = vor.u32 %v6402_v42, %v5445_v41  ;;  %v5421_v41 = vld [vmem:[#allocation16 + $0xe8] sm:$0xf] }
 0x533   : > { %2437 = vmatpush.bf16.msrb.mxu1 %v5238_v60  ;;  %2849 = vmatpush.bf16.msra.mxu3 %v5546_v23  ;;  %v6378_v60 = vld [vmem:[#allocation16 + $0x6c] sm:$0xf0]  ;;  %v5354_v20 = vor.u32 %v6376_v2, %v5351_v9  ;;  %v6364_v2 = vld [vmem:[#allocation16 + $0x4] sm:$0xf]  ;;  %v5303_v9 = vld [vmem:[#allocation16 + $0x10] sm:$0xf0] }
 0x534   : > { %v5350_v13 = vor.u32 %v6378_v60, %v5349_v58  ;;  %v6406_v23 = vld [vmem:[#allocation16 + $0x14c] sm:$0xf0] }
 0x535   : > { %2451 = vmatpush.bf16.msrb.mxu2 %v5178_v25 }
 0x536   : > { %2811 = vmatpush.bf16.msra.mxu0 %v5398_v26 }
 0x537   : > { %2823 = vmatpush.bf16.msra.mxu1 %v5542_v10  ;;  %2850 = vmatpush.bf16.msra.mxu3 %v5530_v40  ;;  %v6408_v10 = vld [vmem:[#allocation16 + $0x164] sm:$0xf] }
 0x538   : > { %v5482_v27 = vor.u32 %v6408_v10, %v5479_v5  ;;  %v5306_v5 = vor.u32 %v6364_v2, %v5303_v9 }
 0x539   : > { %2836 = vmatpush.bf16.msra.mxu2 %v5418_v34  ;;  %v5478_v34 = vor.u32 %v6410_v0, %v5477_v63  ;;  %v5429_v63 = vld [vmem:[#allocation16 + $0x100] sm:$0xf] }
 0x53a   : > { %2812 = vmatpush.bf16.msra.mxu0 %v5382_v35 }
 0x53b   : > { %2824 = vmatpush.bf16.msra.mxu1 %v5526_v31  ;;  %2851 = vmatpush.bf16.msra.mxu3 %v5514_v49  ;;  %v6404_v31 = vld [vmem:[#allocation16 + $0x144] sm:$0xf] }
 0x53c   : > { %v5466_v44 = vor.u32 %v6404_v31, %v5463_v32 }
 0x53d   : > { %2837 = vmatpush.bf16.msra.mxu2 %v5402_v36  ;;  %v5334_v36 = vor.u32 %v6374_v21, %v5333_v15 }
 0x53e   : > { %2813 = vmatpush.bf16.msra.mxu0 %v5366_v56 }
 0x53f   : > { %2825 = vmatpush.bf16.msra.mxu1 %v5510_v43  ;;  %2852 = vmatpush.bf16.msra.mxu3 %v5498_v4  ;;  %v6398_v4 = vld [vmem:[#allocation16 + $0x10c] sm:$0xf0] }
 0x540   : > { %v5430_v10 = vor.u32 %v6398_v4, %v5429_v63  ;;  %v6387_v4 = vld [vmem:[#allocation16 + $0xb4] sm:$0xf0] }
 0x541   : > { %2838 = vmatpush.bf16.msra.mxu2 %v5386_v46  ;;  %v5318_v46 = vor.u32 %v6370_v39, %v5317_v38 }
 0x542   : > { %2814 = vmatpush.bf16.msra.mxu0 %v5350_v13  ;;  %v5431_v13 = vld [vmem:[#allocation16 + $0x110] sm:$0xf0] }
 0x543   : > { %2826 = vmatpush.bf16.msra.mxu1 %v5494_v57  ;;  %2853 = vmatpush.bf16.msra.mxu3 %v5482_v27 }
 0x545   : > { %2839 = vmatpush.bf16.msra.mxu2 %v5370_v62  ;;  %v6366_v62 = vld [vmem:[#allocation16 + $0xc] sm:$0xf0] }
 0x546   : > { %2815 = vmatpush.bf16.msra.mxu0 %v5334_v36 }
 0x547   : > { %2827 = vmatpush.bf16.msra.mxu1 %v5478_v34  ;;  %2854 = vmatpush.bf16.msra.mxu3 %v5466_v44  ;;  %v5549_v44 = vld [vmem:[#allocation16 + $0x1e8] sm:$0xf] }
 0x549   : > { %2840 = vmatpush.bf16.msra.mxu2 %v5354_v20 }
 0x54a   : > { %2816 = vmatpush.bf16.msra.mxu0 %v5318_v46  ;;  %v5423_v46 = vld [vmem:[#allocation16 + $0xf8] sm:$0xf0] }
 0x54b   : > { %2855 = vmatpush.bf16.msra.mxu3 %v5450_v54  ;;  %v5405_v54 = vld [vmem:[#allocation16 + $0xc8] sm:$0xf] }
 0x54d   : > { %2841 = vmatpush.bf16.msra.mxu2 %v5338_v7 }
 0x551   : > { %2842 = vmatpush.bf16.msra.mxu2 %v5322_v51  ;;  %v5551_v51 = vld [vmem:[#allocation16 + $0x1f8] sm:$0xf0] }
 0x555   : > { %2843 = vmatpush.bf16.msra.mxu2 %v5306_v5  ;;  %v6385_v5 = vld [vmem:[#allocation16 + $0xac] sm:$0xf] }
 0x591   : > { %v2058_v22 = vpop.xlane.xlu2 %2057 }
 0x592   : > { %v7727_v30 = vmul.f32 0.003921569, %v2058_v22  ;;  %v5461_v22 = vld [vmem:[#allocation16 + $0x140] sm:$0xf] }
 0x593   : > { %v5462_v37 = vor.u32 %v6406_v23, %v5461_v22 }
 0x594   : > { %6776 = vrsqrt.f32 %v7727_v30  ;;  %vm2071_vm13 = vcmp.eq.f32.partialorder %v7727_v30, inf  ;;  %v2074_v52 = vand.u32 2147483648, %v7727_v30  ;;  %vm2073_vm14 = vcmp.eq.f32.partialorder %v7727_v30, 0.0 }
 0x595   : > { %2828 = vmatpush.bf16.msra.mxu1 %v5462_v37 }
 0x599   : > { %v2061_v55 = vpop.xlane.xlu0 %2060  ;;  %2829 = vmatpush.bf16.msra.mxu1 %v5446_v50 }
 0x59a   : > { %v6777_v25 = vpop.eup %6776  ;;  %v7730_v61 = vmul.f32 0.003921569, %v2061_v55 }
 0x59b   : > { %v2065_v3 = vmul.f32 %v6777_v25, %v7727_v30 }
 0x59c   : > { %6778 = vrsqrt.f32 %v7730_v61  ;;  %vm2083_vm15 = vcmp.eq.f32.partialorder %v7730_v61, inf  ;;  %vm2085_vm0 = vcmp.eq.f32.partialorder %v7730_v61, 0.0 }
 0x59d   : > { %v2066_v6 = vmul.f32 %v6777_v25, %v2065_v3  ;;  %2830 = vmatpush.bf16.msra.mxu1 %v5430_v10  ;;  %v6419_v10 = vld [vmem:[#allocation16 + $0x1b4] sm:$0xf0] }
 0x59f   : > { %v2067_v26 = vmul.f32 0.5, %v2066_v6  ;;  %v6396_v6 = vld [vmem:[#allocation16 + $0x104] sm:$0xf] }
 0x5a0   : > { %v5434_v15 = vor.u32 %v6396_v6, %v5431_v13  ;;  %v5391_v6 = vld [vmem:[#allocation16 + $0xb8] sm:$0xf0]  ;;  %v6417_v13 = vld [vmem:[#allocation16 + $0x1ac] sm:$0xf] }
 0x5a1   : > { %v2068_v33 = vsub.f32 1.5, %v2067_v26 }
 0x5a2   : > { %v6779_v40 = vpop.eup %6778  ;;  %2856 = vmatpush.bf16.msra.mxu3 %v5434_v15  ;;  %v748_v15 = vld [vmem:[%s7565_s20] sm:$0xff]  ;;  %s4429_s20 = scalar_lea.hbm %s7971_s26, %s6588_s19 }
 0x5a3   : > { %v2069_v35 = vmul.f32 %v6777_v25, %v2068_v33  ;;  %v2077_v43 = vmul.f32 %v6779_v40, %v7730_v61  ;;  %v5301_v25 = vld [vmem:[#allocation16] sm:$0xf]  ;;  %s4432_s16 = sshll.u32 %s4429_s20, 4  ;;  %s4433_s16 = int_to_ptr.hbm [resolvable:$true] %s4432_s16 }
 0x5a4   : > { %v5302_v3 = vor.u32 %v6366_v62, %v5301_v25  ;;  %v6421_v25 = vld [vmem:[#allocation16 + $0x1cc] sm:$0xf]  ;;  %v5535_v62 = vld [vmem:[#allocation16 + $0x1d8] sm:$0xf0] }
 0x5a5   : > { %v2070_v48 = vmul.f32 %v2069_v35, %v7727_v30  ;;  %v2078_v49 = vmul.f32 %v6779_v40, %v2077_v43  ;;  %v6395_v43 = vld [vmem:[#allocation16 + $0xf4] sm:$0xf0]  ;;  %v5538_v9 = vor.u32 %v6421_v25, %v5535_v62 }
 0x5a6   : > { %2817 = vmatpush.bf16.msra.mxu0 %v5302_v3  ;;  %v5389_v3 = vld [vmem:[#allocation16 + $0xa8] sm:$0xf] }
 0x5a7   : > { %v2079_v53 = vmul.f32 0.5, %v2078_v49  ;;  %v2072_v55 = vsel %vm2071_vm13, %v7727_v30, %v2070_v48  ;;  %v2086_v30 = vand.u32 2147483648, %v7730_v61 }
 0x5a8   : > { %v2075_v56 = vsel %vm2073_vm14, %v2074_v52, %v2072_v55  ;;  %v6391_v55 = vld [vmem:[#allocation16 + $0xd4] sm:$0xf0] }
 0x5a9   : > { %v2080_v57 = vsub.f32 1.5, %v2079_v53  ;;  %v2088_v58 = vadd.f32 1e-06, %v2075_v56  ;;  %v5550_v53 = vor.u32 %v6427_v45, %v5549_v44  ;;  %v5554_v56 = vor.u32 %v6425_v18, %v5551_v51  ;;  %v6377_v44 = vld [vmem:[#allocation16 + $0x6c] sm:$0xf] }
 0x5aa   : > { %v5406_v63 = vor.u32 %v6391_v55, %v5405_v54  ;;  %v6409_v18 = vld [vmem:[#allocation16 + $0x16c] sm:$0xf]  ;;  %v6375_v51 = vld [vmem:[#allocation16 + $0x54] sm:$0xf0]  ;;  %v5343_v55 = vld [vmem:[#allocation16 + $0x58] sm:$0xf0] }
 0x5ab   : > { %v2081_v60 = vmul.f32 %v6779_v40, %v2080_v57  ;;  %6780 = vrsqrt.f32 %v2088_v58  ;;  %vm2096_vm2 = vweird.f32 %v2088_v58  ;;  %v6423_v57 = vld [vmem:[#allocation16 + $0x1d4] sm:$0xf0]  ;;  %v6373_v54 = vld [vmem:[#allocation16 + $0x4c] sm:$0xf] }
 0x5ac   : > { %v5346_v25 = vor.u32 %v6373_v54, %v5343_v55 }
 0x5ad   : > { %v2082_v0 = vmul.f32 %v2081_v60, %v7730_v61  ;;  %v5407_v60 = vld [vmem:[#allocation16 + $0xd8] sm:$0xf0] }
 0x5af   : > { %v2084_v34 = vsel %vm2083_vm15, %v7730_v61, %v2082_v0 }
 0x5b0   : > { %v2087_v20 = vsel %vm2085_vm0, %v2086_v30, %v2084_v34  ;;  %v5517_v30 = vld [vmem:[#allocation16 + $0x1a8] sm:$0xf]  ;;  %v5519_v34 = vld [vmem:[#allocation16 + $0x1b8] sm:$0xf0] }
 0x5b1   : > { %v6781_v21 = vpop.eup %6780  ;;  %v2089_v22 = vadd.f32 1e-06, %v2087_v20  ;;  %v5390_v20 = vor.u32 %v6387_v4, %v5389_v3  ;;  %v6369_v3 = vld [vmem:[#allocation16 + $0x2c] sm:$0xf]  ;;  %v5327_v4 = vld [vmem:[#allocation16 + $0x38] sm:$0xf0] }
 0x5b2   : > { %v2091_v23 = vmul.f32 %v6781_v21, %v2088_v58  ;;  %vm2097_vm1 = vweird.f32 %v6781_v21  ;;  %v6389_v58 = vld [vmem:[#allocation16 + $0xcc] sm:$0xf] }
 0x5b3   : > { %6782 = vrsqrt.f32 %v2089_v22  ;;  %vm2098_vm3 = vmor %vm2096_vm2, %vm2097_vm1  ;;  %vm2106_vm5 = vweird.f32 %v2089_v22  ;;  %v5410_v2 = vor.u32 %v6389_v58, %v5407_v60  ;;  %v5325_v58 = vld [vmem:[#allocation16 + $0x28] sm:$0xf]  ;;  %v6371_v60 = vld [vmem:[#allocation16 + $0x34] sm:$0xf0] }
 0x5b4   : > { %v2092_v26 = vmul.f32 %v6781_v21, %v2091_v23  ;;  %v6383_v23 = vld [vmem:[#allocation16 + $0x94] sm:$0xf0] }
 0x5b6   : > { %v2093_v27 = vmul.f32 0.5, %v2092_v26  ;;  %v5394_v26 = vor.u32 %v6385_v5, %v5391_v6  ;;  %v5309_v5 = vld [vmem:[#allocation16 + $0x8] sm:$0xf]  ;;  %v6367_v6 = vld [vmem:[#allocation16 + $0x14] sm:$0xf0] }
 0x5b8   : > { %v2094_v28 = vsub.f32 1.5, %v2093_v27  ;;  %v5522_v27 = vor.u32 %v6417_v13, %v5519_v34  ;;  %v5330_v13 = vor.u32 %v6369_v3, %v5327_v4 }
 0x5b9   : > { %v6783_v29 = vpop.eup %6782 }
 0x5ba   : > { %v2101_v31 = vmul.f32 %v6783_v29, %v2089_v22  ;;  %v2095_v32 = vmul.f32 %v6781_v21, %v2094_v28  ;;  %vm2107_vm4 = vweird.f32 %v6783_v29  ;;  %v5373_v22 = vld [vmem:[#allocation16 + $0x88] sm:$0xf] }
 0x5bb   : > { %vm2108_vm6 = vmor %vm2106_vm5, %vm2107_vm4  ;;  %v5501_v28 = vld [vmem:[#allocation16 + $0x188] sm:$0xf] }
 0x5bc   : > { %v2102_v33 = vmul.f32 %v6783_v29, %v2101_v31  ;;  %v2099_v36 = vsel %vm2098_vm3, %v6781_v21, %v2095_v32  ;;  %v5518_v21 = vor.u32 %v6419_v10, %v5517_v30  ;;  %v6381_v31 = vld [vmem:[#allocation16 + $0x8c] sm:$0xf]  ;;  %v5375_v32 = vld [vmem:[#allocation16 + $0x98] sm:$0xf0]  ;;  %v5326_v30 = vor.u32 %v6371_v60, %v5325_v58 }
 0x5bd   : > { %v2110_v39 = vmul.f32 %v2099_v36, %v7707_v11  ;;  %v2111_v40 = vmul.f32 %v2099_v36, %v7710_v12  ;;  %v5422_v12 = vor.u32 %v6395_v43, %v5421_v41  ;;  %v2484_v36 = vunpack.c.l.b16 %v748_v15  ;;  %v6411_v43 = vld [vmem:[#allocation16 + $0x174] sm:$0xf0] }
 0x5be   : > { %v2103_v61 = vmul.f32 0.5, %v2102_v33  ;;  %v6413_v33 = vld [vmem:[#allocation16 + $0x18c] sm:$0xf]  ;;  %v5378_v41 = vor.u32 %v6381_v31, %v5375_v32 }
 0x5bf   : > { %v2114_v47 = vadd.f32 1.0, %v2110_v39  ;;  %v2115_v49 = vadd.f32 1.0, %v2111_v40  ;;  %v5357_v40 = vld [vmem:[#allocation16 + $0x68] sm:$0xf]  ;;  %v7750_v45 = vpack.c.b16 %v2484_v36, %v2484_v36 }
 0x5c0   : > { %v2104_v37 = vsub.f32 1.5, %v2103_v61  ;;  %v5503_v61 = vld [vmem:[#allocation16 + $0x198] sm:$0xf0] }
 0x5c2   : > { %v2105_v38 = vmul.f32 %v6783_v29, %v2104_v37  ;;  %v2485_v37 = vunpack.c.h.b16 %v748_v15  ;;  %v5437_v15 = vld [vmem:[#allocation16 + $0x108] sm:$0xf] }
 0x5c4   : > { %v2109_v7 = vsel %vm2108_vm6, %v6783_v29, %v2105_v38  ;;  %v6415_v29 = vld [vmem:[#allocation16 + $0x194] sm:$0xf0]  ;;  %v5374_v38 = vor.u32 %v6383_v23, %v5373_v22  ;;  %v5311_v22 = vld [vmem:[#allocation16 + $0x18] sm:$0xf0]  ;;  %v6397_v23 = vld [vmem:[#allocation16 + $0x10c] sm:$0xf] }
 0x5c5   : > { %v2112_v42 = vmul.f32 %v2109_v7, %v7718_v16  ;;  %v2113_v35 = vmul.f32 %v2109_v7, %v7721_v19  ;;  %v5426_v16 = vor.u32 %v6393_v17, %v5423_v46  ;;  %v5533_v19 = vld [vmem:[#allocation16 + $0x1c8] sm:$0xf]  ;;  %v5502_v39 = vor.u32 %v6415_v29, %v5501_v28  ;;  %v6379_v7 = vld [vmem:[#allocation16 + $0x74] sm:$0xf0]  ;;  %v5359_v46 = vld [vmem:[#allocation16 + $0x78] sm:$0xf0] }
 0x5c6   : > { %v5534_v0 = vor.u32 %v6423_v57, %v5533_v19  ;;  %v7752_v17 = vpack.c.b16 %v2485_v37, %v2485_v37 }
 0x5c7   : > { %v2116_v48 = vadd.f32 1.0, %v2112_v42  ;;  %v2117_v50 = vadd.f32 1.0, %v2113_v35  ;;  %v5506_v42 = vor.u32 %v6413_v33, %v5503_v61  ;;  %v5485_v35 = vld [vmem:[#allocation16 + $0x168] sm:$0xf] }
 0x5c9   : > { %v2249_v11 = vpack.c.bf16 %v2116_v48, %v2114_v47  ;;  %v2250_v52 = vpack.c.bf16 %v2117_v50, %v2115_v49  ;;  %v5487_v47 = vld [vmem:[#allocation16 + $0x178] sm:$0xf0]  ;;  %v5358_v48 = vor.u32 %v6379_v7, %v5357_v40  ;;  %v5486_v49 = vor.u32 %v6411_v43, %v5485_v35  ;;  %v5341_v50 = vld [vmem:[#allocation16 + $0x48] sm:$0xf] }
 0x5ca   : > { %v5342_v19 = vor.u32 %v6375_v51, %v5341_v50 }
 0x5cb   : > { %2424 = vmatmul.bf16.vlgmr.msrb.gmra.mxu0 %v2249_v11  ;;  %2438 = vmatmul.bf16.vlgmr.msrb.gmra.mxu1 %v2250_v52 }
 0x5cc   : > { %2452 = vmatmul.bf16.vlgmr.msrb.gmra.mxu2 %v2249_v11  ;;  %2466 = vmatmul.bf16.vlgmr.msrb.gmra.mxu3 %v2250_v52  ;;  %v5362_v11 = vor.u32 %v6377_v44, %v5359_v46  ;;  %v5490_v52 = vor.u32 %v6409_v18, %v5487_v47 }
 0x5cd   : > { %2862 = vmatpush.bf16.msrb.mxu0 %v5422_v12  ;;  %2875 = vmatpush.bf16.msrb.mxu1 %v5550_v53  ;;  %v5469_v12 = vld [vmem:[#allocation16 + $0x148] sm:$0xf]  ;;  %v6407_v53 = vld [vmem:[#allocation16 + $0x154] sm:$0xf0] }
 0x5ce   : > { %2888 = vmatpush.bf16.msrb.mxu2 %v5426_v16  ;;  %2901 = vmatpush.bf16.msrb.mxu3 %v5554_v56  ;;  %v6405_v16 = vld [vmem:[#allocation16 + $0x14c] sm:$0xf]  ;;  %v5471_v56 = vld [vmem:[#allocation16 + $0x158] sm:$0xf0]  ;;  %v5470_v57 = vor.u32 %v6407_v53, %v5469_v12 }
 0x5cf   : > { %v5474_v62 = vor.u32 %v6405_v16, %v5471_v56 }
 0x5d1   : > { %2863 = vmatpush.bf16.msrb.mxu0 %v5406_v63  ;;  %2876 = vmatpush.bf16.msrb.mxu1 %v5534_v0  ;;  %v5453_v63 = vld [vmem:[#allocation16 + $0x128] sm:$0xf]  ;;  %v6403_v0 = vld [vmem:[#allocation16 + $0x134] sm:$0xf0] }
 0x5d2   : > { %2889 = vmatpush.bf16.msrb.mxu2 %v5410_v2  ;;  %2902 = vmatpush.bf16.msrb.mxu3 %v5538_v9  ;;  %v6401_v2 = vld [vmem:[#allocation16 + $0x12c] sm:$0xf]  ;;  %v5455_v9 = vld [vmem:[#allocation16 + $0x138] sm:$0xf0]  ;;  %v5454_v10 = vor.u32 %v6403_v0, %v5453_v63 }
 0x5d3   : > { %v5458_v34 = vor.u32 %v6401_v2, %v5455_v9 }
 0x5d5   : > { %2864 = vmatpush.bf16.msrb.mxu0 %v5390_v20  ;;  %2877 = vmatpush.bf16.msrb.mxu1 %v5518_v21  ;;  %v6399_v20 = vld [vmem:[#allocation16 + $0x114] sm:$0xf0]  ;;  %v6365_v21 = vld [vmem:[#allocation16 + $0xc] sm:$0xf] }
 0x5d6   : > { %2890 = vmatpush.bf16.msrb.mxu2 %v5394_v26  ;;  %2903 = vmatpush.bf16.msrb.mxu3 %v5522_v27  ;;  %v5439_v26 = vld [vmem:[#allocation16 + $0x118] sm:$0xf0]  ;;  %v5310_v27 = vor.u32 %v6367_v6, %v5309_v5  ;;  %v5438_v28 = vor.u32 %v6399_v20, %v5437_v15  ;;  %v5314_v29 = vor.u32 %v6365_v21, %v5311_v22 }
 0x5d7   : > { %v5442_v31 = vor.u32 %v6397_v23, %v5439_v26 }
 0x5d9   : > { %2865 = vmatpush.bf16.msrb.mxu0 %v5374_v38  ;;  %2878 = vmatpush.bf16.msrb.mxu1 %v5502_v39  ;;  %v2215_v39 = vld [vmem:[%s7967_s27] sm:$0xf]  ;;  %s7182_s27 = sshra.s32 %s4433_s16, 4  ;;  %s7183_s27 = int_to_ptr.hbm [resolvable:$true] %s7182_s27 }
 0x5da   : > { %2891 = vmatpush.bf16.msrb.mxu2 %v5378_v41  ;;  %2904 = vmatpush.bf16.msrb.mxu3 %v5506_v42  ;;  %v2150_v41 = vld [vmem:[#allocation14] sm:$0x3]  ;;  %v2475_v42 = vperm.slane %v2215_v39, 0  ;;  %v2476_v18 = vperm.slane %v2215_v39, 1  ;;  %v2477_v2 = vperm.slane %v2215_v39, 2  ;;  %v2478_v6 = vperm.slane %v2215_v39, 3  ;;  %p7189_p7 = scmp.lt.s32.totalorder %s7183_s27, %s7971_s26 }
 0x5db   : > { %2818 = vmatmul.bf16.vlgmr.msra.gmra.mxu0 %v7750_v45  ;;  %2831 = vmatmul.bf16.vlgmr.msra.gmra.mxu1 %v7752_v17  ;;  %v2253_v44 = vperm.slane %v2150_v41, 1  ;;  %s7184_s8 = scalar_lea.hbm %s7183_s27, 32 }
 0x5dc   : > { %2844 = vmatmul.bf16.vlgmr.msra.gmra.mxu2 %v7750_v45  ;;  %2857 = vmatmul.bf16.vlgmr.msra.gmra.mxu3 %v7752_v17  ;;  %p7185_p1 = scmp.ne.s32.totalorder %s7183_s27, %s7184_s8  ;;  %p7190_p9 = scmp.lt.s32.totalorder %s7188_s11, %s7184_s8 }
 0x5dd   : > { %2866 = vmatpush.bf16.msrb.mxu0 %v5358_v48  ;;  %2879 = vmatpush.bf16.msrb.mxu1 %v5486_v49 }
 0x5de   : > { %2892 = vmatpush.bf16.msrb.mxu2 %v5362_v11  ;;  %2905 = vmatpush.bf16.msrb.mxu3 %v5490_v52  ;;  %p7186_p3 = pnand %p7185_p1, %p7499_p4  ;;  %p7191_p5 = por %p7190_p9, %p7189_p7 }
 0x5e0   : > { %p7187_p12 = pneg %p7186_p3 }
 0x5e1   : > { %2867 = vmatpush.bf16.msrb.mxu0 %v5342_v19  ;;  %2880 = vmatpush.bf16.msrb.mxu1 %v5470_v57 }
 0x5e2   : > { %2893 = vmatpush.bf16.msrb.mxu2 %v5346_v25  ;;  %2906 = vmatpush.bf16.msrb.mxu3 %v5474_v62  ;;  %p7192_p8 = pnand %p7191_p5, %p7187_p12 }
 0x5e5   : > { %2868 = vmatpush.bf16.msrb.mxu0 %v5326_v30  ;;  %2881 = vmatpush.bf16.msrb.mxu1 %v5454_v10 }
 0x5e6   : > { %2894 = vmatpush.bf16.msrb.mxu2 %v5330_v13  ;;  %2907 = vmatpush.bf16.msrb.mxu3 %v5458_v34 }
 0x5e9   : > { %2869 = vmatpush.bf16.msrb.mxu0 %v5310_v27  ;;  %2882 = vmatpush.bf16.msrb.mxu1 %v5438_v28 }
 0x5ea   : > { %2895 = vmatpush.bf16.msrb.mxu2 %v5314_v29  ;;  %2908 = vmatpush.bf16.msrb.mxu3 %v5442_v31 }
 0x5ec   : > { %2870 = vmatmul.bf16.vlgmr.msrb.gmra.mxu0 %v7750_v45  ;;  %2883 = vmatmul.bf16.vlgmr.msrb.gmra.mxu1 %v7752_v17 }
 0x5ed   : > { %2896 = vmatmul.bf16.vlgmr.msrb.gmra.mxu2 %v7750_v45  ;;  %2909 = vmatmul.bf16.vlgmr.msrb.gmra.mxu3 %v7752_v17  ;;  %v2252_v45 = vperm.slane %v2150_v41, 0 }
 0x648   : > { %v2425_v32 = vpop.f32.mrf.mxu0  ;;  %v2439_v33 = vpop.f32.mrf.mxu1 }
 0x649   : > { %v2426_v49 = vadd.f32 %v2425_v32, %v2252_v45 }
 0x64b   : > { %v2440_v19 = vadd.f32 %v2439_v33, %v2426_v49 }
 0x64f   : > { %v2453_v61 = vpop.f32.mrf.mxu2  ;;  %v2467_v36 = vpop.f32.mrf.mxu3 }
 0x650   : > { %v2427_v37 = vpop.f32.mrf.mxu0  ;;  %v2441_v38 = vpop.f32.mrf.mxu1  ;;  %v2454_v47 = vadd.f32 %v2453_v61, %v2253_v44 }
 0x651   : > { %v2428_v48 = vadd.f32 %v2427_v37, %v2252_v45 }
 0x652   : > { %v2468_v55 = vadd.f32 %v2467_v36, %v2454_v47 }
 0x653   : > { %v2442_v16 = vadd.f32 %v2441_v38, %v2428_v48 }
 0x654   : > { %v2472_v60 = vpack.c.bf16 %v2468_v55, %v2440_v19 }
 0x656   : > { %v2920_v4 = vunpack.c.l.b16 %v2472_v60  ;;  %v2918_v28 = vrot.slane %v2472_v60, 4 }
 0x657   : > { %v2455_v40 = vpop.f32.mrf.mxu2  ;;  %v2469_v7 = vpop.f32.mrf.mxu3 }
 0x658   : > { %v2819_v35 = vpop.f32.mrf.mxu0  ;;  %v2832_v43 = vpop.f32.mrf.mxu1  ;;  %v2456_v46 = vadd.f32 %v2455_v40, %v2253_v44  ;;  %v2938_v36 = vunpack.c.l.b16 %v2918_v28 }
 0x659   : > { %v2820_v17 = vadd.f32 %v2819_v35, %v2475_v42 }
 0x65a   : > { %v2470_v50 = vadd.f32 %v2469_v7, %v2456_v46 }
 0x65b   : > { %v2833_v52 = vadd.f32 %v2832_v43, %v2820_v17 }
 0x65c   : > { %v2473_v57 = vpack.c.bf16 %v2470_v50, %v2442_v16 }
 0x65e   : > { %v2921_v62 = vunpack.c.l.b16 %v2473_v57  ;;  %v2919_v26 = vrot.slane %v2473_v57, 4 }
 0x65f   : > { %v2845_v51 = vpop.f32.mrf.mxu2  ;;  %v2858_v11 = vpop.f32.mrf.mxu3 }
 0x660   : > { %v2846_v12 = vadd.f32 %v2845_v51, %v2476_v18  ;;  %v2821_v53 = vpop.f32.mrf.mxu0  ;;  %v2834_v54 = vpop.f32.mrf.mxu1  ;;  %v2922_v10 = vpack.c.b16 %v2921_v62, %v2920_v4  ;;  %v2939_v31 = vunpack.c.l.b16 %v2919_v26  ;;  %v6441_v26 = vld [vmem:[#allocation17 + $0x64] sm:$0xf0] }
 0x662   : > { %v2859_v56 = vadd.f32 %v2858_v11, %v2846_v12  ;;  %v2940_v37 = vpack.c.b16 %v2939_v31, %v2938_v36  ;;  %v5599_v31 = vld [vmem:[#allocation17 + $0x50] sm:$0xf]  ;;  %v5601_v36 = vld [vmem:[#allocation17 + $0x58] sm:$0xf0] }
 0x664   : > { %v2914_v58 = vpack.c.bf16 %v2859_v56, %v2833_v52 }
 0x666   : > { %v3002_v25 = vrot.slane %v2914_v58, 4  ;;  %2931 = vmatpush.bf16.xpose.msra.mxu0 %v2914_v58 }
 0x667   : > { %v2847_v63 = vpop.f32.mrf.mxu2  ;;  %v2860_v0 = vpop.f32.mrf.mxu3 }
 0x668   : > { %v3013_v3 = vsel %vm1641_vm11, %v3002_v25, 0 }
 0x669   : > { %v2871_v9 = vpop.f32.mrf.mxu0  ;;  %v2884_v30 = vpop.f32.mrf.mxu1  ;;  %3022 = vmatpush.bf16.msra.mxu2 %v3013_v3 }
 0x66a   : > { %v2872_v5 = vadd.f32 %v2871_v9, %v2477_v2 }
 0x66c   : > { %v2885_v15 = vadd.f32 %v2884_v30, %v2872_v5 }
 0x66d   : > { %2932 = vmatmul.bf16.vlgmr.msra.gmra.mxu0 %v2922_v10 }
 0x670   : > { %v2897_v13 = vpop.f32.mrf.mxu2  ;;  %v2910_v34 = vpop.f32.mrf.mxu3 }
 0x671   : > { %v2898_v20 = vadd.f32 %v2897_v13, %v2478_v6  ;;  %v2873_v21 = vpop.f32.mrf.mxu0  ;;  %v2886_v22 = vpop.f32.mrf.mxu1  ;;  %v5615_v13 = vld [vmem:[#allocation17 + $0x70] sm:$0xf] }
 0x672   : > { %v5617_v21 = vld [vmem:[#allocation17 + $0x78] sm:$0xf0] }
 0x673   : > { %v2911_v23 = vadd.f32 %v2910_v34, %v2898_v20  ;;  %v6443_v34 = vld [vmem:[#allocation17 + $0x74] sm:$0xf0] }
 0x674   : > { %v5616_v20 = vor.u32 %v6443_v34, %v5615_v13  ;;  %v5559_v13 = vld [vmem:[#allocation17] sm:$0xf] }
 0x675   : > { %v2915_v27 = vpack.c.bf16 %v2911_v23, %v2885_v15  ;;  %v6442_v15 = vld [vmem:[#allocation17 + $0x74] sm:$0xf]  ;;  %v5607_v23 = vld [vmem:[#allocation17 + $0x60] sm:$0xf] }
 0x676   : > { %v5620_v22 = vor.u32 %v6442_v15, %v5617_v21  ;;  %3245 = vmatpush.bf16.msrb.mxu0 %v5616_v20  ;;  %v5608_v28 = vor.u32 %v6441_v26, %v5607_v23  ;;  %v6429_v15 = vld [vmem:[#allocation17 + $0x4] sm:$0xf0]  ;;  %v5655_v20 = vld [vmem:[#allocation17 + $0xc0] sm:$0xf]  ;;  %v6428_v26 = vld [vmem:[#allocation17 + $0x4] sm:$0xf] }
 0x677   : > { %v3030_v29 = vrot.slane %v2915_v27, 4  ;;  %2949 = vmatpush.bf16.xpose.msra.mxu1 %v2915_v27  ;;  %v6440_v27 = vld [vmem:[#allocation17 + $0x64] sm:$0xf]  ;;  %v6453_v21 = vld [vmem:[#allocation17 + $0xc4] sm:$0xf0] }
 0x678   : > { %v2899_v32 = vpop.f32.mrf.mxu2  ;;  %v2912_v33 = vpop.f32.mrf.mxu3  ;;  %3273 = vmatpush.bf16.msrb.mxu2 %v5620_v22  ;;  %v5560_v22 = vor.u32 %v6429_v15, %v5559_v13  ;;  %v5656_v23 = vor.u32 %v6453_v21, %v5655_v20  ;;  %v2248_v21 = vld [vmem:[%s7968_s0] sm:$0x3] }
 0x679   : > { %v3040_v61 = vsel %vm1641_vm11, %v3030_v29, 0  ;;  %v5609_v29 = vld [vmem:[#allocation17 + $0x68] sm:$0xf0]  ;;  %v6439_v32 = vld [vmem:[#allocation17 + $0x54] sm:$0xf0] }
 0x67a   : > { %3049 = vmatpush.bf16.msra.mxu3 %v3040_v61  ;;  %v5612_v33 = vor.u32 %v6440_v27, %v5609_v29  ;;  %v6438_v61 = vld [vmem:[#allocation17 + $0x54] sm:$0xf]  ;;  %3246 = vmatpush.bf16.msrb.mxu0 %v5608_v28  ;;  %v5561_v27 = vld [vmem:[#allocation17 + $0x8] sm:$0xf0]  ;;  %v6452_v28 = vld [vmem:[#allocation17 + $0xc4] sm:$0xf] }
 0x67b   : > { %v5564_v29 = vor.u32 %v6428_v26, %v5561_v27 }
 0x67c   : > { %3274 = vmatpush.bf16.msrb.mxu2 %v5612_v33  ;;  %v5647_v33 = vld [vmem:[#allocation17 + $0xb0] sm:$0xf] }
 0x67e   : > { %2950 = vmatmul.bf16.vlgmr.msra.gmra.mxu1 %v2940_v37  ;;  %v5600_v37 = vor.u32 %v6439_v32, %v5599_v31  ;;  %v5657_v31 = vld [vmem:[#allocation17 + $0xc8] sm:$0xf0] }
 0x67f   : > { %v5660_v32 = vor.u32 %v6452_v28, %v5657_v31  ;;  %v3082_v28 = vperm.slane %v2248_v21, 1 }
 0x680   : > { %3247 = vmatpush.bf16.msrb.mxu0 %v5600_v37 }
 0x6ea   : > { %v2933_v38 = vpop.f32.mrf.mxu0 }
 0x6eb   : > { %v2956_v39 = vmul.f32 0.088388346, %v2933_v38  ;;  %v5604_v38 = vor.u32 %v6438_v61, %v5601_v36  ;;  %v6451_v61 = vld [vmem:[#allocation17 + $0xb4] sm:$0xf0]  ;;  %v6450_v36 = vld [vmem:[#allocation17 + $0xb4] sm:$0xf] }
 0x6ec   : > { %v5648_v37 = vor.u32 %v6451_v61, %v5647_v33 }
 0x6ed   : > { %v2961_v40 = vsel %vm2960_vm7, %v2956_v39, -inf  ;;  %3275 = vmatpush.bf16.msrb.mxu2 %v5604_v38  ;;  %v5649_v38 = vld [vmem:[#allocation17 + $0xb8] sm:$0xf0] }
 0x6ee   : > { %2962 = vmax.xlane.f32.xlu1 %v2961_v40  ;;  %v6437_v40 = vld [vmem:[#allocation17 + $0x44] sm:$0xf0] }
 0x6f2   : > { %v2935_v7 = vpop.f32.mrf.mxu0 }
 0x6f3   : > { %v2957_v41 = vmul.f32 0.088388346, %v2935_v7  ;;  %v6436_v7 = vld [vmem:[#allocation17 + $0x44] sm:$0xf] }
 0x6f5   : > { %v2964_v42 = vsel %vm2960_vm7, %v2957_v41, -inf }
 0x6f6   : > { %2965 = vmax.xlane.f32.xlu2 %v2964_v42  ;;  %v5593_v42 = vld [vmem:[#allocation17 + $0x48] sm:$0xf0] }
 0x6fb   : > { %v2951_v35 = vpop.f32.mrf.mxu1 }
 0x6fc   : > { %v2958_v43 = vmul.f32 0.088388346, %v2951_v35  ;;  %v5596_v35 = vor.u32 %v6436_v7, %v5593_v42  ;;  %v6449_v7 = vld [vmem:[#allocation17 + $0xa4] sm:$0xf0]  ;;  %v5641_v42 = vld [vmem:[#allocation17 + $0xa8] sm:$0xf0] }
 0x6fe   : > { %v2967_v44 = vsel %vm2960_vm7, %v2958_v43, -inf  ;;  %3276 = vmatpush.bf16.msrb.mxu2 %v5596_v35 }
 0x6ff   : > { %2968 = vmax.xlane.f32.xlu0 %v2967_v44  ;;  %v6435_v44 = vld [vmem:[#allocation17 + $0x34] sm:$0xf0] }
 0x703   : > { %v2953_v45 = vpop.f32.mrf.mxu1 }
 0x704   : > { %v2959_v46 = vmul.f32 0.088388346, %v2953_v45  ;;  %v5679_v45 = vld [vmem:[#allocation17 + $0xf0] sm:$0xf] }
 0x706   : > { %v2970_v17 = vsel %vm2960_vm7, %v2959_v46, -inf }
 0x707   : > { %2971 = vmax.xlane.f32.xlu1 %v2970_v17  ;;  %v6459_v17 = vld [vmem:[#allocation17 + $0xf4] sm:$0xf0] }
 0x761   : > { %v2963_v18 = vpop.xlane.xlu1 %2962 }
 0x762   : > { %v2973_v47 = vsub.f32 %v2956_v39, %v2963_v18  ;;  %v5591_v39 = vld [vmem:[#allocation17 + $0x40] sm:$0xf]  ;;  %v6434_v18 = vld [vmem:[#allocation17 + $0x34] sm:$0xf] }
 0x764   : > { %v2977_v48 = vmul.f32 1.442695, %v2973_v47  ;;  %v5585_v47 = vld [vmem:[#allocation17 + $0x38] sm:$0xf0] }
 0x766   : > { %6784 = vpow2.f32 %v2977_v48  ;;  %v5680_v48 = vor.u32 %v6459_v17, %v5679_v45  ;;  %v5631_v17 = vld [vmem:[#allocation17 + $0x90] sm:$0xf] }
 0x768   : > { %3259 = vmatpush.bf16.msrb.mxu1 %v5680_v48 }
 0x769   : > { %v2966_v49 = vpop.xlane.xlu2 %2965 }
 0x76a   : > { %v2974_v50 = vsub.f32 %v2957_v41, %v2966_v49  ;;  %v5592_v41 = vor.u32 %v6437_v40, %v5591_v39  ;;  %v5588_v49 = vor.u32 %v6434_v18, %v5585_v47  ;;  %v5652_v39 = vor.u32 %v6450_v36, %v5649_v38  ;;  %v5639_v40 = vld [vmem:[#allocation17 + $0xa0] sm:$0xf]  ;;  %v6447_v18 = vld [vmem:[#allocation17 + $0x94] sm:$0xf0]  ;;  %v6446_v47 = vld [vmem:[#allocation17 + $0x94] sm:$0xf] }
 0x76b   : > { %v5632_v48 = vor.u32 %v6447_v18, %v5631_v17 }
 0x76c   : > { %v6785_v51 = vpop.eup %6784  ;;  %v2979_v11 = vmul.f32 1.442695, %v2974_v50  ;;  %3248 = vmatpush.bf16.msrb.mxu0 %v5592_v41  ;;  %v6458_v50 = vld [vmem:[#allocation17 + $0xf4] sm:$0xf]  ;;  %3277 = vmatpush.bf16.msrb.mxu2 %v5588_v49  ;;  %v6448_v41 = vld [vmem:[#allocation17 + $0xa4] sm:$0xf] }
 0x76d   : > { %v2985_v52 = vsel %vm2960_vm7, %v6785_v51, 0.0  ;;  %v2997_v53 = vpack.c.bf16 %v6785_v51, %v6785_v51  ;;  %v5681_v51 = vld [vmem:[#allocation17 + $0xf8] sm:$0xf0] }
 0x76e   : > { %6786 = vpow2.f32 %v2979_v11  ;;  %2986 = vadd.xlane.f32.xlu2 %v2985_v52  ;;  %v5575_v11 = vld [vmem:[#allocation17 + $0x20] sm:$0xf]  ;;  %v5684_v52 = vor.u32 %v6458_v50, %v5681_v51  ;;  %v5633_v49 = vld [vmem:[#allocation17 + $0x98] sm:$0xf0]  ;;  %v6445_v51 = vld [vmem:[#allocation17 + $0x84] sm:$0xf0] }
 0x76f   : > { %v3005_v57 = vunpack.c.l.b16 %v2997_v53  ;;  %v5671_v53 = vld [vmem:[#allocation17 + $0xe0] sm:$0xf] }
 0x770   : > { %3287 = vmatpush.bf16.msrb.mxu3 %v5684_v52  ;;  %v5623_v50 = vld [vmem:[#allocation17 + $0x80] sm:$0xf]  ;;  %v6444_v52 = vld [vmem:[#allocation17 + $0x84] sm:$0xf] }
 0x772   : > { %v2969_v12 = vpop.xlane.xlu0 %2968 }
 0x773   : > { %v2975_v54 = vsub.f32 %v2958_v43, %v2969_v12  ;;  %v5583_v43 = vld [vmem:[#allocation17 + $0x30] sm:$0xf]  ;;  %v6433_v12 = vld [vmem:[#allocation17 + $0x24] sm:$0xf0] }
 0x774   : > { %v6787_v55 = vpop.eup %6786 }
 0x775   : > { %v2998_v16 = vpack.c.bf16 %v6787_v55, %v6787_v55  ;;  %v2981_v56 = vmul.f32 1.442695, %v2975_v54  ;;  %v2988_v19 = vsel %vm2960_vm7, %v6787_v55, 0.0  ;;  %v6457_v54 = vld [vmem:[#allocation17 + $0xe4] sm:$0xf0]  ;;  %v5576_v55 = vor.u32 %v6433_v12, %v5575_v11 }
 0x776   : > { %2989 = vadd.xlane.f32.xlu0 %v2988_v19  ;;  %v5577_v19 = vld [vmem:[#allocation17 + $0x28] sm:$0xf0]  ;;  %v5636_v11 = vor.u32 %v6446_v47, %v5633_v49 }
 0x777   : > { %v3006_v58 = vunpack.c.l.b16 %v2998_v16  ;;  %6788 = vpow2.f32 %v2981_v56  ;;  %v5672_v16 = vor.u32 %v6457_v54, %v5671_v53  ;;  %v6432_v56 = vld [vmem:[#allocation17 + $0x24] sm:$0xf]  ;;  %v5625_v12 = vld [vmem:[#allocation17 + $0x88] sm:$0xf0]  ;;  %v5624_v53 = vor.u32 %v6445_v51, %v5623_v50 }
 0x779   : > { %v3007_v60 = vpack.c.b16 %v3006_v58, %v3005_v57  ;;  %v6456_v57 = vld [vmem:[#allocation17 + $0xe4] sm:$0xf]  ;;  %v5580_v58 = vor.u32 %v6432_v56, %v5577_v19  ;;  %3260 = vmatpush.bf16.msrb.mxu1 %v5672_v16 }
 0x77a   : > { %v2972_v25 = vpop.xlane.xlu1 %2971 }
 0x77b   : > { %v2976_v62 = vsub.f32 %v2959_v46, %v2972_v25  ;;  %5555 = vmatmul.msk.bf16.vlgmr.msra.gmra.mxu2 %vm2960_vm7, %v3007_v60  ;;  %v5584_v46 = vor.u32 %v6435_v44, %v5583_v43  ;;  %v5673_v60 = vld [vmem:[#allocation17 + $0xe8] sm:$0xf0]  ;;  %v5640_v43 = vor.u32 %v6449_v7, %v5639_v40  ;;  %v5644_v44 = vor.u32 %v6448_v41, %v5641_v42 }
 0x77c   : > { %v5676_v25 = vor.u32 %v6456_v57, %v5673_v60  ;;  %3278 = vmatpush.bf16.msrb.mxu2 %v5580_v58 }
 0x77d   : > { %v6789_v63 = vpop.eup %6788  ;;  %v2983_v0 = vmul.f32 1.442695, %v2976_v62  ;;  %3249 = vmatpush.bf16.msrb.mxu0 %v5584_v46  ;;  %v5567_v62 = vld [vmem:[#allocation17 + $0x10] sm:$0xf] }
 0x77e   : > { %v2991_v3 = vsel %vm2960_vm7, %v6789_v63, 0.0  ;;  %v2999_v4 = vpack.c.bf16 %v6789_v63, %v6789_v63  ;;  %3288 = vmatpush.bf16.msrb.mxu3 %v5676_v25  ;;  %v6431_v63 = vld [vmem:[#allocation17 + $0x14] sm:$0xf0] }
 0x77f   : > { %6790 = vpow2.f32 %v2983_v0  ;;  %2992 = vadd.xlane.f32.xlu1 %v2991_v3  ;;  %v5663_v0 = vld [vmem:[#allocation17 + $0xd0] sm:$0xf]  ;;  %v5568_v3 = vor.u32 %v6431_v63, %v5567_v62 }
 0x780   : > { %v3033_v10 = vunpack.c.l.b16 %v2999_v4  ;;  %v6455_v4 = vld [vmem:[#allocation17 + $0xd4] sm:$0xf0] }
 0x781   : > { %3250 = vmatpush.bf16.msrb.mxu0 %v5576_v55  ;;  %v5628_v55 = vor.u32 %v6444_v52, %v5625_v12 }
 0x785   : > { %v6791_v2 = vpop.eup %6790  ;;  %3251 = vmatpush.bf16.msrb.mxu0 %v5568_v3 }
 0x786   : > { %v3000_v9 = vpack.c.bf16 %v6791_v2, %v6791_v2  ;;  %v2994_v30 = vsel %vm2960_vm7, %v6791_v2, 0.0  ;;  %v6430_v2 = vld [vmem:[#allocation17 + $0x14] sm:$0xf] }
 0x787   : > { %2995 = vadd.xlane.f32.xlu2 %v2994_v30  ;;  %v5664_v30 = vor.u32 %v6455_v4, %v5663_v0 }
 0x788   : > { %v3034_v5 = vunpack.c.l.b16 %v3000_v9  ;;  %v5569_v9 = vld [vmem:[#allocation17 + $0x18] sm:$0xf0] }
 0x789   : > { %3261 = vmatpush.bf16.msrb.mxu1 %v5664_v30  ;;  %3252 = vmatpush.bf16.msrb.mxu0 %v5560_v22 }
 0x78a   : > { %v3035_v6 = vpack.c.b16 %v3034_v5, %v3033_v10  ;;  %v5572_v10 = vor.u32 %v6430_v2, %v5569_v9  ;;  %v6454_v5 = vld [vmem:[#allocation17 + $0xd4] sm:$0xf] }
 0x78c   : > { %5556 = vmatmul.msk.bf16.vlgmr.msra.gmra.mxu3 %vm2960_vm7, %v3035_v6  ;;  %v5665_v6 = vld [vmem:[#allocation17 + $0xd8] sm:$0xf0]  ;;  %3279 = vmatpush.bf16.msrb.mxu2 %v5572_v10 }
 0x78d   : > { %v5668_v34 = vor.u32 %v6454_v5, %v5665_v6  ;;  %3262 = vmatpush.bf16.msrb.mxu1 %v5656_v23  ;;  %v3081_v23 = vperm.slane %v2248_v21, 0  ;;  %v6482_v21 = vld [vmem:[#allocation19 + $0xac] sm:$0xf0] }
 0x78f   : > { %3289 = vmatpush.bf16.msrb.mxu3 %v5668_v34 }
 0x790   : > { %3280 = vmatpush.bf16.msrb.mxu2 %v5564_v29 }
 0x791   : > { %3263 = vmatpush.bf16.msrb.mxu1 %v5648_v37 }
 0x793   : > { %3290 = vmatpush.bf16.msrb.mxu3 %v5660_v32 }
 0x795   : > { %3264 = vmatpush.bf16.msrb.mxu1 %v5640_v43 }
 0x797   : > { %3291 = vmatpush.bf16.msrb.mxu3 %v5652_v39 }
 0x799   : > { %3265 = vmatpush.bf16.msrb.mxu1 %v5632_v48 }
 0x79b   : > { %3292 = vmatpush.bf16.msrb.mxu3 %v5644_v44 }
 0x79d   : > { %3266 = vmatpush.bf16.msrb.mxu1 %v5624_v53 }
 0x79f   : > { %3293 = vmatpush.bf16.msrb.mxu3 %v5636_v11 }
 0x7a3   : > { %3294 = vmatpush.bf16.msrb.mxu3 %v5628_v55  ;;  %v6490_v55 = vld [vmem:[#allocation19 + $0xec] sm:$0xf0] }
 0x7e1   : > { %v2987_v35 = vpop.xlane.xlu2 %2986 }
 0x7e2   : > { %6792 = vrcp.f32 %v2987_v35 }
 0x7e8   : > { %v6793_v54 = vpop.eup %6792 }
 0x7e9   : > { %v2990_v45 = vpop.xlane.xlu0 %2989 }
 0x7ea   : > { %6794 = vrcp.f32 %v2990_v45 }
 0x7f0   : > { %v6795_v56 = vpop.eup %6794 }
 0x7f2   : > { %v2993_v25 = vpop.xlane.xlu1 %2992 }
 0x7f3   : > { %6796 = vrcp.f32 %v2993_v25  ;;  %v6520_v25 = vld [vmem:[#allocation19 + $0x1e4] sm:$0xf] }
 0x7f9   : > { %v6797_v2 = vpop.eup %6796 }
 0x7fa   : > { %v2996_v3 = vpop.xlane.xlu2 %2995 }
 0x7fb   : > { %6798 = vrcp.f32 %v2996_v3  ;;  %v6486_v3 = vld [vmem:[#allocation19 + $0xcc] sm:$0xf0] }
 0x7fe   : > { %v3024_v46 = vpop.f32.mrf.mxu2 }
 0x7ff   : > { %v3060_v16 = vmul.f32 %v6793_v54, %v3024_v46  ;;  %v5799_v54 = vld [vmem:[#allocation19 + $0xe0] sm:$0xf] }
 0x801   : > { %v3064_v57 = vpack.c.bf16 %v3060_v16, %v3060_v16  ;;  %v6799_v30 = vpop.eup %6798  ;;  %v5927_v16 = vld [vmem:[#allocation19 + $0x1e0] sm:$0xf] }
 0x803   : > { %v3070_v62 = vunpack.c.l.b16 %v3064_v57  ;;  %v5801_v57 = vld [vmem:[#allocation19 + $0xf0] sm:$0xf0] }
 0x806   : > { %v3026_v19 = vpop.f32.mrf.mxu2 }
 0x807   : > { %v3061_v58 = vmul.f32 %v6795_v56, %v3026_v19  ;;  %v5800_v56 = vor.u32 %v6490_v55, %v5799_v54  ;;  %v6488_v19 = vld [vmem:[#allocation19 + $0xe4] sm:$0xf]  ;;  %v5865_v55 = vld [vmem:[#allocation19 + $0x170] sm:$0xf0] }
 0x808   : > { %v6504_v54 = vld [vmem:[#allocation19 + $0x164] sm:$0xf] }
 0x809   : > { %v3065_v60 = vpack.c.bf16 %v3061_v58, %v3061_v58  ;;  %3779 = vmatpush.bf16.msra.mxu0 %v5800_v56 }
 0x80b   : > { %v3071_v63 = vunpack.c.l.b16 %v3065_v60  ;;  %v5804_v60 = vor.u32 %v6488_v19, %v5801_v57  ;;  %v5719_v19 = vld [vmem:[#allocation19 + $0x40] sm:$0xf]  ;;  %v6470_v57 = vld [vmem:[#allocation19 + $0x4c] sm:$0xf0] }
 0x80d   : > { %v3072_v0 = vpack.c.b16 %v3071_v63, %v3070_v62  ;;  %v5929_v62 = vld [vmem:[#allocation19 + $0x1f0] sm:$0xf0]  ;;  %3807 = vmatpush.bf16.msra.mxu2 %v5804_v60  ;;  %v5868_v60 = vor.u32 %v6504_v54, %v5865_v55 }
 0x80e   : > { %v5932_v63 = vor.u32 %v6520_v25, %v5929_v62  ;;  %v6502_v25 = vld [vmem:[#allocation19 + $0x14c] sm:$0xf0]  ;;  %v6468_v62 = vld [vmem:[#allocation19 + $0x44] sm:$0xf] }
 0x80f   : > { %v3051_v4 = vpop.f32.mrf.mxu3  ;;  %3253 = vmatmul.bf16.vlgmr.msrb.gmra.mxu0 %v3072_v0  ;;  %3281 = vmatmul.bf16.vlgmr.msrb.gmra.mxu2 %v3072_v0  ;;  %v5783_v0 = vld [vmem:[#allocation19 + $0xc0] sm:$0xf] }
 0x810   : > { %v3062_v9 = vmul.f32 %v6797_v2, %v3051_v4  ;;  %v5911_v4 = vld [vmem:[#allocation19 + $0x1c0] sm:$0xf]  ;;  %3821 = vmatpush.bf16.msra.mxu3 %v5932_v63  ;;  %v5784_v2 = vor.u32 %v6486_v3, %v5783_v0  ;;  %v5721_v63 = vld [vmem:[#allocation19 + $0x50] sm:$0xf0]  ;;  %v6500_v3 = vld [vmem:[#allocation19 + $0x144] sm:$0xf] }
 0x812   : > { %v3066_v5 = vpack.c.bf16 %v3062_v9, %v3062_v9  ;;  %v6518_v9 = vld [vmem:[#allocation19 + $0x1cc] sm:$0xf0]  ;;  %3780 = vmatpush.bf16.msra.mxu0 %v5784_v2 }
 0x814   : > { %v3076_v34 = vunpack.c.l.b16 %v3066_v5  ;;  %v5912_v5 = vor.u32 %v6518_v9, %v5911_v4  ;;  %v5849_v4 = vld [vmem:[#allocation19 + $0x150] sm:$0xf0] }
 0x817   : > { %v3053_v10 = vpop.f32.mrf.mxu3 }
 0x818   : > { %v3063_v6 = vmul.f32 %v6799_v30, %v3053_v10  ;;  %v6484_v30 = vld [vmem:[#allocation19 + $0xc4] sm:$0xf]  ;;  %v5785_v10 = vld [vmem:[#allocation19 + $0xd0] sm:$0xf0] }
 0x81a   : > { %v3067_v13 = vpack.c.bf16 %v3063_v6, %v3063_v6  ;;  %v5788_v6 = vor.u32 %v6484_v30, %v5785_v10  ;;  %v5720_v30 = vor.u32 %v6470_v57, %v5719_v19 }
 0x81c   : > { %v3077_v15 = vunpack.c.l.b16 %v3067_v13  ;;  %v6516_v13 = vld [vmem:[#allocation19 + $0x1c4] sm:$0xf]  ;;  %3808 = vmatpush.bf16.msra.mxu2 %v5788_v6  ;;  %v5724_v6 = vor.u32 %v6468_v62, %v5721_v63  ;;  %v5791_v62 = vld [vmem:[#allocation19 + $0xc8] sm:$0xf]  ;;  %v6487_v63 = vld [vmem:[#allocation19 + $0xd4] sm:$0xf0] }
 0x81e   : > { %v3078_v20 = vpack.c.b16 %v3077_v15, %v3076_v34  ;;  %v5913_v34 = vld [vmem:[#allocation19 + $0x1d0] sm:$0xf0]  ;;  %v5767_v15 = vld [vmem:[#allocation19 + $0xa0] sm:$0xf] }
 0x820   : > { %3267 = vmatmul.bf16.vlgmr.msrb.gmra.mxu1 %v3078_v20  ;;  %3295 = vmatmul.bf16.vlgmr.msrb.gmra.mxu3 %v3078_v20  ;;  %v5916_v20 = vor.u32 %v6516_v13, %v5913_v34  ;;  %v5703_v13 = vld [vmem:[#allocation19 + $0x20] sm:$0xf]  ;;  %v6466_v34 = vld [vmem:[#allocation19 + $0x2c] sm:$0xf0] }
 0x822   : > { %3822 = vmatpush.bf16.msra.mxu3 %v5916_v20  ;;  %v5852_v20 = vor.u32 %v6500_v3, %v5849_v4  ;;  %v6519_v4 = vld [vmem:[#allocation19 + $0x1d4] sm:$0xf0] }
 0x88c   : > { %v3254_v22 = vpop.f32.mrf.mxu0 }
 0x88d   : > { %v3255_v29 = vadd.f32 %v3254_v22, %v3081_v23  ;;  %v5895_v22 = vld [vmem:[#allocation19 + $0x1a0] sm:$0xf] }
 0x892   : > { %v3282_v26 = vpop.f32.mrf.mxu2 }
 0x893   : > { %v3283_v31 = vadd.f32 %v3282_v26, %v3082_v28  ;;  %v5768_v26 = vor.u32 %v6482_v21, %v5767_v15  ;;  %v5831_v15 = vld [vmem:[#allocation19 + $0x120] sm:$0xf]  ;;  %v6498_v21 = vld [vmem:[#allocation19 + $0x12c] sm:$0xf0] }
 0x894   : > { %v3256_v36 = vpop.f32.mrf.mxu0 }
 0x895   : > { %v3257_v7 = vadd.f32 %v3256_v36, %v3081_v23  ;;  %v6514_v23 = vld [vmem:[#allocation19 + $0x1ac] sm:$0xf0]  ;;  %3781 = vmatpush.bf16.msra.mxu0 %v5768_v26 }
 0x896   : > { %v6478_v36 = vld [vmem:[#allocation19 + $0x8c] sm:$0xf0] }
 0x89a   : > { %v3284_v39 = vpop.f32.mrf.mxu2 }
 0x89b   : > { %v3285_v42 = vadd.f32 %v3284_v39, %v3082_v28  ;;  %v6480_v28 = vld [vmem:[#allocation19 + $0xa4] sm:$0xf] }
 0x89d   : > { %v3268_v27 = vpop.f32.mrf.mxu1 }
 0x89e   : > { %v3269_v32 = vadd.f32 %v3268_v27, %v3255_v29  ;;  %v5896_v27 = vor.u32 %v6514_v23, %v5895_v22  ;;  %v5769_v29 = vld [vmem:[#allocation19 + $0xb0] sm:$0xf0]  ;;  %v6464_v22 = vld [vmem:[#allocation19 + $0x24] sm:$0xf] }
 0x89f   : > { %v5705_v23 = vld [vmem:[#allocation19 + $0x30] sm:$0xf0] }
 0x8a0   : > { %v7781_v37 = vadd.f32 %v3269_v32, %v7690_v59  ;;  %v5772_v32 = vor.u32 %v6480_v28, %v5769_v29  ;;  %v5833_v28 = vld [vmem:[#allocation19 + $0x130] sm:$0xf0]  ;;  %v5687_v29 = vld [vmem:[#allocation19] sm:$0xf] }
 0x8a2   : > { %3809 = vmatpush.bf16.msra.mxu2 %v5772_v32  ;;  %v6462_v32 = vld [vmem:[#allocation19 + $0xc] sm:$0xf0] }
 0x8a3   : > { %v3296_v33 = vpop.f32.mrf.mxu3 }
 0x8a4   : > { %v3297_v61 = vadd.f32 %v3296_v33, %v3283_v31  ;;  %v6512_v31 = vld [vmem:[#allocation19 + $0x1a4] sm:$0xf]  ;;  %v5897_v33 = vld [vmem:[#allocation19 + $0x1b0] sm:$0xf0] }
 0x8a5   : > { %v3270_v40 = vpop.f32.mrf.mxu1 }
 0x8a6   : > { %v7784_v38 = vadd.f32 %v3297_v61, %v7693_v24  ;;  %v3271_v35 = vadd.f32 %v3270_v40, %v3257_v7  ;;  %v5751_v61 = vld [vmem:[#allocation19 + $0x80] sm:$0xf]  ;;  %v5900_v40 = vor.u32 %v6512_v31, %v5897_v33  ;;  %v5704_v31 = vor.u32 %v6466_v34, %v5703_v13  ;;  %v5775_v34 = vld [vmem:[#allocation19 + $0xa8] sm:$0xf] }
 0x8a7   : > { %v5879_v7 = vld [vmem:[#allocation19 + $0x180] sm:$0xf]  ;;  %v5792_v13 = vor.u32 %v6487_v63, %v5791_v62  ;;  %v5873_v62 = vld [vmem:[#allocation19 + $0x178] sm:$0xf0] }
 0x8a8   : > { %v3305_v41 = vadd.f32 %v7784_v38, %v7781_v37  ;;  %v7789_v45 = vadd.f32 %v3271_v35, %v7698_v8  ;;  %3823 = vmatpush.bf16.msra.mxu3 %v5900_v40  ;;  %v5815_v33 = vld [vmem:[#allocation19 + $0x100] sm:$0xf]  ;;  %v5708_v40 = vor.u32 %v6464_v22, %v5705_v23  ;;  %v6483_v23 = vld [vmem:[#allocation19 + $0xb4] sm:$0xf0] }
 0x8aa   : > { %3306 = vadd.xlane.f32.xlu0 %v3305_v41  ;;  %v6510_v41 = vld [vmem:[#allocation19 + $0x18c] sm:$0xf0] }
 0x8ab   : > { %v3298_v43 = vpop.f32.mrf.mxu3 }
 0x8ac   : > { %v3299_v44 = vadd.f32 %v3298_v43, %v3285_v42  ;;  %v6476_v42 = vld [vmem:[#allocation19 + $0x84] sm:$0xf]  ;;  %v5752_v43 = vor.u32 %v6478_v36, %v5751_v61  ;;  %v6494_v61 = vld [vmem:[#allocation19 + $0x10c] sm:$0xf0] }
 0x8ae   : > { %v7792_v59 = vadd.f32 %v3299_v44, %v7701_v1  ;;  %v5753_v44 = vld [vmem:[#allocation19 + $0x90] sm:$0xf0]  ;;  %3782 = vmatpush.bf16.msra.mxu0 %v5752_v43  ;;  %v6492_v43 = vld [vmem:[#allocation19 + $0x104] sm:$0xf] }
 0x8b0   : > { %v3308_v24 = vadd.f32 %v7792_v59, %v7789_v45 }
 0x8b2   : > { %3309 = vadd.xlane.f32.xlu1 %v3308_v24  ;;  %v6508_v24 = vld [vmem:[#allocation19 + $0x184] sm:$0xf] }
 0x91d   : > { %v3307_v46 = vpop.xlane.xlu0 %3306 }
 0x91e   : > { %v3311_v17 = vmul.f32 %v3307_v46, %v7607_v14  ;;  %v5880_v46 = vor.u32 %v6510_v41, %v5879_v7  ;;  %v6460_v7 = vld [vmem:[#allocation19 + $0x4] sm:$0xf]  ;;  %v5689_v41 = vld [vmem:[#allocation19 + $0x10] sm:$0xf0] }
 0x91f   : > { %v5692_v55 = vor.u32 %v6460_v7, %v5689_v41  ;;  %v5759_v7 = vld [vmem:[#allocation19 + $0x88] sm:$0xf] }
 0x920   : > { %v7798_v18 = vsub.f32 %v7781_v37, %v3311_v17  ;;  %v7801_v47 = vsub.f32 %v7784_v38, %v3311_v17  ;;  %v5756_v17 = vor.u32 %v6476_v42, %v5753_v44  ;;  %v5817_v44 = vld [vmem:[#allocation19 + $0x110] sm:$0xf0] }
 0x922   : > { %v3317_v8 = vmul.f32 %v7798_v18, %v7798_v18  ;;  %v3318_v1 = vmul.f32 %v7801_v47, %v7801_v47  ;;  %3810 = vmatpush.bf16.msra.mxu2 %v5756_v17  ;;  %v6491_v17 = vld [vmem:[#allocation19 + $0xf4] sm:$0xf0] }
 0x924   : > { %v3321_v48 = vadd.f32 %v3318_v1, %v3317_v8  ;;  %v5881_v8 = vld [vmem:[#allocation19 + $0x190] sm:$0xf0]  ;;  %v5735_v1 = vld [vmem:[#allocation19 + $0x60] sm:$0xf] }
 0x925   : > { %v3310_v49 = vpop.xlane.xlu1 %3309 }
 0x926   : > { %v3312_v50 = vmul.f32 %v3310_v49, %v7607_v14  ;;  %3322 = vadd.xlane.f32.xlu2 %v3321_v48  ;;  %v6522_v14 = vld [vmem:[#allocation19 + $0x1ec] sm:$0xf0]  ;;  %v5884_v49 = vor.u32 %v6508_v24, %v5881_v8  ;;  %v5807_v24 = vld [vmem:[#allocation19 + $0xe8] sm:$0xf] }
 0x927   : > { %v5928_v58 = vor.u32 %v6522_v14, %v5927_v16  ;;  %v6474_v48 = vld [vmem:[#allocation19 + $0x6c] sm:$0xf0]  ;;  %v5935_v8 = vld [vmem:[#allocation19 + $0x1e8] sm:$0xf]  ;;  %v5808_v19 = vor.u32 %v6491_v17, %v5807_v24  ;;  %v6479_v24 = vld [vmem:[#allocation19 + $0x94] sm:$0xf0] }
 0x928   : > { %v7809_v51 = vsub.f32 %v7789_v45, %v3312_v50  ;;  %v7812_v11 = vsub.f32 %v7792_v59, %v3312_v50  ;;  %v5863_v50 = vld [vmem:[#allocation19 + $0x160] sm:$0xf]  ;;  %v5736_v16 = vor.u32 %v6474_v48, %v5735_v1  ;;  %3824 = vmatpush.bf16.msra.mxu3 %v5884_v49  ;;  %v5688_v48 = vor.u32 %v6462_v32, %v5687_v29  ;;  %v6515_v29 = vld [vmem:[#allocation19 + $0x1b4] sm:$0xf0]  ;;  %v5777_v32 = vld [vmem:[#allocation19 + $0xb8] sm:$0xf0] }
 0x929   : > { %3793 = vmatpush.bf16.msra.mxu1 %v5928_v58  ;;  %v5847_v58 = vld [vmem:[#allocation19 + $0x140] sm:$0xf]  ;;  %v5816_v49 = vor.u32 %v6494_v61, %v5815_v33  ;;  %v6513_v61 = vld [vmem:[#allocation19 + $0x1ac] sm:$0xf]  ;;  %v6511_v17 = vld [vmem:[#allocation19 + $0x194] sm:$0xf0] }
 0x92a   : > { %v3319_v52 = vmul.f32 %v7809_v51, %v7809_v51  ;;  %v3320_v12 = vmul.f32 %v7812_v11, %v7812_v11  ;;  %3783 = vmatpush.bf16.msra.mxu0 %v5736_v16  ;;  %v6521_v16 = vld [vmem:[#allocation19 + $0x1ec] sm:$0xf] }
 0x92c   : > { %v3324_v53 = vadd.f32 %v3320_v12, %v3319_v52  ;;  %v6506_v52 = vld [vmem:[#allocation19 + $0x16c] sm:$0xf0]  ;;  %v6472_v12 = vld [vmem:[#allocation19 + $0x64] sm:$0xf]  ;;  %3825 = vmatpush.bf16.msra.mxu3 %v5868_v60 }
 0x92d   : > { %3794 = vmatpush.bf16.msra.mxu1 %v5912_v5  ;;  %v5864_v56 = vor.u32 %v6506_v52, %v5863_v50  ;;  %v5848_v5 = vor.u32 %v6502_v25, %v5847_v58  ;;  %v6523_v50 = vld [vmem:[#allocation19 + $0x1f4] sm:$0xf0]  ;;  %v6489_v52 = vld [vmem:[#allocation19 + $0xec] sm:$0xf] }
 0x92e   : > { %3325 = vadd.xlane.f32.xlu0 %v3324_v53  ;;  %v5737_v53 = vld [vmem:[#allocation19 + $0x70] sm:$0xf0]  ;;  %3784 = vmatpush.bf16.msra.mxu0 %v5720_v30  ;;  %v5936_v60 = vor.u32 %v6523_v50, %v5935_v8  ;;  %v5793_v30 = vld [vmem:[#allocation19 + $0xd8] sm:$0xf0] }
 0x92f   : > { %v5740_v14 = vor.u32 %v6472_v12, %v5737_v53  ;;  %v5809_v12 = vld [vmem:[#allocation19 + $0xf8] sm:$0xf0] }
 0x930   : > { %3826 = vmatpush.bf16.msra.mxu3 %v5852_v20  ;;  %v5812_v25 = vor.u32 %v6489_v52, %v5809_v12  ;;  %v5889_v50 = vld [vmem:[#allocation19 + $0x198] sm:$0xf0]  ;;  %v5760_v12 = vor.u32 %v6479_v24, %v5759_v7 }
 0x931   : > { %3795 = vmatpush.bf16.msra.mxu1 %v5896_v27  ;;  %3811 = vmatpush.bf16.msra.mxu2 %v5740_v14  ;;  %v6496_v27 = vld [vmem:[#allocation19 + $0x124] sm:$0xf]  ;;  %v5820_v14 = vor.u32 %v6492_v43, %v5817_v44  ;;  %v5713_v7 = vld [vmem:[#allocation19 + $0x38] sm:$0xf0] }
 0x932   : > { %v5836_v42 = vor.u32 %v6496_v27, %v5833_v28  ;;  %3785 = vmatpush.bf16.msra.mxu0 %v5704_v31  ;;  %v6481_v31 = vld [vmem:[#allocation19 + $0xac] sm:$0xf] }
 0x933   : > { %v5780_v44 = vor.u32 %v6481_v31, %v5777_v32  ;;  %v6467_v32 = vld [vmem:[#allocation19 + $0x34] sm:$0xf0] }
 0x934   : > { %3827 = vmatpush.bf16.msra.mxu3 %v5836_v42 }
 0x935   : > { %3796 = vmatpush.bf16.msra.mxu1 %v5880_v46  ;;  %3812 = vmatpush.bf16.msra.mxu2 %v5724_v6  ;;  %v5921_v6 = vld [vmem:[#allocation19 + $0x1d8] sm:$0xf0] }
 0x936   : > { %3786 = vmatpush.bf16.msra.mxu0 %v5688_v48  ;;  %v5761_v48 = vld [vmem:[#allocation19 + $0x98] sm:$0xf0] }
 0x938   : > { %3828 = vmatpush.bf16.msra.mxu3 %v5820_v14  ;;  %v6475_v14 = vld [vmem:[#allocation19 + $0x74] sm:$0xf0] }
 0x939   : > { %3797 = vmatpush.bf16.msra.mxu1 %v5864_v56  ;;  %3813 = vmatpush.bf16.msra.mxu2 %v5708_v40  ;;  %v5937_v56 = vld [vmem:[#allocation19 + $0x1f8] sm:$0xf0]  ;;  %v5776_v40 = vor.u32 %v6483_v23, %v5775_v34  ;;  %v6469_v34 = vld [vmem:[#allocation19 + $0x4c] sm:$0xf] }
 0x93a   : > { %v5940_v3 = vor.u32 %v6521_v16, %v5937_v56  ;;  %3835 = vmatpush.bf16.msrb.mxu0 %v5808_v19  ;;  %v5871_v19 = vld [vmem:[#allocation19 + $0x168] sm:$0xf] }
 0x93c   : > { %3877 = vmatpush.bf16.msrb.mxu3 %v5940_v3 }
 0x93d   : > { %3798 = vmatpush.bf16.msra.mxu1 %v5848_v5  ;;  %3814 = vmatpush.bf16.msra.mxu2 %v5692_v55  ;;  %v6517_v5 = vld [vmem:[#allocation19 + $0x1cc] sm:$0xf] }
 0x93e   : > { %v5924_v28 = vor.u32 %v6517_v5, %v5921_v6  ;;  %3836 = vmatpush.bf16.msrb.mxu0 %v5792_v13  ;;  %v5855_v5 = vld [vmem:[#allocation19 + $0x148] sm:$0xf]  ;;  %v6503_v13 = vld [vmem:[#allocation19 + $0x154] sm:$0xf0] }
 0x940   : > { %3878 = vmatpush.bf16.msrb.mxu3 %v5924_v28 }
 0x941   : > { %3863 = vmatpush.bf16.msrb.mxu2 %v5812_v25  ;;  %v5745_v25 = vld [vmem:[#allocation19 + $0x78] sm:$0xf0] }
 0x942   : > { %3837 = vmatpush.bf16.msrb.mxu0 %v5776_v40  ;;  %v6465_v40 = vld [vmem:[#allocation19 + $0x2c] sm:$0xf] }
 0x946   : > { %3838 = vmatpush.bf16.msrb.mxu0 %v5760_v12 }
 0x999   : > { %v3323_v39 = vpop.xlane.xlu2 %3322 }
 0x99a   : > { %v7818_v35 = vmul.f32 0.003921569, %v3323_v39  ;;  %v5832_v39 = vor.u32 %v6498_v21, %v5831_v15 }
 0x99c   : > { %6800 = vrsqrt.f32 %v7818_v35  ;;  %3799 = vmatpush.bf16.msra.mxu1 %v5832_v39  ;;  %vm3336_vm8 = vcmp.eq.f32.partialorder %v7818_v35, inf  ;;  %vm3338_vm9 = vcmp.eq.f32.partialorder %v7818_v35, 0.0  ;;  %v3339_v27 = vand.u32 2147483648, %v7818_v35 }
 0x9a0   : > { %3800 = vmatpush.bf16.msra.mxu1 %v5816_v49  ;;  %v6509_v49 = vld [vmem:[#allocation19 + $0x18c] sm:$0xf] }
 0x9a1   : > { %v3326_v0 = vpop.xlane.xlu0 %3325 }
 0x9a2   : > { %v6801_v2 = vpop.eup %6800  ;;  %v7821_v9 = vmul.f32 0.003921569, %v3326_v0  ;;  %v5919_v0 = vld [vmem:[#allocation19 + $0x1c8] sm:$0xf] }
 0x9a3   : > { %v3330_v10 = vmul.f32 %v6801_v2, %v7818_v35  ;;  %v5920_v21 = vor.u32 %v6519_v4, %v5919_v0 }
 0x9a4   : > { %6802 = vrsqrt.f32 %v7821_v9  ;;  %3849 = vmatpush.bf16.msrb.mxu1 %v5936_v60  ;;  %vm3348_vm10 = vcmp.eq.f32.partialorder %v7821_v9, inf  ;;  %vm3350_vm11 = vcmp.eq.f32.partialorder %v7821_v9, 0.0  ;;  %v6473_v60 = vld [vmem:[#allocation19 + $0x6c] sm:$0xf] }
 0x9a5   : > { %v3331_v26 = vmul.f32 %v6801_v2, %v3330_v10 }
 0x9a7   : > { %v3332_v36 = vmul.f32 0.5, %v3331_v26  ;;  %v5903_v26 = vld [vmem:[#allocation19 + $0x1a8] sm:$0xf] }
 0x9a8   : > { %3850 = vmatpush.bf16.msrb.mxu1 %v5920_v21  ;;  %v5904_v43 = vor.u32 %v6515_v29, %v5903_v26  ;;  %v6501_v21 = vld [vmem:[#allocation19 + $0x14c] sm:$0xf]  ;;  %v5711_v26 = vld [vmem:[#allocation19 + $0x28] sm:$0xf]  ;;  %v5856_v29 = vor.u32 %v6503_v13, %v5855_v5 }
 0x9a9   : > { %v3333_v46 = vsub.f32 1.5, %v3332_v36  ;;  %v5905_v36 = vld [vmem:[#allocation19 + $0x1b8] sm:$0xf0] }
 0x9aa   : > { %v6803_v1 = vpop.eup %6802  ;;  %v5908_v8 = vor.u32 %v6513_v61, %v5905_v36 }
 0x9ab   : > { %v3334_v53 = vmul.f32 %v6801_v2, %v3333_v46  ;;  %v3342_v54 = vmul.f32 %v6803_v1, %v7821_v9  ;;  %v6485_v2 = vld [vmem:[#allocation19 + $0xcc] sm:$0xf]  ;;  %v5887_v46 = vld [vmem:[#allocation19 + $0x188] sm:$0xf] }
 0x9ac   : > { %v5796_v22 = vor.u32 %v6485_v2, %v5793_v30  ;;  %3851 = vmatpush.bf16.msrb.mxu1 %v5904_v43  ;;  %v5888_v55 = vor.u32 %v6511_v17, %v5887_v46  ;;  %3879 = vmatpush.bf16.msrb.mxu3 %v5908_v8  ;;  %v5748_v2 = vor.u32 %v6473_v60, %v5745_v25  ;;  %v5727_v30 = vld [vmem:[#allocation19 + $0x48] sm:$0xf]  ;;  %v6497_v43 = vld [vmem:[#allocation19 + $0x12c] sm:$0xf] }
 0x9ad   : > { %v3335_v57 = vmul.f32 %v3334_v53, %v7818_v35  ;;  %v3343_v58 = vmul.f32 %v6803_v1, %v3342_v54  ;;  %v5743_v54 = vld [vmem:[#allocation19 + $0x68] sm:$0xf]  ;;  %v5712_v46 = vor.u32 %v6467_v32, %v5711_v26  ;;  %v6055_v26 = vld [vmem:[#allocation20 + $0xe0] sm:$0xf] }
 0x9ae   : > { %3864 = vmatpush.bf16.msrb.mxu2 %v5796_v22  ;;  %v5744_v0 = vor.u32 %v6475_v14, %v5743_v54  ;;  %v5857_v22 = vld [vmem:[#allocation19 + $0x158] sm:$0xf0]  ;;  %v5695_v17 = vld [vmem:[#allocation19 + $0x8] sm:$0xf] }
 0x9af   : > { %v3344_v10 = vmul.f32 0.5, %v3343_v58  ;;  %v3337_v15 = vsel %vm3336_vm8, %v7818_v35, %v3335_v57  ;;  %v3351_v35 = vand.u32 2147483648, %v7821_v9  ;;  %v5892_v57 = vor.u32 %v6509_v49, %v5889_v50  ;;  %v6507_v58 = vld [vmem:[#allocation19 + $0x174] sm:$0xf0]  ;;  %v5823_v49 = vld [vmem:[#allocation19 + $0x108] sm:$0xf] }
 0x9b0   : > { %v3340_v39 = vsel %vm3338_vm9, %v3339_v27, %v3337_v15  ;;  %3852 = vmatpush.bf16.msrb.mxu1 %v5888_v55  ;;  %v5872_v4 = vor.u32 %v6507_v58, %v5871_v19  ;;  %v5729_v15 = vld [vmem:[#allocation19 + $0x58] sm:$0xf0]  ;;  %3839 = vmatpush.bf16.msrb.mxu0 %v5744_v0  ;;  %v5860_v36 = vor.u32 %v6501_v21, %v5857_v22  ;;  %v6495_v50 = vld [vmem:[#allocation19 + $0x114] sm:$0xf0]  ;;  %v5999_v0 = vld [vmem:[#allocation20 + $0x70] sm:$0xf] }
 0x9b1   : > { %v3345_v20 = vsub.f32 1.5, %v3344_v10  ;;  %v7833_v41 = vadd.f32 1e-06, %v3340_v39  ;;  %v6471_v10 = vld [vmem:[#allocation19 + $0x54] sm:$0xf0]  ;;  %3880 = vmatpush.bf16.msrb.mxu3 %v5892_v57  ;;  %v5732_v31 = vor.u32 %v6469_v34, %v5729_v15  ;;  %v5824_v57 = vor.u32 %v6495_v50, %v5823_v49 }
 0x9b2   : > { %3865 = vmatpush.bf16.msrb.mxu2 %v5780_v44  ;;  %v5728_v23 = vor.u32 %v6471_v10, %v5727_v30  ;;  %v6499_v39 = vld [vmem:[#allocation19 + $0x134] sm:$0xf0]  ;;  %v5841_v44 = vld [vmem:[#allocation19 + $0x138] sm:$0xf0]  ;;  %v6191_v34 = vld [vmem:[#allocation20 + $0x1f0] sm:$0xf] }
 0x9b3   : > { %v3346_v33 = vmul.f32 %v6803_v1, %v3345_v20  ;;  %v6477_v1 = vld [vmem:[#allocation19 + $0x8c] sm:$0xf]  ;;  %6804 = vrsqrt.f32 %v7833_v41  ;;  %vm3361_vm13 = vweird.f32 %v7833_v41  ;;  %v5844_v12 = vor.u32 %v6497_v43, %v5841_v44  ;;  %v5697_v54 = vld [vmem:[#allocation19 + $0x18] sm:$0xf0]  ;;  %v6555_v30 = vld [vmem:[#allocation20 + $0xf4] sm:$0xf0] }
 0x9b4   : > { %v5764_v16 = vor.u32 %v6477_v1, %v5761_v48  ;;  %3853 = vmatpush.bf16.msrb.mxu1 %v5872_v4  ;;  %3840 = vmatpush.bf16.msrb.mxu0 %v5728_v23  ;;  %v5716_v48 = vor.u32 %v6465_v40, %v5713_v7  ;;  %v5825_v14 = vld [vmem:[#allocation19 + $0x118] sm:$0xf0]  ;;  %v6587_v15 = vld [vmem:[#allocation20 + $0x1f4] sm:$0xf0]  ;;  %v6537_v23 = vld [vmem:[#allocation20 + $0x64] sm:$0xf0] }
 0x9b5   : > { %v3347_v42 = vmul.f32 %v3346_v33, %v7821_v9  ;;  %v5839_v33 = vld [vmem:[#allocation19 + $0x128] sm:$0xf]  ;;  %v6535_v7 = vld [vmem:[#allocation20 + $0x54] sm:$0xf0]  ;;  %v6039_v49 = vld [vmem:[#allocation20 + $0xc0] sm:$0xf] }
 0x9b6   : > { %3866 = vmatpush.bf16.msrb.mxu2 %v5764_v16  ;;  %v5840_v1 = vor.u32 %v6499_v39, %v5839_v33  ;;  %v6493_v16 = vld [vmem:[#allocation19 + $0x10c] sm:$0xf]  ;;  %v6569_v32 = vld [vmem:[#allocation20 + $0x164] sm:$0xf0]  ;;  %v6183_v33 = vld [vmem:[#allocation20 + $0x1e0] sm:$0xf] }
 0x9b7   : > { %v3349_v52 = vsel %vm3348_vm10, %v7821_v9, %v3347_v42  ;;  %v6505_v9 = vld [vmem:[#allocation19 + $0x16c] sm:$0xf]  ;;  %v5983_v39 = vld [vmem:[#allocation20 + $0x50] sm:$0xf]  ;;  %v6551_v43 = vld [vmem:[#allocation20 + $0xd4] sm:$0xf0] }
 0x9b8   : > { %v3352_v53 = vsel %vm3350_vm11, %v3351_v35, %v3349_v52  ;;  %v5876_v6 = vor.u32 %v6505_v9, %v5873_v62  ;;  %3854 = vmatpush.bf16.msrb.mxu1 %v5856_v29  ;;  %v6463_v35 = vld [vmem:[#allocation19 + $0x14] sm:$0xf0]  ;;  %3841 = vmatpush.bf16.msrb.mxu0 %v5712_v46  ;;  %v5828_v62 = vor.u32 %v6493_v16, %v5825_v14  ;;  %v6119_v29 = vld [vmem:[#allocation20 + $0x160] sm:$0xf]  ;;  %v6111_v46 = vld [vmem:[#allocation20 + $0x150] sm:$0xf] }
 0x9b9   : > { %v7841_v56 = vadd.f32 1e-06, %v3352_v53  ;;  %v6805_v63 = vpop.eup %6804  ;;  %v6461_v53 = vld [vmem:[#allocation19 + $0xc] sm:$0xf]  ;;  %v6120_v44 = vor.u32 %v6569_v32, %v6119_v29  ;;  %v6549_v50 = vld [vmem:[#allocation20 + $0xc4] sm:$0xf0] }
 0x9ba   : > { %v3356_v3 = vmul.f32 %v6805_v63, %v7833_v41  ;;  %3867 = vmatpush.bf16.msrb.mxu2 %v5748_v2  ;;  %3881 = vmatpush.bf16.msrb.mxu3 %v5876_v6  ;;  %vm3362_vm12 = vweird.f32 %v6805_v63  ;;  %v5696_v41 = vor.u32 %v6463_v35, %v5695_v17  ;;  %v5700_v58 = vor.u32 %v6461_v53, %v5697_v54  ;;  %v6063_v2 = vld [vmem:[#allocation20 + $0xf0] sm:$0xf]  ;;  %v6567_v17 = vld [vmem:[#allocation20 + $0x154] sm:$0xf0]  ;;  %v6533_v35 = vld [vmem:[#allocation20 + $0x44] sm:$0xf0] }
 0x9bb   : > { %6806 = vrsqrt.f32 %v7841_v56  ;;  %vm3363_vm14 = vmor %vm3361_vm13, %vm3362_vm12  ;;  %vm3371_vm0 = vweird.f32 %v7841_v56  ;;  %v5967_v53 = vld [vmem:[#allocation20 + $0x30] sm:$0xf]  ;;  %v6040_v54 = vor.u32 %v6549_v50, %v6039_v49  ;;  %v6547_v14 = vld [vmem:[#allocation20 + $0xb4] sm:$0xf0] }
 0x9bc   : > { %v3357_v20 = vmul.f32 %v6805_v63, %v3356_v3  ;;  %3855 = vmatpush.bf16.msrb.mxu1 %v5840_v1  ;;  %3842 = vmatpush.bf16.msrb.mxu0 %v5696_v41  ;;  %v5975_v1 = vld [vmem:[#allocation20 + $0x40] sm:$0xf]  ;;  %v6031_v16 = vld [vmem:[#allocation20 + $0xb0] sm:$0xf]  ;;  %v6057_v49 = vld [vmem:[#allocation20 + $0xe8] sm:$0xf0] }
 0x9bd   : > { %v5959_v41 = vld [vmem:[#allocation20 + $0x20] sm:$0xf]  ;;  %v6079_v50 = vld [vmem:[#allocation20 + $0x110] sm:$0xf] }
 0x9be   : > { %v3358_v28 = vmul.f32 0.5, %v3357_v20  ;;  %3868 = vmatpush.bf16.msrb.mxu2 %v5732_v31  ;;  %3882 = vmatpush.bf16.msrb.mxu3 %v5860_v36  ;;  %v6192_v31 = vor.u32 %v6587_v15, %v6191_v34  ;;  %v6543_v34 = vld [vmem:[#allocation20 + $0x94] sm:$0xf0]  ;;  %v6175_v15 = vld [vmem:[#allocation20 + $0x1d0] sm:$0xf] }
 0x9bf   : > { %v6167_v32 = vld [vmem:[#allocation20 + $0x1c0] sm:$0xf] }
 0x9c0   : > { %v3359_v42 = vsub.f32 1.5, %v3358_v28  ;;  %3856 = vmatpush.bf16.msrb.mxu1 %v5824_v57  ;;  %v6032_v57 = vor.u32 %v6547_v14, %v6031_v16  ;;  %v6151_v16 = vld [vmem:[#allocation20 + $0x1a0] sm:$0xf] }
 0x9c1   : > { %v6807_v27 = vpop.eup %6806 }
 0x9c2   : > { %v3366_v61 = vmul.f32 %v6807_v27, %v7841_v56  ;;  %v3360_v8 = vmul.f32 %v6805_v63, %v3359_v42  ;;  %vm3372_vm15 = vweird.f32 %v6807_v27  ;;  %3869 = vmatpush.bf16.msrb.mxu2 %v5716_v48  ;;  %3883 = vmatpush.bf16.msrb.mxu3 %v5844_v12  ;;  %v6539_v56 = vld [vmem:[#allocation20 + $0x74] sm:$0xf0]  ;;  %v6047_v42 = vld [vmem:[#allocation20 + $0xd0] sm:$0xf]  ;;  %v5976_v12 = vor.u32 %v6533_v35, %v5975_v1 }
 0x9c3   : > { %vm3373_vm1 = vmor %vm3371_vm0, %vm3372_vm15  ;;  %v6000_v22 = vor.u32 %v6539_v56, %v5999_v0  ;;  %v6048_v48 = vor.u32 %v6551_v43, %v6047_v42  ;;  %v6527_v0 = vld [vmem:[#allocation20 + $0x14] sm:$0xf0]  ;;  %v6525_v56 = vld [vmem:[#allocation20 + $0x4] sm:$0xf0] }
 0x9c4   : > { %v3367_v24 = vmul.f32 %v6807_v27, %v3366_v61  ;;  %v3364_v55 = vsel %vm3363_vm14, %v6805_v63, %v3360_v8  ;;  %v6585_v61 = vld [vmem:[#allocation20 + $0x1e4] sm:$0xf0]  ;;  %v5984_v8 = vor.u32 %v6535_v7, %v5983_v39  ;;  %v6554_v39 = vld [vmem:[#allocation20 + $0xf4] sm:$0xf]  ;;  %v6087_v7 = vld [vmem:[#allocation20 + $0x120] sm:$0xf] }
 0x9c5   : > { %v3375_v25 = vmul.f32 %v3364_v55, %v7798_v18  ;;  %v3376_v9 = vmul.f32 %v3364_v55, %v7801_v47  ;;  %v6127_v18 = vld [vmem:[#allocation20 + $0x170] sm:$0xf]  ;;  %v6571_v47 = vld [vmem:[#allocation20 + $0x174] sm:$0xf0]  ;;  %v6561_v43 = vld [vmem:[#allocation20 + $0x124] sm:$0xf0] }
 0x9c6   : > { %v3368_v52 = vmul.f32 0.5, %v3367_v24  ;;  %3870 = vmatpush.bf16.msrb.mxu2 %v5700_v58  ;;  %3884 = vmatpush.bf16.msrb.mxu3 %v5828_v62  ;;  %v6128_v28 = vor.u32 %v6571_v47, %v6127_v18  ;;  %v6184_v24 = vor.u32 %v6585_v61, %v6183_v33  ;;  %v6531_v55 = vld [vmem:[#allocation20 + $0x34] sm:$0xf0]  ;;  %v6529_v58 = vld [vmem:[#allocation20 + $0x24] sm:$0xf0] }
 0x9c7   : > { %v3379_v10 = vadd.f32 1.0, %v3375_v25  ;;  %v3380_v5 = vadd.f32 1.0, %v3376_v9  ;;  %v6545_v25 = vld [vmem:[#allocation20 + $0xa4] sm:$0xf0]  ;;  %v5960_v9 = vor.u32 %v6529_v58, %v5959_v41  ;;  %v6001_v18 = vld [vmem:[#allocation20 + $0x78] sm:$0xf0] }
 0x9c8   : > { %v3369_v19 = vsub.f32 1.5, %v3368_v52  ;;  %v6112_v52 = vor.u32 %v6567_v17, %v6111_v46  ;;  %v6581_v33 = vld [vmem:[#allocation20 + $0x1c4] sm:$0xf0]  ;;  %v6088_v46 = vor.u32 %v6561_v43, %v6087_v7  ;;  %v6579_v1 = vld [vmem:[#allocation20 + $0x1b4] sm:$0xf0] }
 0x9c9   : > { %v6550_v41 = vld [vmem:[#allocation20 + $0xd4] sm:$0xf]  ;;  %v6049_v58 = vld [vmem:[#allocation20 + $0xd8] sm:$0xf0] }
 0x9ca   : > { %v3370_v60 = vmul.f32 %v6807_v27, %v3369_v19  ;;  %v5968_v19 = vor.u32 %v6531_v55, %v5967_v53  ;;  %v5977_v55 = vld [vmem:[#allocation20 + $0x48] sm:$0xf0]  ;;  %v6566_v43 = vld [vmem:[#allocation20 + $0x154] sm:$0xf] }
 0x9cc   : > { %v3374_v63 = vsel %vm3373_vm1, %v6807_v27, %v3370_v60  ;;  %v6553_v27 = vld [vmem:[#allocation20 + $0xe4] sm:$0xf0]  ;;  %v6023_v60 = vld [vmem:[#allocation20 + $0xa0] sm:$0xf] }
 0x9cd   : > { %v3377_v3 = vmul.f32 %v3374_v63, %v7809_v51  ;;  %v3378_v4 = vmul.f32 %v3374_v63, %v7812_v11  ;;  %v5991_v51 = vld [vmem:[#allocation20 + $0x60] sm:$0xf]  ;;  %v6064_v11 = vor.u32 %v6555_v30, %v6063_v2  ;;  %v6056_v40 = vor.u32 %v6553_v27, %v6055_v26  ;;  %v5951_v63 = vld [vmem:[#allocation20 + $0x10] sm:$0xf]  ;;  %v6536_v26 = vld [vmem:[#allocation20 + $0x64] sm:$0xf] }
 0x9ce   : > { %v5992_v36 = vor.u32 %v6537_v23, %v5991_v51  ;;  %v6024_v62 = vor.u32 %v6545_v25, %v6023_v60  ;;  %v6103_v2 = vld [vmem:[#allocation20 + $0x140] sm:$0xf]  ;;  %v6563_v51 = vld [vmem:[#allocation20 + $0x134] sm:$0xf0]  ;;  %v5993_v27 = vld [vmem:[#allocation20 + $0x68] sm:$0xf0] }
 0x9cf   : > { %v3381_v6 = vadd.f32 1.0, %v3377_v3  ;;  %v3382_v13 = vadd.f32 1.0, %v3378_v4  ;;  %v5952_v3 = vor.u32 %v6527_v0, %v5951_v63  ;;  %v5943_v4 = vld [vmem:[#allocation20] sm:$0xf]  ;;  %v5996_v29 = vor.u32 %v6536_v26, %v5993_v27  ;;  %v6557_v25 = vld [vmem:[#allocation20 + $0x104] sm:$0xf0] }
 0x9d0   : > { %v5944_v30 = vor.u32 %v6525_v56, %v5943_v4  ;;  %v6071_v60 = vld [vmem:[#allocation20 + $0x100] sm:$0xf]  ;;  %v6530_v63 = vld [vmem:[#allocation20 + $0x34] sm:$0xf]  ;;  %v5969_v0 = vld [vmem:[#allocation20 + $0x38] sm:$0xf0] }
 0x9d1   : > { %v3383_v20 = vpack.c.bf16 %v3381_v6, %v3379_v10  ;;  %v3384_v21 = vpack.c.bf16 %v3382_v13, %v3380_v5  ;;  %v6565_v10 = vld [vmem:[#allocation20 + $0x144] sm:$0xf0]  ;;  %v6538_v5 = vld [vmem:[#allocation20 + $0x74] sm:$0xf]  ;;  %v6015_v13 = vld [vmem:[#allocation20 + $0x90] sm:$0xf]  ;;  %v5972_v4 = vor.u32 %v6530_v63, %v5969_v0 }
 0x9d2   : > { %v6104_v47 = vor.u32 %v6565_v10, %v6103_v2  ;;  %v6004_v6 = vor.u32 %v6538_v5, %v6001_v18  ;;  %v6129_v56 = vld [vmem:[#allocation20 + $0x178] sm:$0xf0]  ;;  %v6143_v2 = vld [vmem:[#allocation20 + $0x190] sm:$0xf]  ;;  %v7856_v10 = vld [vmem:[%s7969_s9] sm:$0xf] }
 0x9d3   : > { %3787 = vmatmul.bf16.vlgmr.msra.gmra.mxu0 %v3383_v20  ;;  %3801 = vmatmul.bf16.vlgmr.msra.gmra.mxu1 %v3384_v21  ;;  %v6562_v63 = vld [vmem:[#allocation20 + $0x134] sm:$0xf] }
 0x9d4   : > { %3815 = vmatmul.bf16.vlgmr.msra.gmra.mxu2 %v3383_v20  ;;  %3829 = vmatmul.bf16.vlgmr.msra.gmra.mxu3 %v3384_v21 }
 0x9d5   : > { %4287 = vmatpush.bf16.msra.mxu0 %v6000_v22  ;;  %4301 = vmatpush.bf16.msra.mxu1 %v6064_v11  ;;  %v6095_v22 = vld [vmem:[#allocation20 + $0x130] sm:$0xf] }
 0x9d6   : > { %4315 = vmatpush.bf16.msra.mxu2 %v6128_v28  ;;  %4329 = vmatpush.bf16.msra.mxu3 %v6192_v31  ;;  %v6096_v11 = vor.u32 %v6563_v51, %v6095_v22  ;;  %v6007_v28 = vld [vmem:[#allocation20 + $0x80] sm:$0xf]  ;;  %v6541_v31 = vld [vmem:[#allocation20 + $0x84] sm:$0xf0]  ;;  %v6121_v22 = vld [vmem:[#allocation20 + $0x168] sm:$0xf0] }
 0x9d7   : > { %v6008_v61 = vor.u32 %v6541_v31, %v6007_v28  ;;  %v6135_v51 = vld [vmem:[#allocation20 + $0x180] sm:$0xf]  ;;  %v6546_v28 = vld [vmem:[#allocation20 + $0xb4] sm:$0xf] }
 0x9d8   : > { %v6586_v31 = vld [vmem:[#allocation20 + $0x1f4] sm:$0xf] }
 0x9d9   : > { %4288 = vmatpush.bf16.msra.mxu0 %v5992_v36  ;;  %4302 = vmatpush.bf16.msra.mxu1 %v6056_v40  ;;  %v6168_v36 = vor.u32 %v6581_v33, %v6167_v32  ;;  %v6065_v40 = vld [vmem:[#allocation20 + $0xf8] sm:$0xf0] }
 0x9da   : > { %4316 = vmatpush.bf16.msra.mxu2 %v6120_v44  ;;  %4330 = vmatpush.bf16.msra.mxu3 %v6184_v24  ;;  %v6068_v42 = vor.u32 %v6554_v39, %v6065_v40  ;;  %v6534_v44 = vld [vmem:[#allocation20 + $0x54] sm:$0xf]  ;;  %v5985_v24 = vld [vmem:[#allocation20 + $0x58] sm:$0xf0] }
 0x9db   : > { %v5988_v17 = vor.u32 %v6534_v44, %v5985_v24  ;;  %v6526_v39 = vld [vmem:[#allocation20 + $0x14] sm:$0xf]  ;;  %v5953_v40 = vld [vmem:[#allocation20 + $0x18] sm:$0xf0]  ;;  %v6544_v24 = vld [vmem:[#allocation20 + $0xa4] sm:$0xf] }
 0x9dc   : > { %v6113_v44 = vld [vmem:[#allocation20 + $0x158] sm:$0xf0] }
 0x9dd   : > { %4289 = vmatpush.bf16.msra.mxu0 %v5984_v8  ;;  %4303 = vmatpush.bf16.msra.mxu1 %v6048_v48  ;;  %v6159_v8 = vld [vmem:[#allocation20 + $0x1b0] sm:$0xf]  ;;  %v6552_v48 = vld [vmem:[#allocation20 + $0xe4] sm:$0xf] }
 0x9de   : > { %4317 = vmatpush.bf16.msra.mxu2 %v6112_v52  ;;  %v6160_v35 = vor.u32 %v6579_v1, %v6159_v8  ;;  %v6559_v52 = vld [vmem:[#allocation20 + $0x114] sm:$0xf0]  ;;  %v6584_v8 = vld [vmem:[#allocation20 + $0x1e4] sm:$0xf]  ;;  %v6185_v1 = vld [vmem:[#allocation20 + $0x1e8] sm:$0xf0] }
 0x9df   : > { %v6080_v53 = vor.u32 %v6559_v52, %v6079_v50  ;;  %v3452_v50 = vperm.slane %v7856_v10, 1  ;;  %v6524_v52 = vld [vmem:[#allocation20 + $0x4] sm:$0xf] }
 0x9e1   : > { %4290 = vmatpush.bf16.msra.mxu0 %v5976_v12  ;;  %4304 = vmatpush.bf16.msra.mxu1 %v6040_v54  ;;  %v6060_v12 = vor.u32 %v6552_v48, %v6057_v49  ;;  %v6532_v54 = vld [vmem:[#allocation20 + $0x44] sm:$0xf] }
 0x9e2   : > { %4318 = vmatpush.bf16.msra.mxu2 %v6104_v47  ;;  %v5980_v14 = vor.u32 %v6532_v54, %v5977_v55  ;;  %v6548_v47 = vld [vmem:[#allocation20 + $0xc4] sm:$0xf] }
 0x9e3   : > { %3843 = vmatmul.bf16.vlgmr.msrb.gmra.mxu0 %v3383_v20  ;;  %3857 = vmatmul.bf16.vlgmr.msrb.gmra.mxu1 %v3384_v21 }
 0x9e4   : > { %3871 = vmatmul.bf16.vlgmr.msrb.gmra.mxu2 %v3383_v20  ;;  %3885 = vmatmul.bf16.vlgmr.msrb.gmra.mxu3 %v3384_v21  ;;  %v6016_v20 = vor.u32 %v6543_v34, %v6015_v13  ;;  %v6583_v21 = vld [vmem:[#allocation20 + $0x1d4] sm:$0xf0]  ;;  %v6528_v34 = vld [vmem:[#allocation20 + $0x24] sm:$0xf] }
 0x9e5   : > { %4291 = vmatpush.bf16.msra.mxu0 %v5968_v19  ;;  %4305 = vmatpush.bf16.msra.mxu1 %v6032_v57  ;;  %v6176_v23 = vor.u32 %v6583_v21, %v6175_v15  ;;  %v6577_v19 = vld [vmem:[#allocation20 + $0x1a4] sm:$0xf0]  ;;  %v5961_v15 = vld [vmem:[#allocation20 + $0x28] sm:$0xf0] }
 0x9e6   : > { %4319 = vmatpush.bf16.msra.mxu2 %v6096_v11  ;;  %v6152_v57 = vor.u32 %v6577_v19, %v6151_v16  ;;  %v5964_v21 = vor.u32 %v6528_v34, %v5961_v15  ;;  %v3451_v11 = vperm.slane %v7856_v10, 0  ;;  %v6542_v19 = vld [vmem:[#allocation20 + $0x94] sm:$0xf]  ;;  %v6560_v15 = vld [vmem:[#allocation20 + $0x124] sm:$0xf] }
 0x9e7   : > { %4331 = vmatpush.bf16.msra.mxu3 %v6176_v23  ;;  %v6573_v23 = vld [vmem:[#allocation20 + $0x184] sm:$0xf0] }
 0x9e8   : > { %v6136_v27 = vor.u32 %v6573_v23, %v6135_v51  ;;  %v6161_v51 = vld [vmem:[#allocation20 + $0x1b8] sm:$0xf0] }
 0x9e9   : > { %4292 = vmatpush.bf16.msra.mxu0 %v5960_v9  ;;  %4306 = vmatpush.bf16.msra.mxu1 %v6024_v62  ;;  %v6052_v9 = vor.u32 %v6550_v41, %v6049_v58  ;;  %v6072_v62 = vor.u32 %v6557_v25, %v6071_v60  ;;  %v6017_v41 = vld [vmem:[#allocation20 + $0x98] sm:$0xf0] }
 0x9ea   : > { %4320 = vmatpush.bf16.msra.mxu2 %v6088_v46  ;;  %v6116_v46 = vor.u32 %v6566_v43, %v6113_v44  ;;  %v6020_v25 = vor.u32 %v6542_v19, %v6017_v41  ;;  %v3453_v43 = vperm.slane %v7856_v10, 2  ;;  %v6572_v19 = vld [vmem:[#allocation20 + $0x184] sm:$0xf]  ;;  %v6137_v41 = vld [vmem:[#allocation20 + $0x188] sm:$0xf0] }
 0x9eb   : > { %4332 = vmatpush.bf16.msra.mxu3 %v6168_v36  ;;  %v6193_v36 = vld [vmem:[#allocation20 + $0x1f8] sm:$0xf0] }
 0x9ec   : > { %v6196_v7 = vor.u32 %v6586_v31, %v6193_v36 }
 0x9ed   : > { %4293 = vmatpush.bf16.msra.mxu0 %v5952_v3  ;;  %4307 = vmatpush.bf16.msra.mxu1 %v6016_v20  ;;  %v6570_v3 = vld [vmem:[#allocation20 + $0x174] sm:$0xf]  ;;  %v6568_v20 = vld [vmem:[#allocation20 + $0x164] sm:$0xf] }
 0x9ee   : > { %4321 = vmatpush.bf16.msra.mxu2 %v6080_v53  ;;  %v6132_v5 = vor.u32 %v6570_v3, %v6129_v56  ;;  %v6124_v26 = vor.u32 %v6568_v20, %v6121_v22  ;;  %v6564_v53 = vld [vmem:[#allocation20 + $0x144] sm:$0xf]  ;;  %v6097_v56 = vld [vmem:[#allocation20 + $0x138] sm:$0xf0]  ;;  %v6089_v20 = vld [vmem:[#allocation20 + $0x128] sm:$0xf0] }
 0x9ef   : > { %4333 = vmatpush.bf16.msra.mxu3 %v6160_v35  ;;  %v6188_v35 = vor.u32 %v6584_v8, %v6185_v1  ;;  %v6578_v22 = vld [vmem:[#allocation20 + $0x1b4] sm:$0xf]  ;;  %v6073_v8 = vld [vmem:[#allocation20 + $0x108] sm:$0xf0] }
 0x9f0   : > { %v6164_v31 = vor.u32 %v6578_v22, %v6161_v51 }
 0x9f1   : > { %4294 = vmatpush.bf16.msra.mxu0 %v5944_v30  ;;  %4308 = vmatpush.bf16.msra.mxu1 %v6008_v61  ;;  %v6575_v30 = vld [vmem:[#allocation20 + $0x194] sm:$0xf0] }
 0x9f2   : > { %4322 = vmatpush.bf16.msra.mxu2 %v6072_v62  ;;  %v6144_v18 = vor.u32 %v6575_v30, %v6143_v2  ;;  %v6177_v62 = vld [vmem:[#allocation20 + $0x1d8] sm:$0xf0]  ;;  %v6540_v2 = vld [vmem:[#allocation20 + $0x84] sm:$0xf]  ;;  %v6009_v30 = vld [vmem:[#allocation20 + $0x88] sm:$0xf0] }
 0x9f3   : > { %4334 = vmatpush.bf16.msra.mxu3 %v6152_v57 }
 0x9f5   : > { %4343 = vmatpush.bf16.msrb.mxu0 %v6004_v6  ;;  %4357 = vmatpush.bf16.msrb.mxu1 %v6068_v42  ;;  %v6041_v6 = vld [vmem:[#allocation20 + $0xc8] sm:$0xf0]  ;;  %v5956_v42 = vor.u32 %v6526_v39, %v5953_v40 }
 0x9f6   : > { %v6044_v13 = vor.u32 %v6548_v47, %v6041_v6  ;;  %4371 = vmatpush.bf16.msrb.mxu2 %v6132_v5  ;;  %v6100_v5 = vor.u32 %v6562_v63, %v6097_v56  ;;  %v6169_v47 = vld [vmem:[#allocation20 + $0x1c8] sm:$0xf0] }
 0x9f7   : > { %4335 = vmatpush.bf16.msra.mxu3 %v6144_v18  ;;  %v6580_v18 = vld [vmem:[#allocation20 + $0x1c4] sm:$0xf] }
 0x9f8   : > { %v6172_v34 = vor.u32 %v6580_v18, %v6169_v47 }
 0x9f9   : > { %4344 = vmatpush.bf16.msrb.mxu0 %v5996_v29  ;;  %4358 = vmatpush.bf16.msrb.mxu1 %v6060_v12  ;;  %v6033_v29 = vld [vmem:[#allocation20 + $0xb8] sm:$0xf0]  ;;  %v5945_v12 = vld [vmem:[#allocation20 + $0x8] sm:$0xf0] }
 0x9fa   : > { %v6036_v61 = vor.u32 %v6546_v28, %v6033_v29  ;;  %4372 = vmatpush.bf16.msrb.mxu2 %v6124_v26  ;;  %v5948_v16 = vor.u32 %v6524_v52, %v5945_v12  ;;  %v6092_v26 = vor.u32 %v6560_v15, %v6089_v20 }
 0x9fb   : > { %4336 = vmatpush.bf16.msra.mxu3 %v6136_v27 }
 0x9fd   : > { %4345 = vmatpush.bf16.msrb.mxu0 %v5988_v17  ;;  %4359 = vmatpush.bf16.msrb.mxu1 %v6052_v9  ;;  %v6025_v17 = vld [vmem:[#allocation20 + $0xa8] sm:$0xf0]  ;;  %v6582_v9 = vld [vmem:[#allocation20 + $0x1d4] sm:$0xf] }
 0x9fe   : > { %v6028_v48 = vor.u32 %v6544_v24, %v6025_v17  ;;  %4373 = vmatpush.bf16.msrb.mxu2 %v6116_v46  ;;  %v6556_v17 = vld [vmem:[#allocation20 + $0x104] sm:$0xf] }
 0x9ff   : > { %4385 = vmatpush.bf16.msrb.mxu3 %v6196_v7  ;;  %v6576_v7 = vld [vmem:[#allocation20 + $0x1a4] sm:$0xf]  ;;  %v6076_v12 = vor.u32 %v6556_v17, %v6073_v8 }
 0xa01   : > { %4346 = vmatpush.bf16.msrb.mxu0 %v5980_v14  ;;  %4360 = vmatpush.bf16.msrb.mxu1 %v6044_v13  ;;  %v6105_v14 = vld [vmem:[#allocation20 + $0x148] sm:$0xf0]  ;;  %v6012_v13 = vor.u32 %v6540_v2, %v6009_v30 }
 0xa02   : > { %v6108_v60 = vor.u32 %v6564_v53, %v6105_v14 }
 0xa03   : > { %4386 = vmatpush.bf16.msrb.mxu3 %v6188_v35  ;;  %v6574_v35 = vld [vmem:[#allocation20 + $0x194] sm:$0xf] }
 0xa04   : > { %4374 = vmatpush.bf16.msrb.mxu2 %v6108_v60 }
 0xa05   : > { %4347 = vmatpush.bf16.msrb.mxu0 %v5972_v4  ;;  %4361 = vmatpush.bf16.msrb.mxu1 %v6036_v61  ;;  %v6180_v4 = vor.u32 %v6582_v9, %v6177_v62  ;;  %v6140_v9 = vor.u32 %v6572_v19, %v6137_v41 }
 0xa07   : > { %4387 = vmatpush.bf16.msrb.mxu3 %v6180_v4 }
 0xa08   : > { %4375 = vmatpush.bf16.msrb.mxu2 %v6100_v5 }
 0xa09   : > { %4348 = vmatpush.bf16.msrb.mxu0 %v5964_v21  ;;  %4362 = vmatpush.bf16.msrb.mxu1 %v6028_v48 }
 0xa0b   : > { %4388 = vmatpush.bf16.msrb.mxu3 %v6172_v34 }
 0xa0c   : > { %4376 = vmatpush.bf16.msrb.mxu2 %v6092_v26 }
 0xa0d   : > { %4349 = vmatpush.bf16.msrb.mxu0 %v5956_v42  ;;  %4363 = vmatpush.bf16.msrb.mxu1 %v6020_v25  ;;  %v6153_v42 = vld [vmem:[#allocation20 + $0x1a8] sm:$0xf0] }
 0xa0e   : > { %v6156_v46 = vor.u32 %v6576_v7, %v6153_v42 }
 0xa0f   : > { %4389 = vmatpush.bf16.msrb.mxu3 %v6164_v31 }
 0xa11   : > { %4350 = vmatpush.bf16.msrb.mxu0 %v5948_v16  ;;  %4364 = vmatpush.bf16.msrb.mxu1 %v6012_v13  ;;  %v3454_v16 = vperm.slane %v7856_v10, 3 }
 0xa13   : > { %4390 = vmatpush.bf16.msrb.mxu3 %v6156_v46 }
 0xa50   : > { %v3788_v32 = vpop.f32.mrf.mxu0  ;;  %v3802_v33 = vpop.f32.mrf.mxu1 }
 0xa51   : > { %v3789_v49 = vadd.f32 %v3788_v32, %v3451_v11  ;;  %v6558_v32 = vld [vmem:[#allocation20 + $0x114] sm:$0xf] }
 0xa53   : > { %v3803_v0 = vadd.f32 %v3802_v33, %v3789_v49  ;;  %v6081_v33 = vld [vmem:[#allocation20 + $0x118] sm:$0xf0] }
 0xa54   : > { %v6084_v24 = vor.u32 %v6558_v32, %v6081_v33  ;;  %v6145_v49 = vld [vmem:[#allocation20 + $0x198] sm:$0xf0] }
 0xa55   : > { %v3891_v23 = vmax.f32 %v3803_v0, 0.0 }
 0xa56   : > { %4377 = vmatpush.bf16.msrb.mxu2 %v6084_v24 }
 0xa57   : > { %v3816_v54 = vpop.f32.mrf.mxu2  ;;  %v3830_v55 = vpop.f32.mrf.mxu3 }
 0xa58   : > { %v3790_v57 = vpop.f32.mrf.mxu0  ;;  %v3804_v58 = vpop.f32.mrf.mxu1  ;;  %v3817_v21 = vadd.f32 %v3816_v54, %v3452_v50 }
 0xa59   : > { %v3791_v3 = vadd.f32 %v3790_v57, %v3451_v11 }
 0xa5a   : > { %v3831_v61 = vadd.f32 %v3830_v55, %v3817_v21  ;;  %v6148_v55 = vor.u32 %v6574_v35, %v6145_v49  ;;  %4378 = vmatpush.bf16.msrb.mxu2 %v6076_v12  ;;  %v4403_v21 = vld [vmem:[%s7970_s25] sm:$0x3] }
 0xa5b   : > { %v3805_v6 = vadd.f32 %v3804_v58, %v3791_v3  ;;  %v4405_v26 = vperm.slane %v4403_v21, 0  ;;  %v4406_v46 = vperm.slane %v4403_v21, 1 }
 0xa5c   : > { %v3892_v1 = vmax.f32 %v3831_v61, 0.0  ;;  %4391 = vmatpush.bf16.msrb.mxu3 %v6148_v55 }
 0xa5d   : > { %v3895_v11 = vmax.f32 %v3805_v6, 0.0 }
 0xa5f   : > { %v3899_v27 = vpack.c.bf16 %v3895_v11, %v3891_v23  ;;  %v3818_v28 = vpop.f32.mrf.mxu2  ;;  %v3832_v29 = vpop.f32.mrf.mxu3 }
 0xa60   : > { %v3819_v36 = vadd.f32 %v3818_v28, %v3452_v50  ;;  %v3844_v39 = vpop.f32.mrf.mxu0  ;;  %v3858_v40 = vpop.f32.mrf.mxu1  ;;  %4392 = vmatpush.bf16.msrb.mxu3 %v6140_v9 }
 0xa61   : > { %4295 = vmatmul.bf16.vlgmr.msra.gmra.mxu0 %v3899_v27  ;;  %v3845_v52 = vadd.f32 %v3844_v39, %v3453_v43 }
 0xa62   : > { %v3833_v44 = vadd.f32 %v3832_v29, %v3819_v36 }
 0xa63   : > { %v3859_v57 = vadd.f32 %v3858_v40, %v3845_v52 }
 0xa64   : > { %v3896_v48 = vmax.f32 %v3833_v44, 0.0 }
 0xa65   : > { %v3893_v63 = vmax.f32 %v3859_v57, 0.0 }
 0xa66   : > { %v3900_v50 = vpack.c.bf16 %v3896_v48, %v3892_v1 }
 0xa67   : > { %v3872_v53 = vpop.f32.mrf.mxu2  ;;  %v3886_v54 = vpop.f32.mrf.mxu3 }
 0xa68   : > { %4309 = vmatmul.bf16.vlgmr.msra.gmra.mxu1 %v3900_v50  ;;  %v3846_v14 = vpop.f32.mrf.mxu0  ;;  %v3860_v60 = vpop.f32.mrf.mxu1  ;;  %v3873_v62 = vadd.f32 %v3872_v53, %v3454_v16 }
 0xa69   : > { %v3847_v58 = vadd.f32 %v3846_v14, %v3453_v43 }
 0xa6a   : > { %v3887_v56 = vadd.f32 %v3886_v54, %v3873_v62 }
 0xa6b   : > { %v3861_v25 = vadd.f32 %v3860_v60, %v3847_v58 }
 0xa6c   : > { %v3894_v5 = vmax.f32 %v3887_v56, 0.0 }
 0xa6d   : > { %v3897_v0 = vmax.f32 %v3861_v25, 0.0 }
 0xa6f   : > { %v3901_v3 = vpack.c.bf16 %v3897_v0, %v3893_v63  ;;  %v3874_v4 = vpop.f32.mrf.mxu2  ;;  %v3888_v10 = vpop.f32.mrf.mxu3 }
 0xa70   : > { %v3875_v2 = vadd.f32 %v3874_v4, %v3454_v16 }
 0xa71   : > { %4323 = vmatmul.bf16.vlgmr.msra.gmra.mxu2 %v3901_v3  ;;  %4351 = vmatmul.bf16.vlgmr.msrb.gmra.mxu0 %v3899_v27 }
 0xa72   : > { %v3889_v30 = vadd.f32 %v3888_v10, %v3875_v2 }
 0xa74   : > { %v3898_v18 = vmax.f32 %v3889_v30, 0.0 }
 0xa76   : > { %v3902_v47 = vpack.c.bf16 %v3898_v18, %v3894_v5 }
 0xa78   : > { %4337 = vmatmul.bf16.vlgmr.msra.gmra.mxu3 %v3902_v47  ;;  %4365 = vmatmul.bf16.vlgmr.msrb.gmra.mxu1 %v3900_v50 }
 0xa81   : > { %4379 = vmatmul.bf16.vlgmr.msrb.gmra.mxu2 %v3901_v3 }
 0xa88   : > { %4393 = vmatmul.bf16.vlgmr.msrb.gmra.mxu3 %v3902_v47 }
 0xade   : > { %v4296_v13 = vpop.f32.mrf.mxu0 }
 0xae5   : > { %v4310_v6 = vpop.f32.mrf.mxu1 }
 0xae6   : > { %v4311_v15 = vadd.f32 %v4310_v6, %v4296_v13  ;;  %v4298_v51 = vpop.f32.mrf.mxu0 }
 0xaed   : > { %v4312_v20 = vpop.f32.mrf.mxu1 }
 0xaee   : > { %v4313_v29 = vadd.f32 %v4312_v20, %v4298_v51  ;;  %v4352_v39 = vpop.f32.mrf.mxu0 }
 0xaf4   : > { %v4324_v34 = vpop.f32.mrf.mxu2 }
 0xaf5   : > { %v4325_v22 = vadd.f32 %v4324_v34, %v4311_v15  ;;  %v4366_v33 = vpop.f32.mrf.mxu1 }
 0xaf6   : > { %v4367_v42 = vadd.f32 %v4366_v33, %v4352_v39  ;;  %v4354_v1 = vpop.f32.mrf.mxu0 }
 0xafb   : > { %v4338_v23 = vpop.f32.mrf.mxu3 }
 0xafc   : > { %v4339_v11 = vadd.f32 %v4338_v23, %v4325_v22  ;;  %v4326_v27 = vpop.f32.mrf.mxu2 }
 0xafd   : > { %v4327_v32 = vadd.f32 %v4326_v27, %v4313_v29  ;;  %v4368_v17 = vpop.f32.mrf.mxu1 }
 0xafe   : > { %v4399_v28 = vadd.f32 %v4339_v11, %v7781_v37  ;;  %v4369_v35 = vadd.f32 %v4368_v17, %v4354_v1 }
 0xb00   : > { %v4409_v31 = vadd.f32 %v4405_v26, %v4399_v28 }
 0xb02   : > { %4413 = vst [vmem:[%s7867_s14] sm:$0xff] %v4409_v31 }
 0xb03   : > { %v4340_v61 = vpop.f32.mrf.mxu3 }
 0xb04   : > { %v4341_v36 = vadd.f32 %v4340_v61, %v4327_v32  ;;  %v4380_v40 = vpop.f32.mrf.mxu2 }
 0xb05   : > { %v4381_v37 = vadd.f32 %v4380_v40, %v4367_v42 }
 0xb06   : > { %v4401_v7 = vadd.f32 %v4341_v36, %v7789_v45 }
 0xb08   : > { %v4411_v43 = vadd.f32 %v4405_v26, %v4401_v7 }
 0xb0a   : > { %4415 = vst [vmem:[%s7867_s14 + $0x10] sm:$0xff] %v4411_v43 }
 0xb0b   : > { %v4394_v44 = vpop.f32.mrf.mxu3 }
 0xb0c   : > { %v4395_v24 = vadd.f32 %v4394_v44, %v4381_v37  ;;  %v4382_v48 = vpop.f32.mrf.mxu2 }
 0xb0d   : > { %v4383_v45 = vadd.f32 %v4382_v48, %v4369_v35 }
 0xb0e   : > { %v4400_v8 = vadd.f32 %v4395_v24, %v7784_v38 }
 0xb10   : > { %v4410_v49 = vadd.f32 %v4406_v46, %v4400_v8 }
 0xb12   : > { %4414 = vst [vmem:[%s7867_s14 + $0x8] sm:$0xff] %v4410_v49 }
 0xb13   : > { %v4396_v52 = vpop.f32.mrf.mxu3 }
 0xb14   : > { %v4397_v50 = vadd.f32 %v4396_v52, %v4383_v45 }
 0xb16   : > { %v4402_v38 = vadd.f32 %v4397_v50, %v7792_v59 }
 0xb18   : > { %v4412_v12 = vadd.f32 %v4406_v46, %v4402_v38 }
 0xb1a   : > { %4416 = vst [vmem:[%s7867_s14 + $0x18] sm:$0xff] %v4412_v12 }
 0xb1b   : > { %7195 = shalt.err (!%p7192_p8)
}
 0xb1c   : > { %s7281_s5 = smov 256   ;;  %s7282_s30 = smov 16  }
 0xb1d   : > { %6633 = dma.vmem_to_hbm [thread:$0]  (%p7499_p4), %s4431_s2, 512, %s4433_s16, %s4418_s28, %s7281_s5, %s7281_s5, %s7282_s30  }
 0xb1e PF: > { %s4447_s12 = sand.u32 1, %s7250_s21   ;;  %p7972_p10 = scmp.ge.s32.totalorder %s7262_s24, 2 }
 0xb1f   : > { %s4448_s25 = scalar_lea.sflag [#allocation4], %s4447_s12 }
 0xb20   : > { %p6674_p13 = pnand %p7972_p10, %p7503_p6 }
 0xb22   : > { %p6675_p11 = pneg %p6674_p13 }
 0xb24   : > { %7245 = dma.done.wait (%p6675_p11), %s4448_s25, 512  }
 0xb25   : > { %7247 = vsyncadd (%p6675_p11), %s4448_s25, 4294966784  ;;  %p37_p0 = scmp.ge.s32.totalorder %s7471_s17, 4   ;;  %s7973_s21 = smov %s7254_s22 }
 0xb26   : > { %s7974_s22 = smov %s7258_s23  ;;  %s7975_s23 = smov %s7482_s3 }
 0xb27   : > { %s7976_s24 = smov %s7471_s17  ;;  %39 = sbr.rel (!%p37_p0) target bundleno = 29 (0x1d), region = 182 }
 0xb2c   :  { %4454 = vsyncpa [#allocation3], 1 }
 0xb2d   :  { %4456 = vsyncpa [#allocation3 + $0x1], 1 }
 0xb2e   :  { %4457 = vsyncpa [#allocation6], 1 }
 0xb2f   :  { %4459 = vsyncpa [#allocation6 + $0x1], 1 }
 0xb30   :  { %4460 = vsyncpa [#allocation9], 1 }
 0xb31   :  { %4461 = vsyncpa [#allocation12], 1 }
 0xb32   :  { %4462 = vsyncpa [#allocation15], 1 }
 0xb33   :  { %4463 = vsyncpa [#allocation18], 1 }
 0xb34   :  { %4464 = vsyncpa [#allocation21], 1 }
 0xb35   :  { %4465 = vsyncpa [#allocation4], 1 }
 0xb36   :  { %4467 = vsyncpa [#allocation4 + $0x1], 1 }

</bundles_post_ra>
